<compile_context>
chip_gen: v6e
topology: v6e:2x2x1
jax: 0.10.0
libtpu: 0.0.40
codegen_flags: <defaults>
</compile_context>

<pallas_src>
import functools

import jax
import jax.numpy as jnp
from jax.experimental import pallas as pl
from jax.experimental.pallas import tpu as pltpu


def _round_up(x, m):
    return ((x + m - 1) // m) * m


# ----------------------------------------------------------------------------
# Fused kernel: stacked LSTM over all time steps + final FC, one invocation.
# ----------------------------------------------------------------------------
def fused_lstm_classifier_kernel(x_ref, *refs, num_layers, seq_len, batch, hp):
    """Argument layout (after x_ref):
        inputs : w_ih_0 (Hp,4Hp) bf16, w_hh_0 (Hp,4Hp) bf16,
                 b_0 .. b_{L-1} (1,4Hp) f32,
                 [w_ih_l, w_hh_l in HBM (pl.ANY) for l=1..L-1],
                 wfc (Hp,Cp) bf16, bfc (1,Cp) f32
        outputs: out (B, Cp) f32
        scratch: xw   (T*B, 4Hp) f32   -- per-layer input projection
                 hseq (T*B, Hp)  bf16  -- per-layer output sequence
                 [wbuf (L-1, 2, Hp, 4Hp) bf16, sem DMA (L-1, 2)]  if L > 1
    """
    L, T, B, Hp = num_layers, seq_len, batch, hp

    idx = 0
    wih0_ref = refs[idx]; idx += 1
    whh0_ref = refs[idx]; idx += 1
    b_refs = refs[idx:idx + L]; idx += L
    n_hbm = L - 1
    hbm_w_refs = refs[idx:idx + 2 * n_hbm]; idx += 2 * n_hbm
    wfc_ref = refs[idx]; idx += 1
    bfc_ref = refs[idx]; idx += 1
    out_ref = refs[idx]; idx += 1
    xw_ref = refs[idx]; idx += 1
    hseq_ref = refs[idx]; idx += 1
    if n_hbm > 0:
        wbuf_ref = refs[idx]; idx += 1
        sem_ref = refs[idx]; idx += 1

    # ---- Kick off layer>=1 weight DMAs; they overlap with layer-0 compute. ----
    copies = []
    for l in range(1, L):
        cp_i = pltpu.make_async_copy(hbm_w_refs[2 * (l - 1) + 0],
                                     wbuf_ref.at[l - 1, 0],
                                     sem_ref.at[l - 1, 0])
        cp_h = pltpu.make_async_copy(hbm_w_refs[2 * (l - 1) + 1],
                                     wbuf_ref.at[l - 1, 1],
                                     sem_ref.at[l - 1, 1])
        cp_i.start()
        cp_h.start()
        copies.append((cp_i, cp_h))

    def sig(y):
        # Weights/bias of i/f/o gates are pre-scaled by 0.5 in prepare_params,
        # so sigmoid(z) == 0.5 * tanh(0.5*z) + 0.5 == 0.5 * tanh(y) + 0.5.
        return 0.5 * jnp.tanh(y) + 0.5

    h_last = None
    for l in range(L):
        last_layer = (l == L - 1)

        # ---- batched input projection for all T steps (one MXU matmul) ----
        if l == 0:
            inp_b = x_ref[...].astype(jnp.bfloat16)        # (T*B, Hp)
            wih_view = wih0_ref
            whh_view = whh0_ref
        else:
            cp_i, cp_h = copies[l - 1]
            cp_i.wait()
            cp_h.wait()
            inp_b = hseq_ref[...]                          # (T*B, Hp) bf16
            wih_view = wbuf_ref.at[l - 1, 0]
            whh_view = wbuf_ref.at[l - 1, 1]

        xw_ref[...] = (jnp.dot(inp_b, wih_view[...],
                               preferred_element_type=jnp.float32)
                       + b_refs[l][...])                   # (T*B, 4Hp) f32

        # ---- serial recurrence: only h @ W_hh per step ----
        h = jnp.zeros((B, Hp), jnp.float32)
        c = jnp.zeros((B, Hp), jnp.float32)
        hb = jnp.zeros((B, Hp), jnp.bfloat16)
        for t in range(T):
            z = (xw_ref[pl.ds(t * B, B), :]
                 + jnp.dot(hb, whh_view[...],
                           preferred_element_type=jnp.float32))   # (B, 4Hp)
            # Lane-aligned static gate views (PyTorch order i, f, g, o).
            i_g = sig(z[:, 0 * Hp:1 * Hp])
            f_g = sig(z[:, 1 * Hp:2 * Hp])
            g_g = jnp.tanh(z[:, 2 * Hp:3 * Hp])
            o_g = sig(z[:, 3 * Hp:4 * Hp])
            c = f_g * c + i_g * g_g
            h = o_g * jnp.tanh(c)
            hb = h.astype(jnp.bfloat16)
            if not last_layer:
                hseq_ref[pl.ds(t * B, B), :] = hb
        h_last = hb

    # ---- final Linear on h_n[-1]; lane-dense (B, Cp) store ----
    out_ref[...] = (jnp.dot(h_last, wfc_ref[...],
                            preferred_element_type=jnp.float32)
                    + bfc_ref[...])


# ----------------------------------------------------------------------------
# One-time parameter preparation (transpose / pad / bias fusion / bf16 cast).
# ----------------------------------------------------------------------------
def prepare_params(params, hidden_size, num_classes):
    H = hidden_size
    Hp = max(128, _round_up(H, 128))
    Cp = max(128, _round_up(num_classes, 128))
    # Fold the 0.5 of the tanh-based sigmoid into i/f/o gate columns.
    gate_scale = (0.5, 0.5, 1.0, 0.5)

    def gate_pad_cols(w_t, n_rows):
        # (K, 4H) -> (n_rows, 4*Hp): gate g at columns [g*Hp, g*Hp + H),
        # scaled by gate_scale[g]; padded rows/cols are zero.
        K = w_t.shape[0]
        out = jnp.zeros((n_rows, 4 * Hp), jnp.float32)
        for g in range(4):
            out = out.at[:K, g * Hp:g * Hp + H].set(
                gate_scale[g] * w_t[:, g * H:(g + 1) * H])
        return out

    layers = []
    for layer in params["lstm"]:
        w_ih = jnp.asarray(layer["w_ih"], jnp.float32)      # (4H, Fin_raw)
        w_hh = jnp.asarray(layer["w_hh"], jnp.float32)      # (4H, H)
        w_ih_p = gate_pad_cols(w_ih.T, Hp).astype(jnp.bfloat16)  # (Hp, 4Hp)
        w_hh_p = gate_pad_cols(w_hh.T, Hp).astype(jnp.bfloat16)  # (Hp, 4Hp)
        bias = gate_pad_cols(
            (layer["b_ih"] + layer["b_hh"]).astype(jnp.float32).reshape(1, 4 * H),
            1)                                              # (1, 4Hp) f32
        layers.append((w_ih_p, w_hh_p, bias))

    wfc = jnp.zeros((Hp, Cp), jnp.float32)
    wfc = wfc.at[:H, :num_classes].set(
        jnp.asarray(params["fc_w"], jnp.float32).T).astype(jnp.bfloat16)
    bfc = jnp.zeros((1, Cp), jnp.float32)
    bfc = bfc.at[:, :num_classes].set(jnp.asarray(params["fc_b"], jnp.float32))
    return {"Hp": Hp, "Cp": Cp, "C": num_classes, "layers": layers,
            "fc": (wfc, bfc)}


# ----------------------------------------------------------------------------
# Forward wrapper: one pallas_call for the whole model.
# ----------------------------------------------------------------------------
def lstm_classifier_forward(x_btf, prepped):
    """x_btf: (B, T, input_size) -> logits (B, num_classes)."""
    B, T, F0 = x_btf.shape
    Hp, Cp, C = prepped["Hp"], prepped["Cp"], prepped["C"]
    layers = prepped["layers"]
    L = len(layers)
    wfc, bfc = prepped["fc"]

    # Time-major, flattened to (T*B, F0), feature dim zero-padded to Hp lanes.
    x_tb = jnp.transpose(jnp.asarray(x_btf, jnp.float32), (1, 0, 2))
    x_tb = x_tb.reshape(T * B, F0)
    x_pad = jnp.zeros((T * B, Hp), jnp.float32).at[:, :F0].set(x_tb)

    inputs = [x_pad, layers[0][0], layers[0][1]]
    in_specs = [
        pl.BlockSpec((T * B, Hp), lambda i: (0, 0)),
        pl.BlockSpec((Hp, 4 * Hp), lambda i: (0, 0)),
        pl.BlockSpec((Hp, 4 * Hp), lambda i: (0, 0)),
    ]
    for (_, _, bias) in layers:
        inputs.append(bias)
        in_specs.append(pl.BlockSpec((1, 4 * Hp), lambda i: (0, 0)))
    # Layer>=1 weights stay in HBM; the kernel DMAs them behind layer-0 compute.
    for (w_ih_p, w_hh_p, _) in layers[1:]:
        inputs.extend([w_ih_p, w_hh_p])
        in_specs.extend([pl.BlockSpec(memory_space=pl.ANY),
                         pl.BlockSpec(memory_space=pl.ANY)])
    inputs.extend([wfc, bfc])
    in_specs.extend([pl.BlockSpec((Hp, Cp), lambda i: (0, 0)),
                     pl.BlockSpec((1, Cp), lambda i: (0, 0))])

    scratch_shapes = [
        pltpu.VMEM((T * B, 4 * Hp), jnp.float32),   # per-layer input projection
        pltpu.VMEM((T * B, Hp), jnp.bfloat16),      # per-layer h sequence
    ]
    if L > 1:
        scratch_shapes.append(pltpu.VMEM((L - 1, 2, Hp, 4 * Hp), jnp.bfloat16))
        scratch_shapes.append(pltpu.SemaphoreType.DMA((L - 1, 2)))

    kernel = functools.partial(fused_lstm_classifier_kernel,
                               num_layers=L, seq_len=T, batch=B, hp=Hp)

    out_padded = pl.pallas_call(
        kernel,
        out_shape=jax.ShapeDtypeStruct((B, Cp), jnp.float32),
        grid_spec=pltpu.PrefetchScalarGridSpec(
            num_scalar_prefetch=0,
            grid=(1,),
            in_specs=in_specs,
            out_specs=pl.BlockSpec((B, Cp), lambda i: (0, 0)),
            scratch_shapes=tuple(scratch_shapes)),
        compiler_params=pltpu.CompilerParams(
            dimension_semantics=("arbitrary",)),
    )(*inputs)
    return out_padded[:, :C]


# ----------------------------------------------------------------------------
# Deterministic parameter init (PyTorch shapes, uniform(-1/sqrt(H), 1/sqrt(H))).
# ----------------------------------------------------------------------------
def init_params(key, input_size, hidden_size, num_layers, num_classes):
    bound = 1.0 / jnp.sqrt(jnp.float32(hidden_size))
    params = {"lstm": []}
    for layer in range(num_layers):
        in_feat = input_size if layer == 0 else hidden_size
        key, k1, k2, k3, k4 = jax.random.split(key, 5)
        params["lstm"].append({
            "w_ih": jax.random.uniform(k1, (4 * hidden_size, in_feat),
                                       jnp.float32, -bound, bound),
            "w_hh": jax.random.uniform(k2, (4 * hidden_size, hidden_size),
                                       jnp.float32, -bound, bound),
            "b_ih": jax.random.uniform(k3, (4 * hidden_size,),
                                       jnp.float32, -bound, bound),
            "b_hh": jax.random.uniform(k4, (4 * hidden_size,),
                                       jnp.float32, -bound, bound),
        })
    key, k5, k6 = jax.random.split(key, 3)
    params["fc_w"] = jax.random.uniform(k5, (num_classes, hidden_size),
                                        jnp.float32, -bound, bound)
    params["fc_b"] = jax.random.uniform(k6, (num_classes,),
                                        jnp.float32, -bound, bound)
    return params


# ----------------------------------------------------------------------------
# Pure-JAX f32 reference (matches the PyTorch module).
# ----------------------------------------------------------------------------
def reference_forward(x_btf, params, hidden_size):
    B, T, _ = x_btf.shape
    H = hidden_size
    seq = x_btf
    for layer in params["lstm"]:
        w_ih, w_hh = layer["w_ih"], layer["w_hh"]
        b = layer["b_ih"] + layer["b_hh"]
        h = jnp.zeros((B, H), jnp.float32)
        c = jnp.zeros((B, H), jnp.float32)
        outs = []
        for t in range(T):
            g = seq[:, t, :] @ w_ih.T + h @ w_hh.T + b
            i_g = jax.nn.sigmoid(g[:, 0 * H:1 * H])
            f_g = jax.nn.sigmoid(g[:, 1 * H:2 * H])
            g_g = jnp.tanh(g[:, 2 * H:3 * H])
            o_g = jax.nn.sigmoid(g[:, 3 * H:4 * H])
            c = f_g * c + i_g * g_g
            h = o_g * jnp.tanh(c)
            outs.append(h)
        seq = jnp.stack(outs, axis=1)
    last_hidden = seq[:, -1, :]
    return last_hidden @ params["fc_w"].T + params["fc_b"]


if __name__ == "__main__":
    # Shapes consistent with the module: input_size=6 (problemDim),
    # hidden_size=48, num_layers=2, num_classes=4, batch=2, seq=8.
    batch, seq_len = 2, 8
    input_size, hidden_size = 6, 48
    num_layers, num_classes = 2, 4

    key = jax.random.PRNGKey(0)
    key, kx, kp = jax.random.split(key, 3)
    x = jax.random.normal(kx, (batch, seq_len, input_size), jnp.float32)
    params = init_params(kp, input_size, hidden_size, num_layers, num_classes)

    prepped = prepare_params(params, hidden_size, num_classes)  # one-time prep

    logits = lstm_classifier_forward(x, prepped)
    logits = jax.block_until_ready(logits)

    ref = reference_forward(x, params, hidden_size)
    assert logits.shape == (batch, num_classes)
    # bf16 matmul operands -> loosened tolerance vs. the f32 reference.
    assert jnp.allclose(logits, ref, atol=5e-2, rtol=5e-2), (
        f"mismatch: {logits} vs {ref}")

    print("KERNEL_OK")
</pallas_src>

<mosaic_0001>
module attributes {stable_mosaic.version = 11 : i64} {
  func.func @fused_lstm_classifier_kernel(%arg0: i32, %arg1: memref<16x128xf32, #tpu.memory_space<vmem>>, %arg2: memref<128x512xbf16, #tpu.memory_space<vmem>>, %arg3: memref<128x512xbf16, #tpu.memory_space<vmem>>, %arg4: memref<1x512xf32, #tpu.memory_space<vmem>>, %arg5: memref<1x512xf32, #tpu.memory_space<vmem>>, %arg6: memref<128x512xbf16, #tpu.memory_space<any>>, %arg7: memref<128x512xbf16, #tpu.memory_space<any>>, %arg8: memref<128x128xbf16, #tpu.memory_space<vmem>>, %arg9: memref<1x128xf32, #tpu.memory_space<vmem>>, %arg10: memref<2x128xf32, #tpu.memory_space<vmem>>, %arg11: memref<16x512xf32, #tpu.memory_space<vmem>>, %arg12: memref<16x128xbf16, #tpu.memory_space<vmem>>, %arg13: memref<1x2x128x512xbf16, #tpu.memory_space<vmem>>, %arg14: memref<1x2x!tpu.dma_semaphore, #tpu.memory_space<semaphore_mem>>) attributes {dimension_semantics = [#tpu.dimension_semantics<arbitrary>], iteration_bounds = array<i64: 1>, scalar_prefetch = 0 : i64, scratch_operands = 4 : i64, tpu.core_type = #tpu.core_type<tc>, window_params = [{pipeline_mode = #tpu.pipeline_mode<synchronous>, transform_indices = @transform_0, window_bounds = array<i64: 16, 128>}, {pipeline_mode = #tpu.pipeline_mode<synchronous>, transform_indices = @transform_1, window_bounds = array<i64: 128, 512>}, {pipeline_mode = #tpu.pipeline_mode<synchronous>, transform_indices = @transform_2, window_bounds = array<i64: 128, 512>}, {pipeline_mode = #tpu.pipeline_mode<synchronous>, transform_indices = @transform_3, window_bounds = array<i64: 1, 512>}, {pipeline_mode = #tpu.pipeline_mode<synchronous>, transform_indices = @transform_4, window_bounds = array<i64: 1, 512>}, {}, {}, {pipeline_mode = #tpu.pipeline_mode<synchronous>, transform_indices = @transform_7, window_bounds = array<i64: 128, 128>}, {pipeline_mode = #tpu.pipeline_mode<synchronous>, transform_indices = @transform_8, window_bounds = array<i64: 1, 128>}, {pipeline_mode = #tpu.pipeline_mode<synchronous>, transform_indices = @transform_9, window_bounds = array<i64: 2, 128>}]} {
    %c0_i32 = arith.constant 0 : i32
    %c0_i32_0 = arith.constant 0 : i32
    %c0_i32_1 = arith.constant 0 : i32
    %c0_i32_2 = arith.constant 0 : i32
    %c0_i32_3 = arith.constant 0 : i32
    %c0_i32_4 = arith.constant 0 : i32
    %0 = tpu.memref_slice %arg13[%c0_i32, %c0_i32_0, %c0_i32_3, %c0_i32_4] : memref<1x2x128x512xbf16, #tpu.memory_space<vmem>> -> memref<1x1x128x512xbf16, #tpu.memory_space<vmem>>
    %1 = tpu.memref_squeeze %0 : memref<1x1x128x512xbf16, #tpu.memory_space<vmem>> -> memref<128x512xbf16, #tpu.memory_space<vmem>>
    %2 = tpu.memref_slice %arg14[%c0_i32_1, %c0_i32_2] : memref<1x2x!tpu.dma_semaphore, #tpu.memory_space<semaphore_mem>> -> memref<1x1x!tpu.dma_semaphore, #tpu.memory_space<semaphore_mem>>
    %3 = tpu.memref_squeeze %2 : memref<1x1x!tpu.dma_semaphore, #tpu.memory_space<semaphore_mem>> -> memref<!tpu.dma_semaphore, #tpu.memory_space<semaphore_mem>>
    tpu.enqueue_dma source(%arg6 : memref<128x512xbf16, #tpu.memory_space<any>>) target(%1 : memref<128x512xbf16, #tpu.memory_space<vmem>>) target_semaphore(%3 : memref<!tpu.dma_semaphore, #tpu.memory_space<semaphore_mem>>)
    %c0_i32_5 = arith.constant 0 : i32
    %c1_i32 = arith.constant 1 : i32
    %c0_i32_6 = arith.constant 0 : i32
    %c1_i32_7 = arith.constant 1 : i32
    %c0_i32_8 = arith.constant 0 : i32
    %c0_i32_9 = arith.constant 0 : i32
    %4 = tpu.memref_slice %arg13[%c0_i32_5, %c1_i32, %c0_i32_8, %c0_i32_9] : memref<1x2x128x512xbf16, #tpu.memory_space<vmem>> -> memref<1x1x128x512xbf16, #tpu.memory_space<vmem>>
    %5 = tpu.memref_squeeze %4 : memref<1x1x128x512xbf16, #tpu.memory_space<vmem>> -> memref<128x512xbf16, #tpu.memory_space<vmem>>
    %6 = tpu.memref_slice %arg14[%c0_i32_6, %c1_i32_7] : memref<1x2x!tpu.dma_semaphore, #tpu.memory_space<semaphore_mem>> -> memref<1x1x!tpu.dma_semaphore, #tpu.memory_space<semaphore_mem>>
    %7 = tpu.memref_squeeze %6 : memref<1x1x!tpu.dma_semaphore, #tpu.memory_space<semaphore_mem>> -> memref<!tpu.dma_semaphore, #tpu.memory_space<semaphore_mem>>
    tpu.enqueue_dma source(%arg7 : memref<128x512xbf16, #tpu.memory_space<any>>) target(%5 : memref<128x512xbf16, #tpu.memory_space<vmem>>) target_semaphore(%7 : memref<!tpu.dma_semaphore, #tpu.memory_space<semaphore_mem>>)
    %c0 = arith.constant 0 : index
    %c0_10 = arith.constant 0 : index
    %8 = vector.load %arg1[%c0, %c0_10] : memref<16x128xf32, #tpu.memory_space<vmem>>, vector<16x128xf32>
    %9 = arith.truncf %8 : vector<16x128xf32> to vector<16x128xbf16>
    %c0_11 = arith.constant 0 : index
    %c0_12 = arith.constant 0 : index
    %10 = vector.load %arg2[%c0_11, %c0_12] : memref<128x512xbf16, #tpu.memory_space<vmem>>, vector<128x512xbf16>
    %cst = arith.constant dense<0.000000e+00> : vector<16x512xf32>
    %11 = tpu.matmul %9, %10, %cst {dimension_numbers = #tpu.dot_dimension_numbers<[1], [0], [0], [1], [0, 0, 1, 1], [], []>} : vector<16x128xbf16>, vector<128x512xbf16>, vector<16x512xf32> -> vector<16x512xf32>
    %c0_13 = arith.constant 0 : index
    %c0_14 = arith.constant 0 : index
    %12 = vector.load %arg4[%c0_13, %c0_14] : memref<1x512xf32, #tpu.memory_space<vmem>>, vector<1x512xf32>
    %13 = vector.broadcast %12 : vector<1x512xf32> to vector<16x512xf32>
    %14 = arith.addf %11, %13 : vector<16x512xf32>
    %c0_15 = arith.constant 0 : index
    %c0_16 = arith.constant 0 : index
    %15 = vector.load %arg11[%c0_15, %c0_16] : memref<16x512xf32, #tpu.memory_space<vmem>>, vector<16x512xf32>
    tpu.vector_store %arg11[%c0_15, %c0_16], %14 {strides = array<i32>} : memref<16x512xf32, #tpu.memory_space<vmem>>, vector<16x512xf32>,
    %cst_17 = arith.constant 0.000000e+00 : f32
    %16 = vector.broadcast %cst_17 : f32 to vector<2x128xf32>
    %cst_18 = arith.constant 0.000000e+00 : bf16
    %17 = vector.broadcast %cst_18 : bf16 to vector<2x128xbf16>
    %c0_19 = arith.constant 0 : index
    %c0_20 = arith.constant 0 : index
    %18 = vector.load %arg11[%c0_19, %c0_20] : memref<16x512xf32, #tpu.memory_space<vmem>>, vector<2x512xf32>
    %c0_21 = arith.constant 0 : index
    %c0_22 = arith.constant 0 : index
    %19 = vector.load %arg3[%c0_21, %c0_22] : memref<128x512xbf16, #tpu.memory_space<vmem>>, vector<128x512xbf16>
    %cst_23 = arith.constant dense<0.000000e+00> : vector<2x512xf32>
    %20 = tpu.matmul %17, %19, %cst_23 {dimension_numbers = #tpu.dot_dimension_numbers<[1], [0], [0], [1], [0, 0, 1, 1], [], []>} : vector<2x128xbf16>, vector<128x512xbf16>, vector<2x512xf32> -> vector<2x512xf32>
    %21 = arith.addf %18, %20 : vector<2x512xf32>
    %22 = vector.extract_strided_slice %21 {offsets = [0, 0], sizes = [2, 128], strides = [1, 1]} : vector<2x512xf32> to vector<2x128xf32>
    %23 = math.tanh %22 : vector<2x128xf32>
    %cst_24 = arith.constant 5.000000e-01 : f32
    %24 = vector.broadcast %cst_24 : f32 to vector<2x128xf32>
    %25 = arith.mulf %24, %23 : vector<2x128xf32>
    %cst_25 = arith.constant 5.000000e-01 : f32
    %26 = vector.broadcast %cst_25 : f32 to vector<2x128xf32>
    %27 = arith.addf %25, %26 : vector<2x128xf32>
    %28 = vector.extract_strided_slice %21 {offsets = [0, 128], sizes = [2, 128], strides = [1, 1]} : vector<2x512xf32> to vector<2x128xf32>
    %29 = math.tanh %28 : vector<2x128xf32>
    %cst_26 = arith.constant 5.000000e-01 : f32
    %30 = vector.broadcast %cst_26 : f32 to vector<2x128xf32>
    %31 = arith.mulf %30, %29 : vector<2x128xf32>
    %cst_27 = arith.constant 5.000000e-01 : f32
    %32 = vector.broadcast %cst_27 : f32 to vector<2x128xf32>
    %33 = arith.addf %31, %32 : vector<2x128xf32>
    %34 = vector.extract_strided_slice %21 {offsets = [0, 256], sizes = [2, 128], strides = [1, 1]} : vector<2x512xf32> to vector<2x128xf32>
    %35 = math.tanh %34 : vector<2x128xf32>
    %36 = vector.extract_strided_slice %21 {offsets = [0, 384], sizes = [2, 128], strides = [1, 1]} : vector<2x512xf32> to vector<2x128xf32>
    %37 = math.tanh %36 : vector<2x128xf32>
    %cst_28 = arith.constant 5.000000e-01 : f32
    %38 = vector.broadcast %cst_28 : f32 to vector<2x128xf32>
    %39 = arith.mulf %38, %37 : vector<2x128xf32>
    %cst_29 = arith.constant 5.000000e-01 : f32
    %40 = vector.broadcast %cst_29 : f32 to vector<2x128xf32>
    %41 = arith.addf %39, %40 : vector<2x128xf32>
    %42 = arith.mulf %33, %16 : vector<2x128xf32>
    %43 = arith.mulf %27, %35 : vector<2x128xf32>
    %44 = arith.addf %42, %43 : vector<2x128xf32>
    %45 = math.tanh %44 : vector<2x128xf32>
    %46 = arith.mulf %41, %45 : vector<2x128xf32>
    %47 = arith.truncf %46 : vector<2x128xf32> to vector<2x128xbf16>
    %c0_30 = arith.constant 0 : index
    %c0_31 = arith.constant 0 : index
    %48 = vector.load %arg12[%c0_30, %c0_31] : memref<16x128xbf16, #tpu.memory_space<vmem>>, vector<2x128xbf16>
    tpu.vector_store %arg12[%c0_30, %c0_31], %47 {strides = array<i32>} : memref<16x128xbf16, #tpu.memory_space<vmem>>, vector<2x128xbf16>,
    %c2 = arith.constant 2 : index
    %c0_32 = arith.constant 0 : index
    %49 = vector.load %arg11[%c2, %c0_32] : memref<16x512xf32, #tpu.memory_space<vmem>>, vector<2x512xf32>
    %c0_33 = arith.constant 0 : index
    %c0_34 = arith.constant 0 : index
    %50 = vector.load %arg3[%c0_33, %c0_34] : memref<128x512xbf16, #tpu.memory_space<vmem>>, vector<128x512xbf16>
    %cst_35 = arith.constant dense<0.000000e+00> : vector<2x512xf32>
    %51 = tpu.matmul %47, %50, %cst_35 {dimension_numbers = #tpu.dot_dimension_numbers<[1], [0], [0], [1], [0, 0, 1, 1], [], []>} : vector<2x128xbf16>, vector<128x512xbf16>, vector<2x512xf32> -> vector<2x512xf32>
    %52 = arith.addf %49, %51 : vector<2x512xf32>
    %53 = vector.extract_strided_slice %52 {offsets = [0, 0], sizes = [2, 128], strides = [1, 1]} : vector<2x512xf32> to vector<2x128xf32>
    %54 = math.tanh %53 : vector<2x128xf32>
    %cst_36 = arith.constant 5.000000e-01 : f32
    %55 = vector.broadcast %cst_36 : f32 to vector<2x128xf32>
    %56 = arith.mulf %55, %54 : vector<2x128xf32>
    %cst_37 = arith.constant 5.000000e-01 : f32
    %57 = vector.broadcast %cst_37 : f32 to vector<2x128xf32>
    %58 = arith.addf %56, %57 : vector<2x128xf32>
    %59 = vector.extract_strided_slice %52 {offsets = [0, 128], sizes = [2, 128], strides = [1, 1]} : vector<2x512xf32> to vector<2x128xf32>
    %60 = math.tanh %59 : vector<2x128xf32>
    %cst_38 = arith.constant 5.000000e-01 : f32
    %61 = vector.broadcast %cst_38 : f32 to vector<2x128xf32>
    %62 = arith.mulf %61, %60 : vector<2x128xf32>
    %cst_39 = arith.constant 5.000000e-01 : f32
    %63 = vector.broadcast %cst_39 : f32 to vector<2x128xf32>
    %64 = arith.addf %62, %63 : vector<2x128xf32>
    %65 = vector.extract_strided_slice %52 {offsets = [0, 256], sizes = [2, 128], strides = [1, 1]} : vector<2x512xf32> to vector<2x128xf32>
    %66 = math.tanh %65 : vector<2x128xf32>
    %67 = vector.extract_strided_slice %52 {offsets = [0, 384], sizes = [2, 128], strides = [1, 1]} : vector<2x512xf32> to vector<2x128xf32>
    %68 = math.tanh %67 : vector<2x128xf32>
    %cst_40 = arith.constant 5.000000e-01 : f32
    %69 = vector.broadcast %cst_40 : f32 to vector<2x128xf32>
    %70 = arith.mulf %69, %68 : vector<2x128xf32>
    %cst_41 = arith.constant 5.000000e-01 : f32
    %71 = vector.broadcast %cst_41 : f32 to vector<2x128xf32>
    %72 = arith.addf %70, %71 : vector<2x128xf32>
    %73 = arith.mulf %64, %44 : vector<2x128xf32>
    %74 = arith.mulf %58, %66 : vector<2x128xf32>
    %75 = arith.addf %73, %74 : vector<2x128xf32>
    %76 = math.tanh %75 : vector<2x128xf32>
    %77 = arith.mulf %72, %76 : vector<2x128xf32>
    %78 = arith.truncf %77 : vector<2x128xf32> to vector<2x128xbf16>
    %c2_42 = arith.constant 2 : index
    %c0_43 = arith.constant 0 : index
    %79 = vector.load %arg12[%c2_42, %c0_43] : memref<16x128xbf16, #tpu.memory_space<vmem>>, vector<2x128xbf16>
    tpu.vector_store %arg12[%c2_42, %c0_43], %78 {strides = array<i32>} : memref<16x128xbf16, #tpu.memory_space<vmem>>, vector<2x128xbf16>,
    %c4 = arith.constant 4 : index
    %c0_44 = arith.constant 0 : index
    %80 = vector.load %arg11[%c4, %c0_44] : memref<16x512xf32, #tpu.memory_space<vmem>>, vector<2x512xf32>
    %c0_45 = arith.constant 0 : index
    %c0_46 = arith.constant 0 : index
    %81 = vector.load %arg3[%c0_45, %c0_46] : memref<128x512xbf16, #tpu.memory_space<vmem>>, vector<128x512xbf16>
    %cst_47 = arith.constant dense<0.000000e+00> : vector<2x512xf32>
    %82 = tpu.matmul %78, %81, %cst_47 {dimension_numbers = #tpu.dot_dimension_numbers<[1], [0], [0], [1], [0, 0, 1, 1], [], []>} : vector<2x128xbf16>, vector<128x512xbf16>, vector<2x512xf32> -> vector<2x512xf32>
    %83 = arith.addf %80, %82 : vector<2x512xf32>
    %84 = vector.extract_strided_slice %83 {offsets = [0, 0], sizes = [2, 128], strides = [1, 1]} : vector<2x512xf32> to vector<2x128xf32>
    %85 = math.tanh %84 : vector<2x128xf32>
    %cst_48 = arith.constant 5.000000e-01 : f32
    %86 = vector.broadcast %cst_48 : f32 to vector<2x128xf32>
    %87 = arith.mulf %86, %85 : vector<2x128xf32>
    %cst_49 = arith.constant 5.000000e-01 : f32
    %88 = vector.broadcast %cst_49 : f32 to vector<2x128xf32>
    %89 = arith.addf %87, %88 : vector<2x128xf32>
    %90 = vector.extract_strided_slice %83 {offsets = [0, 128], sizes = [2, 128], strides = [1, 1]} : vector<2x512xf32> to vector<2x128xf32>
    %91 = math.tanh %90 : vector<2x128xf32>
    %cst_50 = arith.constant 5.000000e-01 : f32
    %92 = vector.broadcast %cst_50 : f32 to vector<2x128xf32>
    %93 = arith.mulf %92, %91 : vector<2x128xf32>
    %cst_51 = arith.constant 5.000000e-01 : f32
    %94 = vector.broadcast %cst_51 : f32 to vector<2x128xf32>
    %95 = arith.addf %93, %94 : vector<2x128xf32>
    %96 = vector.extract_strided_slice %83 {offsets = [0, 256], sizes = [2, 128], strides = [1, 1]} : vector<2x512xf32> to vector<2x128xf32>
    %97 = math.tanh %96 : vector<2x128xf32>
    %98 = vector.extract_strided_slice %83 {offsets = [0, 384], sizes = [2, 128], strides = [1, 1]} : vector<2x512xf32> to vector<2x128xf32>
    %99 = math.tanh %98 : vector<2x128xf32>
    %cst_52 = arith.constant 5.000000e-01 : f32
    %100 = vector.broadcast %cst_52 : f32 to vector<2x128xf32>
    %101 = arith.mulf %100, %99 : vector<2x128xf32>
    %cst_53 = arith.constant 5.000000e-01 : f32
    %102 = vector.broadcast %cst_53 : f32 to vector<2x128xf32>
    %103 = arith.addf %101, %102 : vector<2x128xf32>
    %104 = arith.mulf %95, %75 : vector<2x128xf32>
    %105 = arith.mulf %89, %97 : vector<2x128xf32>
    %106 = arith.addf %104, %105 : vector<2x128xf32>
    %107 = math.tanh %106 : vector<2x128xf32>
    %108 = arith.mulf %103, %107 : vector<2x128xf32>
    %109 = arith.truncf %108 : vector<2x128xf32> to vector<2x128xbf16>
    %c4_54 = arith.constant 4 : index
    %c0_55 = arith.constant 0 : index
    %110 = vector.load %arg12[%c4_54, %c0_55] : memref<16x128xbf16, #tpu.memory_space<vmem>>, vector<2x128xbf16>
    tpu.vector_store %arg12[%c4_54, %c0_55], %109 {strides = array<i32>} : memref<16x128xbf16, #tpu.memory_space<vmem>>, vector<2x128xbf16>,
    %c6 = arith.constant 6 : index
    %c0_56 = arith.constant 0 : index
    %111 = vector.load %arg11[%c6, %c0_56] : memref<16x512xf32, #tpu.memory_space<vmem>>, vector<2x512xf32>
    %c0_57 = arith.constant 0 : index
    %c0_58 = arith.constant 0 : index
    %112 = vector.load %arg3[%c0_57, %c0_58] : memref<128x512xbf16, #tpu.memory_space<vmem>>, vector<128x512xbf16>
    %cst_59 = arith.constant dense<0.000000e+00> : vector<2x512xf32>
    %113 = tpu.matmul %109, %112, %cst_59 {dimension_numbers = #tpu.dot_dimension_numbers<[1], [0], [0], [1], [0, 0, 1, 1], [], []>} : vector<2x128xbf16>, vector<128x512xbf16>, vector<2x512xf32> -> vector<2x512xf32>
    %114 = arith.addf %111, %113 : vector<2x512xf32>
    %115 = vector.extract_strided_slice %114 {offsets = [0, 0], sizes = [2, 128], strides = [1, 1]} : vector<2x512xf32> to vector<2x128xf32>
    %116 = math.tanh %115 : vector<2x128xf32>
    %cst_60 = arith.constant 5.000000e-01 : f32
    %117 = vector.broadcast %cst_60 : f32 to vector<2x128xf32>
    %118 = arith.mulf %117, %116 : vector<2x128xf32>
    %cst_61 = arith.constant 5.000000e-01 : f32
    %119 = vector.broadcast %cst_61 : f32 to vector<2x128xf32>
    %120 = arith.addf %118, %119 : vector<2x128xf32>
    %121 = vector.extract_strided_slice %114 {offsets = [0, 128], sizes = [2, 128], strides = [1, 1]} : vector<2x512xf32> to vector<2x128xf32>
    %122 = math.tanh %121 : vector<2x128xf32>
    %cst_62 = arith.constant 5.000000e-01 : f32
    %123 = vector.broadcast %cst_62 : f32 to vector<2x128xf32>
    %124 = arith.mulf %123, %122 : vector<2x128xf32>
    %cst_63 = arith.constant 5.000000e-01 : f32
    %125 = vector.broadcast %cst_63 : f32 to vector<2x128xf32>
    %126 = arith.addf %124, %125 : vector<2x128xf32>
    %127 = vector.extract_strided_slice %114 {offsets = [0, 256], sizes = [2, 128], strides = [1, 1]} : vector<2x512xf32> to vector<2x128xf32>
    %128 = math.tanh %127 : vector<2x128xf32>
    %129 = vector.extract_strided_slice %114 {offsets = [0, 384], sizes = [2, 128], strides = [1, 1]} : vector<2x512xf32> to vector<2x128xf32>
    %130 = math.tanh %129 : vector<2x128xf32>
    %cst_64 = arith.constant 5.000000e-01 : f32
    %131 = vector.broadcast %cst_64 : f32 to vector<2x128xf32>
    %132 = arith.mulf %131, %130 : vector<2x128xf32>
    %cst_65 = arith.constant 5.000000e-01 : f32
    %133 = vector.broadcast %cst_65 : f32 to vector<2x128xf32>
    %134 = arith.addf %132, %133 : vector<2x128xf32>
    %135 = arith.mulf %126, %106 : vector<2x128xf32>
    %136 = arith.mulf %120, %128 : vector<2x128xf32>
    %137 = arith.addf %135, %136 : vector<2x128xf32>
    %138 = math.tanh %137 : vector<2x128xf32>
    %139 = arith.mulf %134, %138 : vector<2x128xf32>
    %140 = arith.truncf %139 : vector<2x128xf32> to vector<2x128xbf16>
    %c6_66 = arith.constant 6 : index
    %c0_67 = arith.constant 0 : index
    %141 = vector.load %arg12[%c6_66, %c0_67] : memref<16x128xbf16, #tpu.memory_space<vmem>>, vector<2x128xbf16>
    tpu.vector_store %arg12[%c6_66, %c0_67], %140 {strides = array<i32>} : memref<16x128xbf16, #tpu.memory_space<vmem>>, vector<2x128xbf16>,
    %c8 = arith.constant 8 : index
    %c0_68 = arith.constant 0 : index
    %142 = vector.load %arg11[%c8, %c0_68] : memref<16x512xf32, #tpu.memory_space<vmem>>, vector<2x512xf32>
    %c0_69 = arith.constant 0 : index
    %c0_70 = arith.constant 0 : index
    %143 = vector.load %arg3[%c0_69, %c0_70] : memref<128x512xbf16, #tpu.memory_space<vmem>>, vector<128x512xbf16>
    %cst_71 = arith.constant dense<0.000000e+00> : vector<2x512xf32>
    %144 = tpu.matmul %140, %143, %cst_71 {dimension_numbers = #tpu.dot_dimension_numbers<[1], [0], [0], [1], [0, 0, 1, 1], [], []>} : vector<2x128xbf16>, vector<128x512xbf16>, vector<2x512xf32> -> vector<2x512xf32>
    %145 = arith.addf %142, %144 : vector<2x512xf32>
    %146 = vector.extract_strided_slice %145 {offsets = [0, 0], sizes = [2, 128], strides = [1, 1]} : vector<2x512xf32> to vector<2x128xf32>
    %147 = math.tanh %146 : vector<2x128xf32>
    %cst_72 = arith.constant 5.000000e-01 : f32
    %148 = vector.broadcast %cst_72 : f32 to vector<2x128xf32>
    %149 = arith.mulf %148, %147 : vector<2x128xf32>
    %cst_73 = arith.constant 5.000000e-01 : f32
    %150 = vector.broadcast %cst_73 : f32 to vector<2x128xf32>
    %151 = arith.addf %149, %150 : vector<2x128xf32>
    %152 = vector.extract_strided_slice %145 {offsets = [0, 128], sizes = [2, 128], strides = [1, 1]} : vector<2x512xf32> to vector<2x128xf32>
    %153 = math.tanh %152 : vector<2x128xf32>
    %cst_74 = arith.constant 5.000000e-01 : f32
    %154 = vector.broadcast %cst_74 : f32 to vector<2x128xf32>
    %155 = arith.mulf %154, %153 : vector<2x128xf32>
    %cst_75 = arith.constant 5.000000e-01 : f32
    %156 = vector.broadcast %cst_75 : f32 to vector<2x128xf32>
    %157 = arith.addf %155, %156 : vector<2x128xf32>
    %158 = vector.extract_strided_slice %145 {offsets = [0, 256], sizes = [2, 128], strides = [1, 1]} : vector<2x512xf32> to vector<2x128xf32>
    %159 = math.tanh %158 : vector<2x128xf32>
    %160 = vector.extract_strided_slice %145 {offsets = [0, 384], sizes = [2, 128], strides = [1, 1]} : vector<2x512xf32> to vector<2x128xf32>
    %161 = math.tanh %160 : vector<2x128xf32>
    %cst_76 = arith.constant 5.000000e-01 : f32
    %162 = vector.broadcast %cst_76 : f32 to vector<2x128xf32>
    %163 = arith.mulf %162, %161 : vector<2x128xf32>
    %cst_77 = arith.constant 5.000000e-01 : f32
    %164 = vector.broadcast %cst_77 : f32 to vector<2x128xf32>
    %165 = arith.addf %163, %164 : vector<2x128xf32>
    %166 = arith.mulf %157, %137 : vector<2x128xf32>
    %167 = arith.mulf %151, %159 : vector<2x128xf32>
    %168 = arith.addf %166, %167 : vector<2x128xf32>
    %169 = math.tanh %168 : vector<2x128xf32>
    %170 = arith.mulf %165, %169 : vector<2x128xf32>
    %171 = arith.truncf %170 : vector<2x128xf32> to vector<2x128xbf16>
    %c8_78 = arith.constant 8 : index
    %c0_79 = arith.constant 0 : index
    %172 = vector.load %arg12[%c8_78, %c0_79] : memref<16x128xbf16, #tpu.memory_space<vmem>>, vector<2x128xbf16>
    tpu.vector_store %arg12[%c8_78, %c0_79], %171 {strides = array<i32>} : memref<16x128xbf16, #tpu.memory_space<vmem>>, vector<2x128xbf16>,
    %c10 = arith.constant 10 : index
    %c0_80 = arith.constant 0 : index
    %173 = vector.load %arg11[%c10, %c0_80] : memref<16x512xf32, #tpu.memory_space<vmem>>, vector<2x512xf32>
    %c0_81 = arith.constant 0 : index
    %c0_82 = arith.constant 0 : index
    %174 = vector.load %arg3[%c0_81, %c0_82] : memref<128x512xbf16, #tpu.memory_space<vmem>>, vector<128x512xbf16>
    %cst_83 = arith.constant dense<0.000000e+00> : vector<2x512xf32>
    %175 = tpu.matmul %171, %174, %cst_83 {dimension_numbers = #tpu.dot_dimension_numbers<[1], [0], [0], [1], [0, 0, 1, 1], [], []>} : vector<2x128xbf16>, vector<128x512xbf16>, vector<2x512xf32> -> vector<2x512xf32>
    %176 = arith.addf %173, %175 : vector<2x512xf32>
    %177 = vector.extract_strided_slice %176 {offsets = [0, 0], sizes = [2, 128], strides = [1, 1]} : vector<2x512xf32> to vector<2x128xf32>
    %178 = math.tanh %177 : vector<2x128xf32>
    %cst_84 = arith.constant 5.000000e-01 : f32
    %179 = vector.broadcast %cst_84 : f32 to vector<2x128xf32>
    %180 = arith.mulf %179, %178 : vector<2x128xf32>
    %cst_85 = arith.constant 5.000000e-01 : f32
    %181 = vector.broadcast %cst_85 : f32 to vector<2x128xf32>
    %182 = arith.addf %180, %181 : vector<2x128xf32>
    %183 = vector.extract_strided_slice %176 {offsets = [0, 128], sizes = [2, 128], strides = [1, 1]} : vector<2x512xf32> to vector<2x128xf32>
    %184 = math.tanh %183 : vector<2x128xf32>
    %cst_86 = arith.constant 5.000000e-01 : f32
    %185 = vector.broadcast %cst_86 : f32 to vector<2x128xf32>
    %186 = arith.mulf %185, %184 : vector<2x128xf32>
    %cst_87 = arith.constant 5.000000e-01 : f32
    %187 = vector.broadcast %cst_87 : f32 to vector<2x128xf32>
    %188 = arith.addf %186, %187 : vector<2x128xf32>
    %189 = vector.extract_strided_slice %176 {offsets = [0, 256], sizes = [2, 128], strides = [1, 1]} : vector<2x512xf32> to vector<2x128xf32>
    %190 = math.tanh %189 : vector<2x128xf32>
    %191 = vector.extract_strided_slice %176 {offsets = [0, 384], sizes = [2, 128], strides = [1, 1]} : vector<2x512xf32> to vector<2x128xf32>
    %192 = math.tanh %191 : vector<2x128xf32>
    %cst_88 = arith.constant 5.000000e-01 : f32
    %193 = vector.broadcast %cst_88 : f32 to vector<2x128xf32>
    %194 = arith.mulf %193, %192 : vector<2x128xf32>
    %cst_89 = arith.constant 5.000000e-01 : f32
    %195 = vector.broadcast %cst_89 : f32 to vector<2x128xf32>
    %196 = arith.addf %194, %195 : vector<2x128xf32>
    %197 = arith.mulf %188, %168 : vector<2x128xf32>
    %198 = arith.mulf %182, %190 : vector<2x128xf32>
    %199 = arith.addf %197, %198 : vector<2x128xf32>
    %200 = math.tanh %199 : vector<2x128xf32>
    %201 = arith.mulf %196, %200 : vector<2x128xf32>
    %202 = arith.truncf %201 : vector<2x128xf32> to vector<2x128xbf16>
    %c10_90 = arith.constant 10 : index
    %c0_91 = arith.constant 0 : index
    %203 = vector.load %arg12[%c10_90, %c0_91] : memref<16x128xbf16, #tpu.memory_space<vmem>>, vector<2x128xbf16>
    tpu.vector_store %arg12[%c10_90, %c0_91], %202 {strides = array<i32>} : memref<16x128xbf16, #tpu.memory_space<vmem>>, vector<2x128xbf16>,
    %c12 = arith.constant 12 : index
    %c0_92 = arith.constant 0 : index
    %204 = vector.load %arg11[%c12, %c0_92] : memref<16x512xf32, #tpu.memory_space<vmem>>, vector<2x512xf32>
    %c0_93 = arith.constant 0 : index
    %c0_94 = arith.constant 0 : index
    %205 = vector.load %arg3[%c0_93, %c0_94] : memref<128x512xbf16, #tpu.memory_space<vmem>>, vector<128x512xbf16>
    %cst_95 = arith.constant dense<0.000000e+00> : vector<2x512xf32>
    %206 = tpu.matmul %202, %205, %cst_95 {dimension_numbers = #tpu.dot_dimension_numbers<[1], [0], [0], [1], [0, 0, 1, 1], [], []>} : vector<2x128xbf16>, vector<128x512xbf16>, vector<2x512xf32> -> vector<2x512xf32>
    %207 = arith.addf %204, %206 : vector<2x512xf32>
    %208 = vector.extract_strided_slice %207 {offsets = [0, 0], sizes = [2, 128], strides = [1, 1]} : vector<2x512xf32> to vector<2x128xf32>
    %209 = math.tanh %208 : vector<2x128xf32>
    %cst_96 = arith.constant 5.000000e-01 : f32
    %210 = vector.broadcast %cst_96 : f32 to vector<2x128xf32>
    %211 = arith.mulf %210, %209 : vector<2x128xf32>
    %cst_97 = arith.constant 5.000000e-01 : f32
    %212 = vector.broadcast %cst_97 : f32 to vector<2x128xf32>
    %213 = arith.addf %211, %212 : vector<2x128xf32>
    %214 = vector.extract_strided_slice %207 {offsets = [0, 128], sizes = [2, 128], strides = [1, 1]} : vector<2x512xf32> to vector<2x128xf32>
    %215 = math.tanh %214 : vector<2x128xf32>
    %cst_98 = arith.constant 5.000000e-01 : f32
    %216 = vector.broadcast %cst_98 : f32 to vector<2x128xf32>
    %217 = arith.mulf %216, %215 : vector<2x128xf32>
    %cst_99 = arith.constant 5.000000e-01 : f32
    %218 = vector.broadcast %cst_99 : f32 to vector<2x128xf32>
    %219 = arith.addf %217, %218 : vector<2x128xf32>
    %220 = vector.extract_strided_slice %207 {offsets = [0, 256], sizes = [2, 128], strides = [1, 1]} : vector<2x512xf32> to vector<2x128xf32>
    %221 = math.tanh %220 : vector<2x128xf32>
    %222 = vector.extract_strided_slice %207 {offsets = [0, 384], sizes = [2, 128], strides = [1, 1]} : vector<2x512xf32> to vector<2x128xf32>
    %223 = math.tanh %222 : vector<2x128xf32>
    %cst_100 = arith.constant 5.000000e-01 : f32
    %224 = vector.broadcast %cst_100 : f32 to vector<2x128xf32>
    %225 = arith.mulf %224, %223 : vector<2x128xf32>
    %cst_101 = arith.constant 5.000000e-01 : f32
    %226 = vector.broadcast %cst_101 : f32 to vector<2x128xf32>
    %227 = arith.addf %225, %226 : vector<2x128xf32>
    %228 = arith.mulf %219, %199 : vector<2x128xf32>
    %229 = arith.mulf %213, %221 : vector<2x128xf32>
    %230 = arith.addf %228, %229 : vector<2x128xf32>
    %231 = math.tanh %230 : vector<2x128xf32>
    %232 = arith.mulf %227, %231 : vector<2x128xf32>
    %233 = arith.truncf %232 : vector<2x128xf32> to vector<2x128xbf16>
    %c12_102 = arith.constant 12 : index
    %c0_103 = arith.constant 0 : index
    %234 = vector.load %arg12[%c12_102, %c0_103] : memref<16x128xbf16, #tpu.memory_space<vmem>>, vector<2x128xbf16>
    tpu.vector_store %arg12[%c12_102, %c0_103], %233 {strides = array<i32>} : memref<16x128xbf16, #tpu.memory_space<vmem>>, vector<2x128xbf16>,
    %c14 = arith.constant 14 : index
    %c0_104 = arith.constant 0 : index
    %235 = vector.load %arg11[%c14, %c0_104] : memref<16x512xf32, #tpu.memory_space<vmem>>, vector<2x512xf32>
    %c0_105 = arith.constant 0 : index
    %c0_106 = arith.constant 0 : index
    %236 = vector.load %arg3[%c0_105, %c0_106] : memref<128x512xbf16, #tpu.memory_space<vmem>>, vector<128x512xbf16>
    %cst_107 = arith.constant dense<0.000000e+00> : vector<2x512xf32>
    %237 = tpu.matmul %233, %236, %cst_107 {dimension_numbers = #tpu.dot_dimension_numbers<[1], [0], [0], [1], [0, 0, 1, 1], [], []>} : vector<2x128xbf16>, vector<128x512xbf16>, vector<2x512xf32> -> vector<2x512xf32>
    %238 = arith.addf %235, %237 : vector<2x512xf32>
    %239 = vector.extract_strided_slice %238 {offsets = [0, 0], sizes = [2, 128], strides = [1, 1]} : vector<2x512xf32> to vector<2x128xf32>
    %240 = math.tanh %239 : vector<2x128xf32>
    %cst_108 = arith.constant 5.000000e-01 : f32
    %241 = vector.broadcast %cst_108 : f32 to vector<2x128xf32>
    %242 = arith.mulf %241, %240 : vector<2x128xf32>
    %cst_109 = arith.constant 5.000000e-01 : f32
    %243 = vector.broadcast %cst_109 : f32 to vector<2x128xf32>
    %244 = arith.addf %242, %243 : vector<2x128xf32>
    %245 = vector.extract_strided_slice %238 {offsets = [0, 128], sizes = [2, 128], strides = [1, 1]} : vector<2x512xf32> to vector<2x128xf32>
    %246 = math.tanh %245 : vector<2x128xf32>
    %cst_110 = arith.constant 5.000000e-01 : f32
    %247 = vector.broadcast %cst_110 : f32 to vector<2x128xf32>
    %248 = arith.mulf %247, %246 : vector<2x128xf32>
    %cst_111 = arith.constant 5.000000e-01 : f32
    %249 = vector.broadcast %cst_111 : f32 to vector<2x128xf32>
    %250 = arith.addf %248, %249 : vector<2x128xf32>
    %251 = vector.extract_strided_slice %238 {offsets = [0, 256], sizes = [2, 128], strides = [1, 1]} : vector<2x512xf32> to vector<2x128xf32>
    %252 = math.tanh %251 : vector<2x128xf32>
    %253 = vector.extract_strided_slice %238 {offsets = [0, 384], sizes = [2, 128], strides = [1, 1]} : vector<2x512xf32> to vector<2x128xf32>
    %254 = math.tanh %253 : vector<2x128xf32>
    %cst_112 = arith.constant 5.000000e-01 : f32
    %255 = vector.broadcast %cst_112 : f32 to vector<2x128xf32>
    %256 = arith.mulf %255, %254 : vector<2x128xf32>
    %cst_113 = arith.constant 5.000000e-01 : f32
    %257 = vector.broadcast %cst_113 : f32 to vector<2x128xf32>
    %258 = arith.addf %256, %257 : vector<2x128xf32>
    %259 = arith.mulf %250, %230 : vector<2x128xf32>
    %260 = arith.mulf %244, %252 : vector<2x128xf32>
    %261 = arith.addf %259, %260 : vector<2x128xf32>
    %262 = math.tanh %261 : vector<2x128xf32>
    %263 = arith.mulf %258, %262 : vector<2x128xf32>
    %264 = arith.truncf %263 : vector<2x128xf32> to vector<2x128xbf16>
    %c14_114 = arith.constant 14 : index
    %c0_115 = arith.constant 0 : index
    %265 = vector.load %arg12[%c14_114, %c0_115] : memref<16x128xbf16, #tpu.memory_space<vmem>>, vector<2x128xbf16>
    tpu.vector_store %arg12[%c14_114, %c0_115], %264 {strides = array<i32>} : memref<16x128xbf16, #tpu.memory_space<vmem>>, vector<2x128xbf16>,
    %c0_i32_116 = arith.constant 0 : i32
    %c0_i32_117 = arith.constant 0 : i32
    %c0_i32_118 = arith.constant 0 : i32
    %c0_i32_119 = arith.constant 0 : i32
    %c0_i32_120 = arith.constant 0 : i32
    %c0_i32_121 = arith.constant 0 : i32
    %266 = tpu.memref_slice %arg13[%c0_i32_116, %c0_i32_117, %c0_i32_120, %c0_i32_121] : memref<1x2x128x512xbf16, #tpu.memory_space<vmem>> -> memref<1x1x128x512xbf16, #tpu.memory_space<vmem>>
    %267 = tpu.memref_squeeze %266 : memref<1x1x128x512xbf16, #tpu.memory_space<vmem>> -> memref<128x512xbf16, #tpu.memory_space<vmem>>
    %268 = tpu.memref_slice %arg14[%c0_i32_118, %c0_i32_119] : memref<1x2x!tpu.dma_semaphore, #tpu.memory_space<semaphore_mem>> -> memref<1x1x!tpu.dma_semaphore, #tpu.memory_space<semaphore_mem>>
    %269 = tpu.memref_squeeze %268 : memref<1x1x!tpu.dma_semaphore, #tpu.memory_space<semaphore_mem>> -> memref<!tpu.dma_semaphore, #tpu.memory_space<semaphore_mem>>
    tpu.wait_dma2 semaphore(%269 : memref<!tpu.dma_semaphore, #tpu.memory_space<semaphore_mem>>) src(%arg6 : memref<128x512xbf16, #tpu.memory_space<any>>) dst(%267 : memref<128x512xbf16, #tpu.memory_space<vmem>>)
    %c0_i32_122 = arith.constant 0 : i32
    %c1_i32_123 = arith.constant 1 : i32
    %c0_i32_124 = arith.constant 0 : i32
    %c1_i32_125 = arith.constant 1 : i32
    %c0_i32_126 = arith.constant 0 : i32
    %c0_i32_127 = arith.constant 0 : i32
    %270 = tpu.memref_slice %arg13[%c0_i32_122, %c1_i32_123, %c0_i32_126, %c0_i32_127] : memref<1x2x128x512xbf16, #tpu.memory_space<vmem>> -> memref<1x1x128x512xbf16, #tpu.memory_space<vmem>>
    %271 = tpu.memref_squeeze %270 : memref<1x1x128x512xbf16, #tpu.memory_space<vmem>> -> memref<128x512xbf16, #tpu.memory_space<vmem>>
    %272 = tpu.memref_slice %arg14[%c0_i32_124, %c1_i32_125] : memref<1x2x!tpu.dma_semaphore, #tpu.memory_space<semaphore_mem>> -> memref<1x1x!tpu.dma_semaphore, #tpu.memory_space<semaphore_mem>>
    %273 = tpu.memref_squeeze %272 : memref<1x1x!tpu.dma_semaphore, #tpu.memory_space<semaphore_mem>> -> memref<!tpu.dma_semaphore, #tpu.memory_space<semaphore_mem>>
    tpu.wait_dma2 semaphore(%273 : memref<!tpu.dma_semaphore, #tpu.memory_space<semaphore_mem>>) src(%arg7 : memref<128x512xbf16, #tpu.memory_space<any>>) dst(%271 : memref<128x512xbf16, #tpu.memory_space<vmem>>)
    %c0_128 = arith.constant 0 : index
    %c0_129 = arith.constant 0 : index
    %274 = vector.load %arg12[%c0_128, %c0_129] : memref<16x128xbf16, #tpu.memory_space<vmem>>, vector<16x128xbf16>
    %c0_130 = arith.constant 0 : index
    %c0_131 = arith.constant 0 : index
    %c0_132 = arith.constant 0 : index
    %c0_133 = arith.constant 0 : index
    %275 = vector.load %arg13[%c0_130, %c0_131, %c0_132, %c0_133] : memref<1x2x128x512xbf16, #tpu.memory_space<vmem>>, vector<1x1x128x512xbf16>
    %276 = vector.shape_cast %275 : vector<1x1x128x512xbf16> to vector<128x512xbf16>
    %cst_134 = arith.constant dense<0.000000e+00> : vector<16x512xf32>
    %277 = tpu.matmul %274, %276, %cst_134 {dimension_numbers = #tpu.dot_dimension_numbers<[1], [0], [0], [1], [0, 0, 1, 1], [], []>} : vector<16x128xbf16>, vector<128x512xbf16>, vector<16x512xf32> -> vector<16x512xf32>
    %c0_135 = arith.constant 0 : index
    %c0_136 = arith.constant 0 : index
    %278 = vector.load %arg5[%c0_135, %c0_136] : memref<1x512xf32, #tpu.memory_space<vmem>>, vector<1x512xf32>
    %279 = vector.broadcast %278 : vector<1x512xf32> to vector<16x512xf32>
    %280 = arith.addf %277, %279 : vector<16x512xf32>
    %c0_137 = arith.constant 0 : index
    %c0_138 = arith.constant 0 : index
    %281 = vector.load %arg11[%c0_137, %c0_138] : memref<16x512xf32, #tpu.memory_space<vmem>>, vector<16x512xf32>
    tpu.vector_store %arg11[%c0_137, %c0_138], %280 {strides = array<i32>} : memref<16x512xf32, #tpu.memory_space<vmem>>, vector<16x512xf32>,
    %cst_139 = arith.constant 0.000000e+00 : f32
    %282 = vector.broadcast %cst_139 : f32 to vector<2x128xf32>
    %cst_140 = arith.constant 0.000000e+00 : bf16
    %283 = vector.broadcast %cst_140 : bf16 to vector<2x128xbf16>
    %c0_141 = arith.constant 0 : index
    %c0_142 = arith.constant 0 : index
    %284 = vector.load %arg11[%c0_141, %c0_142] : memref<16x512xf32, #tpu.memory_space<vmem>>, vector<2x512xf32>
    %c0_143 = arith.constant 0 : index
    %c1 = arith.constant 1 : index
    %c0_144 = arith.constant 0 : index
    %c0_145 = arith.constant 0 : index
    %285 = vector.load %arg13[%c0_143, %c1, %c0_144, %c0_145] : memref<1x2x128x512xbf16, #tpu.memory_space<vmem>>, vector<1x1x128x512xbf16>
    %286 = vector.shape_cast %285 : vector<1x1x128x512xbf16> to vector<128x512xbf16>
    %cst_146 = arith.constant dense<0.000000e+00> : vector<2x512xf32>
    %287 = tpu.matmul %283, %286, %cst_146 {dimension_numbers = #tpu.dot_dimension_numbers<[1], [0], [0], [1], [0, 0, 1, 1], [], []>} : vector<2x128xbf16>, vector<128x512xbf16>, vector<2x512xf32> -> vector<2x512xf32>
    %288 = arith.addf %284, %287 : vector<2x512xf32>
    %289 = vector.extract_strided_slice %288 {offsets = [0, 0], sizes = [2, 128], strides = [1, 1]} : vector<2x512xf32> to vector<2x128xf32>
    %290 = math.tanh %289 : vector<2x128xf32>
    %cst_147 = arith.constant 5.000000e-01 : f32
    %291 = vector.broadcast %cst_147 : f32 to vector<2x128xf32>
    %292 = arith.mulf %291, %290 : vector<2x128xf32>
    %cst_148 = arith.constant 5.000000e-01 : f32
    %293 = vector.broadcast %cst_148 : f32 to vector<2x128xf32>
    %294 = arith.addf %292, %293 : vector<2x128xf32>
    %295 = vector.extract_strided_slice %288 {offsets = [0, 128], sizes = [2, 128], strides = [1, 1]} : vector<2x512xf32> to vector<2x128xf32>
    %296 = math.tanh %295 : vector<2x128xf32>
    %cst_149 = arith.constant 5.000000e-01 : f32
    %297 = vector.broadcast %cst_149 : f32 to vector<2x128xf32>
    %298 = arith.mulf %297, %296 : vector<2x128xf32>
    %cst_150 = arith.constant 5.000000e-01 : f32
    %299 = vector.broadcast %cst_150 : f32 to vector<2x128xf32>
    %300 = arith.addf %298, %299 : vector<2x128xf32>
    %301 = vector.extract_strided_slice %288 {offsets = [0, 256], sizes = [2, 128], strides = [1, 1]} : vector<2x512xf32> to vector<2x128xf32>
    %302 = math.tanh %301 : vector<2x128xf32>
    %303 = vector.extract_strided_slice %288 {offsets = [0, 384], sizes = [2, 128], strides = [1, 1]} : vector<2x512xf32> to vector<2x128xf32>
    %304 = math.tanh %303 : vector<2x128xf32>
    %cst_151 = arith.constant 5.000000e-01 : f32
    %305 = vector.broadcast %cst_151 : f32 to vector<2x128xf32>
    %306 = arith.mulf %305, %304 : vector<2x128xf32>
    %cst_152 = arith.constant 5.000000e-01 : f32
    %307 = vector.broadcast %cst_152 : f32 to vector<2x128xf32>
    %308 = arith.addf %306, %307 : vector<2x128xf32>
    %309 = arith.mulf %300, %282 : vector<2x128xf32>
    %310 = arith.mulf %294, %302 : vector<2x128xf32>
    %311 = arith.addf %309, %310 : vector<2x128xf32>
    %312 = math.tanh %311 : vector<2x128xf32>
    %313 = arith.mulf %308, %312 : vector<2x128xf32>
    %314 = arith.truncf %313 : vector<2x128xf32> to vector<2x128xbf16>
    %c2_153 = arith.constant 2 : index
    %c0_154 = arith.constant 0 : index
    %315 = vector.load %arg11[%c2_153, %c0_154] : memref<16x512xf32, #tpu.memory_space<vmem>>, vector<2x512xf32>
    %c0_155 = arith.constant 0 : index
    %c1_156 = arith.constant 1 : index
    %c0_157 = arith.constant 0 : index
    %c0_158 = arith.constant 0 : index
    %316 = vector.load %arg13[%c0_155, %c1_156, %c0_157, %c0_158] : memref<1x2x128x512xbf16, #tpu.memory_space<vmem>>, vector<1x1x128x512xbf16>
    %317 = vector.shape_cast %316 : vector<1x1x128x512xbf16> to vector<128x512xbf16>
    %cst_159 = arith.constant dense<0.000000e+00> : vector<2x512xf32>
    %318 = tpu.matmul %314, %317, %cst_159 {dimension_numbers = #tpu.dot_dimension_numbers<[1], [0], [0], [1], [0, 0, 1, 1], [], []>} : vector<2x128xbf16>, vector<128x512xbf16>, vector<2x512xf32> -> vector<2x512xf32>
    %319 = arith.addf %315, %318 : vector<2x512xf32>
    %320 = vector.extract_strided_slice %319 {offsets = [0, 0], sizes = [2, 128], strides = [1, 1]} : vector<2x512xf32> to vector<2x128xf32>
    %321 = math.tanh %320 : vector<2x128xf32>
    %cst_160 = arith.constant 5.000000e-01 : f32
    %322 = vector.broadcast %cst_160 : f32 to vector<2x128xf32>
    %323 = arith.mulf %322, %321 : vector<2x128xf32>
    %cst_161 = arith.constant 5.000000e-01 : f32
    %324 = vector.broadcast %cst_161 : f32 to vector<2x128xf32>
    %325 = arith.addf %323, %324 : vector<2x128xf32>
    %326 = vector.extract_strided_slice %319 {offsets = [0, 128], sizes = [2, 128], strides = [1, 1]} : vector<2x512xf32> to vector<2x128xf32>
    %327 = math.tanh %326 : vector<2x128xf32>
    %cst_162 = arith.constant 5.000000e-01 : f32
    %328 = vector.broadcast %cst_162 : f32 to vector<2x128xf32>
    %329 = arith.mulf %328, %327 : vector<2x128xf32>
    %cst_163 = arith.constant 5.000000e-01 : f32
    %330 = vector.broadcast %cst_163 : f32 to vector<2x128xf32>
    %331 = arith.addf %329, %330 : vector<2x128xf32>
    %332 = vector.extract_strided_slice %319 {offsets = [0, 256], sizes = [2, 128], strides = [1, 1]} : vector<2x512xf32> to vector<2x128xf32>
    %333 = math.tanh %332 : vector<2x128xf32>
    %334 = vector.extract_strided_slice %319 {offsets = [0, 384], sizes = [2, 128], strides = [1, 1]} : vector<2x512xf32> to vector<2x128xf32>
    %335 = math.tanh %334 : vector<2x128xf32>
    %cst_164 = arith.constant 5.000000e-01 : f32
    %336 = vector.broadcast %cst_164 : f32 to vector<2x128xf32>
    %337 = arith.mulf %336, %335 : vector<2x128xf32>
    %cst_165 = arith.constant 5.000000e-01 : f32
    %338 = vector.broadcast %cst_165 : f32 to vector<2x128xf32>
    %339 = arith.addf %337, %338 : vector<2x128xf32>
    %340 = arith.mulf %331, %311 : vector<2x128xf32>
    %341 = arith.mulf %325, %333 : vector<2x128xf32>
    %342 = arith.addf %340, %341 : vector<2x128xf32>
    %343 = math.tanh %342 : vector<2x128xf32>
    %344 = arith.mulf %339, %343 : vector<2x128xf32>
    %345 = arith.truncf %344 : vector<2x128xf32> to vector<2x128xbf16>
    %c4_166 = arith.constant 4 : index
    %c0_167 = arith.constant 0 : index
    %346 = vector.load %arg11[%c4_166, %c0_167] : memref<16x512xf32, #tpu.memory_space<vmem>>, vector<2x512xf32>
    %c0_168 = arith.constant 0 : index
    %c1_169 = arith.constant 1 : index
    %c0_170 = arith.constant 0 : index
    %c0_171 = arith.constant 0 : index
    %347 = vector.load %arg13[%c0_168, %c1_169, %c0_170, %c0_171] : memref<1x2x128x512xbf16, #tpu.memory_space<vmem>>, vector<1x1x128x512xbf16>
    %348 = vector.shape_cast %347 : vector<1x1x128x512xbf16> to vector<128x512xbf16>
    %cst_172 = arith.constant dense<0.000000e+00> : vector<2x512xf32>
    %349 = tpu.matmul %345, %348, %cst_172 {dimension_numbers = #tpu.dot_dimension_numbers<[1], [0], [0], [1], [0, 0, 1, 1], [], []>} : vector<2x128xbf16>, vector<128x512xbf16>, vector<2x512xf32> -> vector<2x512xf32>
    %350 = arith.addf %346, %349 : vector<2x512xf32>
    %351 = vector.extract_strided_slice %350 {offsets = [0, 0], sizes = [2, 128], strides = [1, 1]} : vector<2x512xf32> to vector<2x128xf32>
    %352 = math.tanh %351 : vector<2x128xf32>
    %cst_173 = arith.constant 5.000000e-01 : f32
    %353 = vector.broadcast %cst_173 : f32 to vector<2x128xf32>
    %354 = arith.mulf %353, %352 : vector<2x128xf32>
    %cst_174 = arith.constant 5.000000e-01 : f32
    %355 = vector.broadcast %cst_174 : f32 to vector<2x128xf32>
    %356 = arith.addf %354, %355 : vector<2x128xf32>
    %357 = vector.extract_strided_slice %350 {offsets = [0, 128], sizes = [2, 128], strides = [1, 1]} : vector<2x512xf32> to vector<2x128xf32>
    %358 = math.tanh %357 : vector<2x128xf32>
    %cst_175 = arith.constant 5.000000e-01 : f32
    %359 = vector.broadcast %cst_175 : f32 to vector<2x128xf32>
    %360 = arith.mulf %359, %358 : vector<2x128xf32>
    %cst_176 = arith.constant 5.000000e-01 : f32
    %361 = vector.broadcast %cst_176 : f32 to vector<2x128xf32>
    %362 = arith.addf %360, %361 : vector<2x128xf32>
    %363 = vector.extract_strided_slice %350 {offsets = [0, 256], sizes = [2, 128], strides = [1, 1]} : vector<2x512xf32> to vector<2x128xf32>
    %364 = math.tanh %363 : vector<2x128xf32>
    %365 = vector.extract_strided_slice %350 {offsets = [0, 384], sizes = [2, 128], strides = [1, 1]} : vector<2x512xf32> to vector<2x128xf32>
    %366 = math.tanh %365 : vector<2x128xf32>
    %cst_177 = arith.constant 5.000000e-01 : f32
    %367 = vector.broadcast %cst_177 : f32 to vector<2x128xf32>
    %368 = arith.mulf %367, %366 : vector<2x128xf32>
    %cst_178 = arith.constant 5.000000e-01 : f32
    %369 = vector.broadcast %cst_178 : f32 to vector<2x128xf32>
    %370 = arith.addf %368, %369 : vector<2x128xf32>
    %371 = arith.mulf %362, %342 : vector<2x128xf32>
    %372 = arith.mulf %356, %364 : vector<2x128xf32>
    %373 = arith.addf %371, %372 : vector<2x128xf32>
    %374 = math.tanh %373 : vector<2x128xf32>
    %375 = arith.mulf %370, %374 : vector<2x128xf32>
    %376 = arith.truncf %375 : vector<2x128xf32> to vector<2x128xbf16>
    %c6_179 = arith.constant 6 : index
    %c0_180 = arith.constant 0 : index
    %377 = vector.load %arg11[%c6_179, %c0_180] : memref<16x512xf32, #tpu.memory_space<vmem>>, vector<2x512xf32>
    %c0_181 = arith.constant 0 : index
    %c1_182 = arith.constant 1 : index
    %c0_183 = arith.constant 0 : index
    %c0_184 = arith.constant 0 : index
    %378 = vector.load %arg13[%c0_181, %c1_182, %c0_183, %c0_184] : memref<1x2x128x512xbf16, #tpu.memory_space<vmem>>, vector<1x1x128x512xbf16>
    %379 = vector.shape_cast %378 : vector<1x1x128x512xbf16> to vector<128x512xbf16>
    %cst_185 = arith.constant dense<0.000000e+00> : vector<2x512xf32>
    %380 = tpu.matmul %376, %379, %cst_185 {dimension_numbers = #tpu.dot_dimension_numbers<[1], [0], [0], [1], [0, 0, 1, 1], [], []>} : vector<2x128xbf16>, vector<128x512xbf16>, vector<2x512xf32> -> vector<2x512xf32>
    %381 = arith.addf %377, %380 : vector<2x512xf32>
    %382 = vector.extract_strided_slice %381 {offsets = [0, 0], sizes = [2, 128], strides = [1, 1]} : vector<2x512xf32> to vector<2x128xf32>
    %383 = math.tanh %382 : vector<2x128xf32>
    %cst_186 = arith.constant 5.000000e-01 : f32
    %384 = vector.broadcast %cst_186 : f32 to vector<2x128xf32>
    %385 = arith.mulf %384, %383 : vector<2x128xf32>
    %cst_187 = arith.constant 5.000000e-01 : f32
    %386 = vector.broadcast %cst_187 : f32 to vector<2x128xf32>
    %387 = arith.addf %385, %386 : vector<2x128xf32>
    %388 = vector.extract_strided_slice %381 {offsets = [0, 128], sizes = [2, 128], strides = [1, 1]} : vector<2x512xf32> to vector<2x128xf32>
    %389 = math.tanh %388 : vector<2x128xf32>
    %cst_188 = arith.constant 5.000000e-01 : f32
    %390 = vector.broadcast %cst_188 : f32 to vector<2x128xf32>
    %391 = arith.mulf %390, %389 : vector<2x128xf32>
    %cst_189 = arith.constant 5.000000e-01 : f32
    %392 = vector.broadcast %cst_189 : f32 to vector<2x128xf32>
    %393 = arith.addf %391, %392 : vector<2x128xf32>
    %394 = vector.extract_strided_slice %381 {offsets = [0, 256], sizes = [2, 128], strides = [1, 1]} : vector<2x512xf32> to vector<2x128xf32>
    %395 = math.tanh %394 : vector<2x128xf32>
    %396 = vector.extract_strided_slice %381 {offsets = [0, 384], sizes = [2, 128], strides = [1, 1]} : vector<2x512xf32> to vector<2x128xf32>
    %397 = math.tanh %396 : vector<2x128xf32>
    %cst_190 = arith.constant 5.000000e-01 : f32
    %398 = vector.broadcast %cst_190 : f32 to vector<2x128xf32>
    %399 = arith.mulf %398, %397 : vector<2x128xf32>
    %cst_191 = arith.constant 5.000000e-01 : f32
    %400 = vector.broadcast %cst_191 : f32 to vector<2x128xf32>
    %401 = arith.addf %399, %400 : vector<2x128xf32>
    %402 = arith.mulf %393, %373 : vector<2x128xf32>
    %403 = arith.mulf %387, %395 : vector<2x128xf32>
    %404 = arith.addf %402, %403 : vector<2x128xf32>
    %405 = math.tanh %404 : vector<2x128xf32>
    %406 = arith.mulf %401, %405 : vector<2x128xf32>
    %407 = arith.truncf %406 : vector<2x128xf32> to vector<2x128xbf16>
    %c8_192 = arith.constant 8 : index
    %c0_193 = arith.constant 0 : index
    %408 = vector.load %arg11[%c8_192, %c0_193] : memref<16x512xf32, #tpu.memory_space<vmem>>, vector<2x512xf32>
    %c0_194 = arith.constant 0 : index
    %c1_195 = arith.constant 1 : index
    %c0_196 = arith.constant 0 : index
    %c0_197 = arith.constant 0 : index
    %409 = vector.load %arg13[%c0_194, %c1_195, %c0_196, %c0_197] : memref<1x2x128x512xbf16, #tpu.memory_space<vmem>>, vector<1x1x128x512xbf16>
    %410 = vector.shape_cast %409 : vector<1x1x128x512xbf16> to vector<128x512xbf16>
    %cst_198 = arith.constant dense<0.000000e+00> : vector<2x512xf32>
    %411 = tpu.matmul %407, %410, %cst_198 {dimension_numbers = #tpu.dot_dimension_numbers<[1], [0], [0], [1], [0, 0, 1, 1], [], []>} : vector<2x128xbf16>, vector<128x512xbf16>, vector<2x512xf32> -> vector<2x512xf32>
    %412 = arith.addf %408, %411 : vector<2x512xf32>
    %413 = vector.extract_strided_slice %412 {offsets = [0, 0], sizes = [2, 128], strides = [1, 1]} : vector<2x512xf32> to vector<2x128xf32>
    %414 = math.tanh %413 : vector<2x128xf32>
    %cst_199 = arith.constant 5.000000e-01 : f32
    %415 = vector.broadcast %cst_199 : f32 to vector<2x128xf32>
    %416 = arith.mulf %415, %414 : vector<2x128xf32>
    %cst_200 = arith.constant 5.000000e-01 : f32
    %417 = vector.broadcast %cst_200 : f32 to vector<2x128xf32>
    %418 = arith.addf %416, %417 : vector<2x128xf32>
    %419 = vector.extract_strided_slice %412 {offsets = [0, 128], sizes = [2, 128], strides = [1, 1]} : vector<2x512xf32> to vector<2x128xf32>
    %420 = math.tanh %419 : vector<2x128xf32>
    %cst_201 = arith.constant 5.000000e-01 : f32
    %421 = vector.broadcast %cst_201 : f32 to vector<2x128xf32>
    %422 = arith.mulf %421, %420 : vector<2x128xf32>
    %cst_202 = arith.constant 5.000000e-01 : f32
    %423 = vector.broadcast %cst_202 : f32 to vector<2x128xf32>
    %424 = arith.addf %422, %423 : vector<2x128xf32>
    %425 = vector.extract_strided_slice %412 {offsets = [0, 256], sizes = [2, 128], strides = [1, 1]} : vector<2x512xf32> to vector<2x128xf32>
    %426 = math.tanh %425 : vector<2x128xf32>
    %427 = vector.extract_strided_slice %412 {offsets = [0, 384], sizes = [2, 128], strides = [1, 1]} : vector<2x512xf32> to vector<2x128xf32>
    %428 = math.tanh %427 : vector<2x128xf32>
    %cst_203 = arith.constant 5.000000e-01 : f32
    %429 = vector.broadcast %cst_203 : f32 to vector<2x128xf32>
    %430 = arith.mulf %429, %428 : vector<2x128xf32>
    %cst_204 = arith.constant 5.000000e-01 : f32
    %431 = vector.broadcast %cst_204 : f32 to vector<2x128xf32>
    %432 = arith.addf %430, %431 : vector<2x128xf32>
    %433 = arith.mulf %424, %404 : vector<2x128xf32>
    %434 = arith.mulf %418, %426 : vector<2x128xf32>
    %435 = arith.addf %433, %434 : vector<2x128xf32>
    %436 = math.tanh %435 : vector<2x128xf32>
    %437 = arith.mulf %432, %436 : vector<2x128xf32>
    %438 = arith.truncf %437 : vector<2x128xf32> to vector<2x128xbf16>
    %c10_205 = arith.constant 10 : index
    %c0_206 = arith.constant 0 : index
    %439 = vector.load %arg11[%c10_205, %c0_206] : memref<16x512xf32, #tpu.memory_space<vmem>>, vector<2x512xf32>
    %c0_207 = arith.constant 0 : index
    %c1_208 = arith.constant 1 : index
    %c0_209 = arith.constant 0 : index
    %c0_210 = arith.constant 0 : index
    %440 = vector.load %arg13[%c0_207, %c1_208, %c0_209, %c0_210] : memref<1x2x128x512xbf16, #tpu.memory_space<vmem>>, vector<1x1x128x512xbf16>
    %441 = vector.shape_cast %440 : vector<1x1x128x512xbf16> to vector<128x512xbf16>
    %cst_211 = arith.constant dense<0.000000e+00> : vector<2x512xf32>
    %442 = tpu.matmul %438, %441, %cst_211 {dimension_numbers = #tpu.dot_dimension_numbers<[1], [0], [0], [1], [0, 0, 1, 1], [], []>} : vector<2x128xbf16>, vector<128x512xbf16>, vector<2x512xf32> -> vector<2x512xf32>
    %443 = arith.addf %439, %442 : vector<2x512xf32>
    %444 = vector.extract_strided_slice %443 {offsets = [0, 0], sizes = [2, 128], strides = [1, 1]} : vector<2x512xf32> to vector<2x128xf32>
    %445 = math.tanh %444 : vector<2x128xf32>
    %cst_212 = arith.constant 5.000000e-01 : f32
    %446 = vector.broadcast %cst_212 : f32 to vector<2x128xf32>
    %447 = arith.mulf %446, %445 : vector<2x128xf32>
    %cst_213 = arith.constant 5.000000e-01 : f32
    %448 = vector.broadcast %cst_213 : f32 to vector<2x128xf32>
    %449 = arith.addf %447, %448 : vector<2x128xf32>
    %450 = vector.extract_strided_slice %443 {offsets = [0, 128], sizes = [2, 128], strides = [1, 1]} : vector<2x512xf32> to vector<2x128xf32>
    %451 = math.tanh %450 : vector<2x128xf32>
    %cst_214 = arith.constant 5.000000e-01 : f32
    %452 = vector.broadcast %cst_214 : f32 to vector<2x128xf32>
    %453 = arith.mulf %452, %451 : vector<2x128xf32>
    %cst_215 = arith.constant 5.000000e-01 : f32
    %454 = vector.broadcast %cst_215 : f32 to vector<2x128xf32>
    %455 = arith.addf %453, %454 : vector<2x128xf32>
    %456 = vector.extract_strided_slice %443 {offsets = [0, 256], sizes = [2, 128], strides = [1, 1]} : vector<2x512xf32> to vector<2x128xf32>
    %457 = math.tanh %456 : vector<2x128xf32>
    %458 = vector.extract_strided_slice %443 {offsets = [0, 384], sizes = [2, 128], strides = [1, 1]} : vector<2x512xf32> to vector<2x128xf32>
    %459 = math.tanh %458 : vector<2x128xf32>
    %cst_216 = arith.constant 5.000000e-01 : f32
    %460 = vector.broadcast %cst_216 : f32 to vector<2x128xf32>
    %461 = arith.mulf %460, %459 : vector<2x128xf32>
    %cst_217 = arith.constant 5.000000e-01 : f32
    %462 = vector.broadcast %cst_217 : f32 to vector<2x128xf32>
    %463 = arith.addf %461, %462 : vector<2x128xf32>
    %464 = arith.mulf %455, %435 : vector<2x128xf32>
    %465 = arith.mulf %449, %457 : vector<2x128xf32>
    %466 = arith.addf %464, %465 : vector<2x128xf32>
    %467 = math.tanh %466 : vector<2x128xf32>
    %468 = arith.mulf %463, %467 : vector<2x128xf32>
    %469 = arith.truncf %468 : vector<2x128xf32> to vector<2x128xbf16>
    %c12_218 = arith.constant 12 : index
    %c0_219 = arith.constant 0 : index
    %470 = vector.load %arg11[%c12_218, %c0_219] : memref<16x512xf32, #tpu.memory_space<vmem>>, vector<2x512xf32>
    %c0_220 = arith.constant 0 : index
    %c1_221 = arith.constant 1 : index
    %c0_222 = arith.constant 0 : index
    %c0_223 = arith.constant 0 : index
    %471 = vector.load %arg13[%c0_220, %c1_221, %c0_222, %c0_223] : memref<1x2x128x512xbf16, #tpu.memory_space<vmem>>, vector<1x1x128x512xbf16>
    %472 = vector.shape_cast %471 : vector<1x1x128x512xbf16> to vector<128x512xbf16>
    %cst_224 = arith.constant dense<0.000000e+00> : vector<2x512xf32>
    %473 = tpu.matmul %469, %472, %cst_224 {dimension_numbers = #tpu.dot_dimension_numbers<[1], [0], [0], [1], [0, 0, 1, 1], [], []>} : vector<2x128xbf16>, vector<128x512xbf16>, vector<2x512xf32> -> vector<2x512xf32>
    %474 = arith.addf %470, %473 : vector<2x512xf32>
    %475 = vector.extract_strided_slice %474 {offsets = [0, 0], sizes = [2, 128], strides = [1, 1]} : vector<2x512xf32> to vector<2x128xf32>
    %476 = math.tanh %475 : vector<2x128xf32>
    %cst_225 = arith.constant 5.000000e-01 : f32
    %477 = vector.broadcast %cst_225 : f32 to vector<2x128xf32>
    %478 = arith.mulf %477, %476 : vector<2x128xf32>
    %cst_226 = arith.constant 5.000000e-01 : f32
    %479 = vector.broadcast %cst_226 : f32 to vector<2x128xf32>
    %480 = arith.addf %478, %479 : vector<2x128xf32>
    %481 = vector.extract_strided_slice %474 {offsets = [0, 128], sizes = [2, 128], strides = [1, 1]} : vector<2x512xf32> to vector<2x128xf32>
    %482 = math.tanh %481 : vector<2x128xf32>
    %cst_227 = arith.constant 5.000000e-01 : f32
    %483 = vector.broadcast %cst_227 : f32 to vector<2x128xf32>
    %484 = arith.mulf %483, %482 : vector<2x128xf32>
    %cst_228 = arith.constant 5.000000e-01 : f32
    %485 = vector.broadcast %cst_228 : f32 to vector<2x128xf32>
    %486 = arith.addf %484, %485 : vector<2x128xf32>
    %487 = vector.extract_strided_slice %474 {offsets = [0, 256], sizes = [2, 128], strides = [1, 1]} : vector<2x512xf32> to vector<2x128xf32>
    %488 = math.tanh %487 : vector<2x128xf32>
    %489 = vector.extract_strided_slice %474 {offsets = [0, 384], sizes = [2, 128], strides = [1, 1]} : vector<2x512xf32> to vector<2x128xf32>
    %490 = math.tanh %489 : vector<2x128xf32>
    %cst_229 = arith.constant 5.000000e-01 : f32
    %491 = vector.broadcast %cst_229 : f32 to vector<2x128xf32>
    %492 = arith.mulf %491, %490 : vector<2x128xf32>
    %cst_230 = arith.constant 5.000000e-01 : f32
    %493 = vector.broadcast %cst_230 : f32 to vector<2x128xf32>
    %494 = arith.addf %492, %493 : vector<2x128xf32>
    %495 = arith.mulf %486, %466 : vector<2x128xf32>
    %496 = arith.mulf %480, %488 : vector<2x128xf32>
    %497 = arith.addf %495, %496 : vector<2x128xf32>
    %498 = math.tanh %497 : vector<2x128xf32>
    %499 = arith.mulf %494, %498 : vector<2x128xf32>
    %500 = arith.truncf %499 : vector<2x128xf32> to vector<2x128xbf16>
    %c14_231 = arith.constant 14 : index
    %c0_232 = arith.constant 0 : index
    %501 = vector.load %arg11[%c14_231, %c0_232] : memref<16x512xf32, #tpu.memory_space<vmem>>, vector<2x512xf32>
    %c0_233 = arith.constant 0 : index
    %c1_234 = arith.constant 1 : index
    %c0_235 = arith.constant 0 : index
    %c0_236 = arith.constant 0 : index
    %502 = vector.load %arg13[%c0_233, %c1_234, %c0_235, %c0_236] : memref<1x2x128x512xbf16, #tpu.memory_space<vmem>>, vector<1x1x128x512xbf16>
    %503 = vector.shape_cast %502 : vector<1x1x128x512xbf16> to vector<128x512xbf16>
    %cst_237 = arith.constant dense<0.000000e+00> : vector<2x512xf32>
    %504 = tpu.matmul %500, %503, %cst_237 {dimension_numbers = #tpu.dot_dimension_numbers<[1], [0], [0], [1], [0, 0, 1, 1], [], []>} : vector<2x128xbf16>, vector<128x512xbf16>, vector<2x512xf32> -> vector<2x512xf32>
    %505 = arith.addf %501, %504 : vector<2x512xf32>
    %506 = vector.extract_strided_slice %505 {offsets = [0, 0], sizes = [2, 128], strides = [1, 1]} : vector<2x512xf32> to vector<2x128xf32>
    %507 = math.tanh %506 : vector<2x128xf32>
    %cst_238 = arith.constant 5.000000e-01 : f32
    %508 = vector.broadcast %cst_238 : f32 to vector<2x128xf32>
    %509 = arith.mulf %508, %507 : vector<2x128xf32>
    %cst_239 = arith.constant 5.000000e-01 : f32
    %510 = vector.broadcast %cst_239 : f32 to vector<2x128xf32>
    %511 = arith.addf %509, %510 : vector<2x128xf32>
    %512 = vector.extract_strided_slice %505 {offsets = [0, 128], sizes = [2, 128], strides = [1, 1]} : vector<2x512xf32> to vector<2x128xf32>
    %513 = math.tanh %512 : vector<2x128xf32>
    %cst_240 = arith.constant 5.000000e-01 : f32
    %514 = vector.broadcast %cst_240 : f32 to vector<2x128xf32>
    %515 = arith.mulf %514, %513 : vector<2x128xf32>
    %cst_241 = arith.constant 5.000000e-01 : f32
    %516 = vector.broadcast %cst_241 : f32 to vector<2x128xf32>
    %517 = arith.addf %515, %516 : vector<2x128xf32>
    %518 = vector.extract_strided_slice %505 {offsets = [0, 256], sizes = [2, 128], strides = [1, 1]} : vector<2x512xf32> to vector<2x128xf32>
    %519 = math.tanh %518 : vector<2x128xf32>
    %520 = vector.extract_strided_slice %505 {offsets = [0, 384], sizes = [2, 128], strides = [1, 1]} : vector<2x512xf32> to vector<2x128xf32>
    %521 = math.tanh %520 : vector<2x128xf32>
    %cst_242 = arith.constant 5.000000e-01 : f32
    %522 = vector.broadcast %cst_242 : f32 to vector<2x128xf32>
    %523 = arith.mulf %522, %521 : vector<2x128xf32>
    %cst_243 = arith.constant 5.000000e-01 : f32
    %524 = vector.broadcast %cst_243 : f32 to vector<2x128xf32>
    %525 = arith.addf %523, %524 : vector<2x128xf32>
    %526 = arith.mulf %517, %497 : vector<2x128xf32>
    %527 = arith.mulf %511, %519 : vector<2x128xf32>
    %528 = arith.addf %526, %527 : vector<2x128xf32>
    %529 = math.tanh %528 : vector<2x128xf32>
    %530 = arith.mulf %525, %529 : vector<2x128xf32>
    %531 = arith.truncf %530 : vector<2x128xf32> to vector<2x128xbf16>
    %c0_244 = arith.constant 0 : index
    %c0_245 = arith.constant 0 : index
    %532 = vector.load %arg8[%c0_244, %c0_245] : memref<128x128xbf16, #tpu.memory_space<vmem>>, vector<128x128xbf16>
    %cst_246 = arith.constant dense<0.000000e+00> : vector<2x128xf32>
    %533 = tpu.matmul %531, %532, %cst_246 {dimension_numbers = #tpu.dot_dimension_numbers<[1], [0], [0], [1], [0, 0, 1, 1], [], []>} : vector<2x128xbf16>, vector<128x128xbf16>, vector<2x128xf32> -> vector<2x128xf32>
    %c0_247 = arith.constant 0 : index
    %c0_248 = arith.constant 0 : index
    %534 = vector.load %arg9[%c0_247, %c0_248] : memref<1x128xf32, #tpu.memory_space<vmem>>, vector<1x128xf32>
    %535 = vector.broadcast %534 : vector<1x128xf32> to vector<2x128xf32>
    %536 = arith.addf %533, %535 : vector<2x128xf32>
    %c0_249 = arith.constant 0 : index
    %c0_250 = arith.constant 0 : index
    %537 = vector.load %arg10[%c0_249, %c0_250] : memref<2x128xf32, #tpu.memory_space<vmem>>, vector<2x128xf32>
    tpu.vector_store %arg10[%c0_249, %c0_250], %536 {strides = array<i32>} : memref<2x128xf32, #tpu.memory_space<vmem>>, vector<2x128xf32>,
    return
  }
  func.func @transform_0(%arg0: i32) -> (i32, i32) {
    %c0_i32 = arith.constant 0 : i32
    %c0_i32_0 = arith.constant 0 : i32
    %c0_i32_1 = arith.constant 0 : i32
    return %c0_i32, %c0_i32_0 : i32, i32
  }
  func.func @transform_1(%arg0: i32) -> (i32, i32) {
    %c0_i32 = arith.constant 0 : i32
    %c0_i32_0 = arith.constant 0 : i32
    %c0_i32_1 = arith.constant 0 : i32
    return %c0_i32, %c0_i32_0 : i32, i32
  }
  func.func @transform_2(%arg0: i32) -> (i32, i32) {
    %c0_i32 = arith.constant 0 : i32
    %c0_i32_0 = arith.constant 0 : i32
    %c0_i32_1 = arith.constant 0 : i32
    return %c0_i32, %c0_i32_0 : i32, i32
  }
  func.func @transform_3(%arg0: i32) -> (i32, i32) {
    %c0_i32 = arith.constant 0 : i32
    %c0_i32_0 = arith.constant 0 : i32
    %c0_i32_1 = arith.constant 0 : i32
    return %c0_i32, %c0_i32_0 : i32, i32
  }
  func.func @transform_4(%arg0: i32) -> (i32, i32) {
    %c0_i32 = arith.constant 0 : i32
    %c0_i32_0 = arith.constant 0 : i32
    %c0_i32_1 = arith.constant 0 : i32
    return %c0_i32, %c0_i32_0 : i32, i32
  }
  func.func @transform_7(%arg0: i32) -> (i32, i32) {
    %c0_i32 = arith.constant 0 : i32
    %c0_i32_0 = arith.constant 0 : i32
    %c0_i32_1 = arith.constant 0 : i32
    return %c0_i32, %c0_i32_0 : i32, i32
  }
  func.func @transform_8(%arg0: i32) -> (i32, i32) {
    %c0_i32 = arith.constant 0 : i32
    %c0_i32_0 = arith.constant 0 : i32
    %c0_i32_1 = arith.constant 0 : i32
    return %c0_i32, %c0_i32_0 : i32, i32
  }
  func.func @transform_9(%arg0: i32) -> (i32, i32) {
    %c0_i32 = arith.constant 0 : i32
    %c0_i32_0 = arith.constant 0 : i32
    %c0_i32_1 = arith.constant 0 : i32
    return %c0_i32, %c0_i32_0 : i32, i32
  }
}

</mosaic_0001>

<bundles_post_ra>
// kernel: tpu_custom_call.1
= control target key start
LH: loop header
LB: loop body
LE: loop exit
PB: predicated region body
PF: predicated region fallthrough
CT: control target
= control target key end

     0   :  { %14 = vsyncpa [#allocation7], 0  ;;  %s6474_s0 = inlined_call_operand.hbm [shape: f32[16,128], index: 0, kind: input, shape index: {}]   ;;  %s6475_s1 = inlined_call_operand.hbm [shape: bf16[128,512], index: 1, kind: input, shape index: {}]   ;;  %s6476_s2 = inlined_call_operand.hbm [shape: bf16[128,512], index: 2, kind: input, shape index: {}]   ;;  %s6477_s3 = inlined_call_operand.vmem [shape: f32[1,512], index: 3, kind: input, shape index: {}]   ;;  %s6478_s4 = inlined_call_operand.hbm [shape: f32[1,512], index: 4, kind: input, shape index: {}]   ;;  %s6479_s5 = inlined_call_operand.hbm [shape: bf16[128,512], index: 5, kind: input, shape index: {}]   ;;  %s6480_s6 = inlined_call_operand.hbm [shape: bf16[128,512], index: 6, kind: input, shape index: {}]   ;;  %s6481_s7 = inlined_call_operand.hbm [shape: bf16[128,128], index: 7, kind: input, shape index: {}]   ;;  %s6482_s8 = inlined_call_operand.vmem [shape: f32[1,128], index: 8, kind: input, shape index: {}]   ;;  %s6483_s9 = inlined_call_operand.hbm [shape: f32[2,128], index: 9, kind: output, shape index: {}]  }
   0x1   :  { %15 = vsyncpa [#allocation10], 0 }
   0x2   :  { %16 = vsyncpa [#allocation13], 0 }
   0x3   :  { %17 = vsyncpa [#allocation8], 0  ;;  %s5569_s30 = smov [#allocation9]  }
   0x4   :  { %s35_s10 = sshll.u32 %s5569_s30, 4  ;;  %s36_s10 = int_to_ptr.vmem [resolvable:$true] %s35_s10 }
   0x5   :  { %s5405_s11 = scalar_lea.vmem %s36_s10, 4096  ;;  %p5410_p1 = scmp.lt.s32.totalorder %s36_s10, %s36_s10 }
   0x6   :  { %p5406_p0 = scmp.ne.s32.totalorder %s36_s10, %s5405_s11  ;;  %p5411_p2 = scmp.lt.s32.totalorder %s5405_s11, %s5405_s11 }
   0x8   :  { %p5412_p3 = por %p5411_p2, %p5410_p1 }
   0xa   :  { %p5413_p4 = pnand %p5412_p3, %p5406_p0 }
   0xc   :  { %5416 = shalt.err (!%p5413_p4)
}
   0xd   :  { %s5570_s12 = smov 256   ;;  %s5571_s13 = smov 16  }
   0xe   :  { %41 = dma.hbm_to_vmem [thread:$0]  %s6475_s1, 4096, %s36_s10, [#allocation10], %s5570_s12, %s5570_s12, %s5571_s13  }
   0xf   :  { %s5572_s16 = smov [#allocation12]   ;;  %s5573_s18 = smov [#allocation6]  }
  0x10   :  { %s62_s17 = sshll.u32 %s5572_s16, 4  ;;  %s23_s19 = sshll.u32 %s5573_s18, 4  ;;  %s63_s17 = int_to_ptr.vmem [resolvable:$true] %s62_s17  ;;  %s24_s19 = int_to_ptr.vmem [resolvable:$true] %s23_s19 }
  0x11   :  { %s5425_s20 = scalar_lea.vmem %s63_s17, 64  ;;  %p5430_p6 = scmp.lt.s32.totalorder %s63_s17, %s63_s17 }
  0x12   :  { %p5426_p5 = scmp.ne.s32.totalorder %s63_s17, %s5425_s20  ;;  %p5431_p7 = scmp.lt.s32.totalorder %s5425_s20, %s5425_s20 }
  0x14   :  { %p5432_p8 = por %p5431_p7, %p5430_p6 }
  0x16   :  { %p5433_p9 = pnand %p5432_p8, %p5426_p5 }
  0x18   :  { %5436 = shalt.err (!%p5433_p9)
}
  0x19   :  { %65 = dma.hbm_to_vmem [thread:$0]  %s6478_s4, 64, %s63_s17, [#allocation13]  }
  0x1a   :  { %s5445_s23 = scalar_lea.vmem %s24_s19, 256  ;;  %p5450_p11 = scmp.lt.s32.totalorder %s24_s19, %s24_s19 }
  0x1b   :  { %p5446_p10 = scmp.ne.s32.totalorder %s24_s19, %s5445_s23  ;;  %p5451_p12 = scmp.lt.s32.totalorder %s5445_s23, %s5445_s23 }
  0x1d   :  { %p5452_p13 = por %p5451_p12, %p5450_p11 }
  0x1f   :  { %p5453_p0 = pnand %p5452_p13, %p5446_p10 }
  0x21   :  { %5456 = shalt.err (!%p5453_p0)
}
  0x22   :  { %s5574_s1 = smov 128   ;;  %s5575_s24 = smov 8  }
  0x23   :  { %29 = dma.hbm_to_vmem [thread:$0]  %s6474_s0, 256, %s24_s19, [#allocation7], %s5574_s1, %s5574_s1, %s5575_s24  }
  0x24   :  { %s5576_s27 = smov [#allocation11]   ;;  %s5577_s29 = smov [#allocation14]  }
  0x25   :  { %s47_s28 = sshll.u32 %s5576_s27, 4  ;;  %s71_s30 = sshll.u32 %s5577_s29, 4  ;;  %s48_s28 = int_to_ptr.vmem [resolvable:$true] %s47_s28  ;;  %s72_s30 = int_to_ptr.vmem [resolvable:$true] %s71_s30 }
  0x26   :  { %s5465_s4 = scalar_lea.vmem %s48_s28, 4096  ;;  %p5470_p2 = scmp.lt.s32.totalorder %s48_s28, %s48_s28 }
  0x27   :  { %p5466_p1 = scmp.ne.s32.totalorder %s48_s28, %s5465_s4  ;;  %p5471_p3 = scmp.lt.s32.totalorder %s5465_s4, %s5465_s4 }
  0x29   :  { %p5472_p4 = por %p5471_p3, %p5470_p2 }
  0x2b   :  { %p5473_p5 = pnand %p5472_p4, %p5466_p1 }
  0x2d   :  { %5476 = shalt.err (!%p5473_p5)
}
  0x2e   :  { %53 = dma.hbm_to_vmem [thread:$0]  %s6476_s2, 4096, %s48_s28, [#allocation10], %s5570_s12, %s5570_s12, %s5571_s13  }
  0x2f   :  { %s5485_s0 = scalar_lea.vmem %s72_s30, 1024  ;;  %p5490_p7 = scmp.lt.s32.totalorder %s72_s30, %s72_s30 }
  0x30   :  { %p5486_p6 = scmp.ne.s32.totalorder %s72_s30, %s5485_s0  ;;  %p5491_p8 = scmp.lt.s32.totalorder %s5485_s0, %s5485_s0 }
  0x32   :  { %p5492_p9 = por %p5491_p8, %p5490_p7 }
  0x34   :  { %p5493_p10 = pnand %p5492_p9, %p5486_p6 }
  0x36   :  { %5496 = shalt.err (!%p5493_p10)
}
  0x37   :  { %s5578_s14 = smov 64   ;;  %s5579_s15 = smov 4  }
  0x38   :  { %77 = dma.hbm_to_vmem [thread:$0]  %s6481_s7, 1024, %s72_s30, [#allocation13], %s5578_s14, %s5578_s14, %s5579_s15  }
  0x39   :  { %5557 = dma.done.wait [#allocation7], 256  }
  0x3a   :  { %5558 = vsyncadd [#allocation7], 4294967040 }
  0x3b   :  { %5559 = dma.done.wait [#allocation10], 8192  }
  0x3c   :  { %5560 = vsyncadd [#allocation10], 4294959104 }
  0x3d   :  { %5561 = dma.done.wait [#allocation13], 1088  }
  0x3e   :  { %5562 = vsyncadd [#allocation13], 4294966208  ;;  %v5580_v0 = vmov 0   ;;  %v4956_v1 = vld [vmem:[#allocation9 + $0xe4] ss:$16 sps:$4 sm:$0xff]   ;;  %v121_v34 = vld [vmem:[#allocation6 + $0x8] sm:$0xff] }
  0x3f   :  { %369 = vmatprep.mubr.bf16.mxu0 %v5580_v0  ;;  %412 = vmatprep.mubr.bf16.mxu1 %v5580_v0  ;;  %v4958_v2 = vld [vmem:[#allocation9 + $0xec] ss:$16 sps:$4 sm:$0xff]   ;;  %v4960_v3 = vld [vmem:[#allocation9 + $0xe0] ss:$16 sps:$4 sm:$0xff]   ;;  %v4961_v4 = vld [vmem:[#allocation9 + $0xe8] ss:$16 sps:$4 sm:$0xff]  }
  0x40   :  { %337 = vmatprep.subr.bf16.mxu0 %v4956_v1  ;;  %380 = vmatprep.subr.bf16.mxu1 %v4958_v2  ;;  %v4962_v5 = vld [vmem:[#allocation9 + $0xc4] ss:$16 sps:$4 sm:$0xff]   ;;  %v4964_v6 = vld [vmem:[#allocation9 + $0xcc] ss:$16 sps:$4 sm:$0xff]   ;;  %v4966_v7 = vld [vmem:[#allocation9 + $0xc0] ss:$16 sps:$4 sm:$0xff]  }
  0x41   :  { %338 = vmatpush1.bf16.msra.mxu0 %v4960_v3  ;;  %381 = vmatpush1.bf16.msra.mxu1 %v4961_v4  ;;  %v4967_v8 = vld [vmem:[#allocation9 + $0xc8] ss:$16 sps:$4 sm:$0xff]   ;;  %v4968_v9 = vld [vmem:[#allocation9 + $0xa4] ss:$16 sps:$4 sm:$0xff]   ;;  %v4970_v10 = vld [vmem:[#allocation9 + $0xac] ss:$16 sps:$4 sm:$0xff]  }
  0x42   :  { %339 = vmatprep.subr.bf16.mxu0 %v4962_v5  ;;  %382 = vmatprep.subr.bf16.mxu1 %v4964_v6  ;;  %v4972_v11 = vld [vmem:[#allocation9 + $0xa0] ss:$16 sps:$4 sm:$0xff]   ;;  %v4973_v12 = vld [vmem:[#allocation9 + $0xa8] ss:$16 sps:$4 sm:$0xff]   ;;  %v4974_v13 = vld [vmem:[#allocation9 + $0x84] ss:$16 sps:$4 sm:$0xff]   ;;  %v157_v5 = vlaneseq }
  0x43   :  { %v4976_v14 = vld [vmem:[#allocation9 + $0x8c] ss:$16 sps:$4 sm:$0xff]   ;;  %v4978_v15 = vld [vmem:[#allocation9 + $0x80] ss:$16 sps:$4 sm:$0xff]   ;;  %v4979_v16 = vld [vmem:[#allocation9 + $0x88] ss:$16 sps:$4 sm:$0xff]  }
  0x44   :  { %v4980_v17 = vld [vmem:[#allocation9 + $0x64] ss:$16 sps:$4 sm:$0xff]   ;;  %v4982_v18 = vld [vmem:[#allocation9 + $0x6c] ss:$16 sps:$4 sm:$0xff]   ;;  %v4984_v19 = vld [vmem:[#allocation9 + $0x60] ss:$16 sps:$4 sm:$0xff]  }
  0x45   :  { %340 = vmatpush1.bf16.msra.mxu0 %v4966_v7  ;;  %383 = vmatpush1.bf16.msra.mxu1 %v4967_v8  ;;  %v4985_v20 = vld [vmem:[#allocation9 + $0x68] ss:$16 sps:$4 sm:$0xff]   ;;  %v4986_v21 = vld [vmem:[#allocation9 + $0x44] ss:$16 sps:$4 sm:$0xff]   ;;  %v4988_v22 = vld [vmem:[#allocation9 + $0x4c] ss:$16 sps:$4 sm:$0xff]  }
  0x46   :  { %341 = vmatprep.subr.bf16.mxu0 %v4968_v9  ;;  %384 = vmatprep.subr.bf16.mxu1 %v4970_v10  ;;  %v4990_v23 = vld [vmem:[#allocation9 + $0x40] ss:$16 sps:$4 sm:$0xff]   ;;  %v4991_v24 = vld [vmem:[#allocation9 + $0x48] ss:$16 sps:$4 sm:$0xff]   ;;  %v4992_v25 = vld [vmem:[#allocation9 + $0x24] ss:$16 sps:$4 sm:$0xff]  }
  0x47   :  { %v4994_v26 = vld [vmem:[#allocation9 + $0x2c] ss:$16 sps:$4 sm:$0xff]   ;;  %v4996_v27 = vld [vmem:[#allocation9 + $0x20] ss:$16 sps:$4 sm:$0xff]   ;;  %v4997_v28 = vld [vmem:[#allocation9 + $0x28] ss:$16 sps:$4 sm:$0xff]  }
  0x48   :  { %v4998_v29 = vld [vmem:[#allocation9 + $0x4] ss:$16 sps:$4 sm:$0xff]   ;;  %v5000_v30 = vld [vmem:[#allocation9 + $0xc] ss:$16 sps:$4 sm:$0xff]   ;;  %v5002_v31 = vld [vmem:[#allocation9] ss:$16 sps:$4 sm:$0xff]  }
  0x49   :  { %342 = vmatpush1.bf16.msra.mxu0 %v4972_v11  ;;  %385 = vmatpush1.bf16.msra.mxu1 %v4973_v12  ;;  %v5003_v32 = vld [vmem:[#allocation9 + $0x8] ss:$16 sps:$4 sm:$0xff]   ;;  %v120_v33 = vld [vmem:[#allocation6] sm:$0xff]  ;;  %v5661_v36 = vld [vmem:[#allocation11 + $0xec] ss:$16 sps:$4 sm:$0xff]   ;;  %v5795_v6 = vshrl.u32 %v157_v5, 7 }
  0x4a   :  { %343 = vmatprep.subr.bf16.mxu0 %v4974_v13  ;;  %386 = vmatprep.subr.bf16.mxu1 %v4976_v14  ;;  %v5659_v35 = vld [vmem:[#allocation11 + $0xe4] ss:$16 sps:$4 sm:$0xff]   ;;  %v122_v37 = vpack.c.bf16 %v121_v34, %v120_v33  ;;  %v5663_v38 = vld [vmem:[#allocation11 + $0xe0] ss:$16 sps:$4 sm:$0xff]   ;;  %v5665_v39 = vld [vmem:[#allocation11 + $0xe8] ss:$16 sps:$4 sm:$0xff]  }
  0x4b   :  { %v5669_v40 = vld [vmem:[#allocation11 + $0xc4] ss:$16 sps:$4 sm:$0xff]   ;;  %v5671_v41 = vld [vmem:[#allocation11 + $0xcc] ss:$16 sps:$4 sm:$0xff]   ;;  %v5675_v42 = vld [vmem:[#allocation11 + $0xc0] ss:$16 sps:$4 sm:$0xff]  }
  0x4c   :  { %v5677_v43 = vld [vmem:[#allocation11 + $0xc8] ss:$16 sps:$4 sm:$0xff]   ;;  %v5681_v44 = vld [vmem:[#allocation11 + $0xa4] ss:$16 sps:$4 sm:$0xff]   ;;  %v5683_v45 = vld [vmem:[#allocation11 + $0xac] ss:$16 sps:$4 sm:$0xff]  }
  0x4d   :  { %344 = vmatpush1.bf16.msra.mxu0 %v4978_v15  ;;  %387 = vmatpush1.bf16.msra.mxu1 %v4979_v16  ;;  %v5689_v46 = vld [vmem:[#allocation11 + $0xa0] ss:$16 sps:$4 sm:$0xff]   ;;  %v5691_v47 = vld [vmem:[#allocation11 + $0xa8] ss:$16 sps:$4 sm:$0xff]   ;;  %v5695_v48 = vld [vmem:[#allocation11 + $0x84] ss:$16 sps:$4 sm:$0xff]  }
  0x4e   :  { %345 = vmatprep.subr.bf16.mxu0 %v4980_v17  ;;  %388 = vmatprep.subr.bf16.mxu1 %v4982_v18  ;;  %v5697_v49 = vld [vmem:[#allocation11 + $0x8c] ss:$16 sps:$4 sm:$0xff]   ;;  %v5699_v50 = vld [vmem:[#allocation11 + $0x80] ss:$16 sps:$4 sm:$0xff]   ;;  %v5701_v51 = vld [vmem:[#allocation11 + $0x88] ss:$16 sps:$4 sm:$0xff]  }
  0x4f   :  { %v5703_v52 = vld [vmem:[#allocation11 + $0x64] ss:$16 sps:$4 sm:$0xff]   ;;  %v5705_v53 = vld [vmem:[#allocation11 + $0x6c] ss:$16 sps:$4 sm:$0xff]   ;;  %v5711_v54 = vld [vmem:[#allocation11 + $0x60] ss:$16 sps:$4 sm:$0xff]  }
  0x50   :  { %v5713_v55 = vld [vmem:[#allocation11 + $0x68] ss:$16 sps:$4 sm:$0xff]   ;;  %v5715_v56 = vld [vmem:[#allocation11 + $0x44] ss:$16 sps:$4 sm:$0xff]   ;;  %v5717_v57 = vld [vmem:[#allocation11 + $0x4c] ss:$16 sps:$4 sm:$0xff]  }
  0x51   :  { %346 = vmatpush1.bf16.msra.mxu0 %v4984_v19  ;;  %389 = vmatpush1.bf16.msra.mxu1 %v4985_v20  ;;  %v5723_v58 = vld [vmem:[#allocation11 + $0x40] ss:$16 sps:$4 sm:$0xff]   ;;  %v5725_v59 = vld [vmem:[#allocation11 + $0x48] ss:$16 sps:$4 sm:$0xff]   ;;  %v5727_v60 = vld [vmem:[#allocation11 + $0x24] ss:$16 sps:$4 sm:$0xff]  }
  0x52   :  { %347 = vmatprep.subr.bf16.mxu0 %v4986_v21  ;;  %390 = vmatprep.subr.bf16.mxu1 %v4988_v22  ;;  %v5729_v61 = vld [vmem:[#allocation11 + $0x2c] ss:$16 sps:$4 sm:$0xff]   ;;  %v5737_v62 = vld [vmem:[#allocation11 + $0x20] ss:$16 sps:$4 sm:$0xff]   ;;  %v5739_v63 = vld [vmem:[#allocation11 + $0x28] ss:$16 sps:$4 sm:$0xff]  }
  0x53   :  { %v5743_v1 = vld [vmem:[#allocation11 + $0x4] ss:$16 sps:$4 sm:$0xff]   ;;  %v5745_v2 = vld [vmem:[#allocation11 + $0xc] ss:$16 sps:$4 sm:$0xff]   ;;  %v5749_v3 = vld [vmem:[#allocation11] ss:$16 sps:$4 sm:$0xff]  }
  0x54   :  { %v5751_v4 = vld [vmem:[#allocation11 + $0x8] ss:$16 sps:$4 sm:$0xff]   ;;  %v159_v7 = vsub.s32 0, %v5795_v6  ;;  %v167_v8 = vsub.s32 2, %v5795_v6  ;;  %v163_v10 = vsub.s32 1, %v5795_v6  ;;  %v171_v11 = vsub.s32 3, %v5795_v6 }
  0x55   :  { %348 = vmatpush1.bf16.msra.mxu0 %v4990_v23  ;;  %391 = vmatpush1.bf16.msra.mxu1 %v4991_v24  ;;  %v155_v9 = vld [vmem:[%s6477_s3] sm:$0xf]  ;;  %s5581_s3 = smov [#allocation4]   ;;  %s5582_s13 = smov [#allocation4 + $0x100]  }
  0x56   :  { %349 = vmatprep.subr.bf16.mxu0 %v4992_v25  ;;  %392 = vmatprep.subr.bf16.mxu1 %v4994_v26  ;;  %v160_v12 = vrot.slane %v155_v9, %v159_v7  ;;  %v168_v13 = vrot.slane %v155_v9, %v167_v8  ;;  %v164_v14 = vrot.slane %v155_v9, %v163_v10  ;;  %s103_s12 = sshll.u32 %s5581_s3, 4  ;;  %s116_s18 = sshll.u32 %s5582_s13, 4  ;;  %s104_s12 = int_to_ptr.vmem [resolvable:$true] %s103_s12  ;;  %s117_s18 = int_to_ptr.vmem [resolvable:$true] %s116_s18 }
  0x57   :  { %v172_v15 = vrot.slane %v155_v9, %v171_v11  ;;  %s5505_s19 = scalar_lea.vmem %s104_s12, 4096  ;;  %s5509_s20 = scalar_lea.vmem %s104_s12, 8192 }
  0x58   :  { %p5506_p11 = scmp.ne.s32.totalorder %s104_s12, %s5505_s19  ;;  %p5510_p12 = scmp.lt.s32.totalorder %s104_s12, %s104_s12 }
  0x59   :  { %350 = vmatpush1.bf16.msra.mxu0 %v4996_v27  ;;  %393 = vmatpush1.bf16.msra.mxu1 %v4997_v28  ;;  %p5511_p13 = scmp.lt.s32.totalorder %s5509_s20, %s5505_s19 }
  0x5a   :  { %351 = vmatprep.subr.bf16.mxu0 %v4998_v29  ;;  %394 = vmatprep.subr.bf16.mxu1 %v5000_v30 }
  0x5b   :  { %p5512_p0 = por %p5511_p13, %p5510_p12 }
  0x5d   :  { %352 = vmatpush1.bf16.msra.mxu0 %v5002_v31  ;;  %395 = vmatpush1.bf16.msra.mxu1 %v5003_v32  ;;  %p5513_p1 = pnand %p5512_p0, %p5506_p11 }
  0x5e   :  { %627 = vmatprep.subr.bf16.mxu0 %v5659_v35  ;;  %668 = vmatprep.subr.bf16.mxu1 %v5661_v36 }
  0x60   :  { %370 = vmatmul.mubr.bf16.vlgmr.msra.gmra.mxu0 %v122_v37  ;;  %413 = vmatmul.mubr.bf16.vlgmr.msra.gmra.mxu1 %v122_v37 }
  0x61   :  { %628 = vmatpush1.bf16.msra.mxu0 %v5663_v38  ;;  %669 = vmatpush1.bf16.msra.mxu1 %v5665_v39 }
  0x62   :  { %629 = vmatprep.subr.bf16.mxu0 %v5669_v40  ;;  %670 = vmatprep.subr.bf16.mxu1 %v5671_v41 }
  0x63   :  { %659 = vmatprep.mubr.bf16.mxu0 %v5580_v0  ;;  %700 = vmatprep.mubr.bf16.mxu1 %v5580_v0 }
  0x65   :  { %630 = vmatpush1.bf16.msra.mxu0 %v5675_v42  ;;  %671 = vmatpush1.bf16.msra.mxu1 %v5677_v43 }
  0x66   :  { %631 = vmatprep.subr.bf16.mxu0 %v5681_v44  ;;  %672 = vmatprep.subr.bf16.mxu1 %v5683_v45 }
  0x69   :  { %632 = vmatpush1.bf16.msra.mxu0 %v5689_v46  ;;  %673 = vmatpush1.bf16.msra.mxu1 %v5691_v47 }
  0x6a   :  { %633 = vmatprep.subr.bf16.mxu0 %v5695_v48  ;;  %674 = vmatprep.subr.bf16.mxu1 %v5697_v49 }
  0x6d   :  { %634 = vmatpush1.bf16.msra.mxu0 %v5699_v50  ;;  %675 = vmatpush1.bf16.msra.mxu1 %v5701_v51 }
  0x6e   :  { %635 = vmatprep.subr.bf16.mxu0 %v5703_v52  ;;  %676 = vmatprep.subr.bf16.mxu1 %v5705_v53 }
  0x71   :  { %636 = vmatpush1.bf16.msra.mxu0 %v5711_v54  ;;  %677 = vmatpush1.bf16.msra.mxu1 %v5713_v55 }
  0x72   :  { %637 = vmatprep.subr.bf16.mxu0 %v5715_v56  ;;  %678 = vmatprep.subr.bf16.mxu1 %v5717_v57 }
  0x75   :  { %638 = vmatpush1.bf16.msra.mxu0 %v5723_v58  ;;  %679 = vmatpush1.bf16.msra.mxu1 %v5725_v59 }
  0x76   :  { %639 = vmatprep.subr.bf16.mxu0 %v5727_v60  ;;  %680 = vmatprep.subr.bf16.mxu1 %v5729_v61 }
  0x79   :  { %640 = vmatpush1.bf16.msra.mxu0 %v5737_v62  ;;  %681 = vmatpush1.bf16.msra.mxu1 %v5739_v63 }
  0x7a   :  { %641 = vmatprep.subr.bf16.mxu0 %v5743_v1  ;;  %682 = vmatprep.subr.bf16.mxu1 %v5745_v2 }
  0x7d   :  { %642 = vmatpush1.bf16.msra.mxu0 %v5749_v3  ;;  %683 = vmatpush1.bf16.msra.mxu1 %v5751_v4 }
  0x7e   :  { %926 = vmatprep.subr.bf16.mxu0 %v5659_v35  ;;  %967 = vmatprep.subr.bf16.mxu1 %v5661_v36 }
  0x80   :  { %660 = vmatmul.mubr.bf16.vlgmr.msra.gmra.mxu0 %v5580_v0  ;;  %701 = vmatmul.mubr.bf16.vlgmr.msra.gmra.mxu1 %v5580_v0 }
  0x81   :  { %927 = vmatpush1.bf16.msra.mxu0 %v5663_v38  ;;  %968 = vmatpush1.bf16.msra.mxu1 %v5665_v39 }
  0x82   :  { %928 = vmatprep.subr.bf16.mxu0 %v5669_v40  ;;  %969 = vmatprep.subr.bf16.mxu1 %v5671_v41 }
  0x83   :  { %958 = vmatprep.mubr.bf16.mxu0 %v5580_v0  ;;  %999 = vmatprep.mubr.bf16.mxu1 %v5580_v0 }
  0x85   :  { %929 = vmatpush1.bf16.msra.mxu0 %v5675_v42  ;;  %970 = vmatpush1.bf16.msra.mxu1 %v5677_v43 }
  0x86   :  { %930 = vmatprep.subr.bf16.mxu0 %v5681_v44  ;;  %971 = vmatprep.subr.bf16.mxu1 %v5683_v45 }
  0x89   :  { %931 = vmatpush1.bf16.msra.mxu0 %v5689_v46  ;;  %972 = vmatpush1.bf16.msra.mxu1 %v5691_v47 }
  0x8a   :  { %932 = vmatprep.subr.bf16.mxu0 %v5695_v48  ;;  %973 = vmatprep.subr.bf16.mxu1 %v5697_v49 }
  0x8d   :  { %933 = vmatpush1.bf16.msra.mxu0 %v5699_v50  ;;  %974 = vmatpush1.bf16.msra.mxu1 %v5701_v51 }
  0x8e   :  { %934 = vmatprep.subr.bf16.mxu0 %v5703_v52  ;;  %975 = vmatprep.subr.bf16.mxu1 %v5705_v53 }
  0x91   :  { %935 = vmatpush1.bf16.msra.mxu0 %v5711_v54  ;;  %976 = vmatpush1.bf16.msra.mxu1 %v5713_v55 }
  0x92   :  { %936 = vmatprep.subr.bf16.mxu0 %v5715_v56  ;;  %977 = vmatprep.subr.bf16.mxu1 %v5717_v57 }
  0x95   :  { %937 = vmatpush1.bf16.msra.mxu0 %v5723_v58  ;;  %978 = vmatpush1.bf16.msra.mxu1 %v5725_v59 }
  0x96   :  { %938 = vmatprep.subr.bf16.mxu0 %v5727_v60  ;;  %979 = vmatprep.subr.bf16.mxu1 %v5729_v61 }
  0x99   :  { %939 = vmatpush1.bf16.msra.mxu0 %v5737_v62  ;;  %980 = vmatpush1.bf16.msra.mxu1 %v5739_v63 }
  0x9a   :  { %940 = vmatprep.subr.bf16.mxu0 %v5743_v1  ;;  %981 = vmatprep.subr.bf16.mxu1 %v5745_v2 }
  0x9d   :  { %941 = vmatpush1.bf16.msra.mxu0 %v5749_v3  ;;  %982 = vmatpush1.bf16.msra.mxu1 %v5751_v4 }
  0x9e   :  { %1243 = vmatprep.subr.bf16.mxu0 %v5659_v35  ;;  %1284 = vmatprep.subr.bf16.mxu1 %v5661_v36 }
 0x120   :  { %v371_v16 = vpop.f32.mrf.mxu0  ;;  %v414_v17 = vpop.f32.mrf.mxu1 }
 0x121   :  { %v372_v18 = vadd.f32 %v371_v16, %v160_v12  ;;  %v415_v19 = vadd.f32 %v414_v17, %v168_v13 }
 0x122   :  { %v373_v20 = vpop.f32.mrf.mxu0  ;;  %v416_v21 = vpop.f32.mrf.mxu1 }
 0x123   :  { %423 = vst [vmem:[#allocation2 + $0x30] sm:$0xff] %v372_v18  ;;  %425 = vst [vmem:[#allocation2 + $0x18] sm:$0xff] %v415_v19  ;;  %v374_v22 = vadd.f32 %v373_v20, %v164_v14  ;;  %v417_v23 = vadd.f32 %v416_v21, %v172_v15 }
 0x124   :  { %v375_v24 = vpop.f32.mrf.mxu0  ;;  %v418_v25 = vpop.f32.mrf.mxu1 }
 0x125   :  { %424 = vst [vmem:[#allocation2] sm:$0xff] %v374_v22  ;;  %426 = vst [vmem:[#allocation2 + $0x10] sm:$0xff] %v417_v23  ;;  %v376_v26 = vadd.f32 %v375_v24, %v160_v12  ;;  %v419_v27 = vadd.f32 %v418_v25, %v168_v13 }
 0x126   :  { %v377_v28 = vpop.f32.mrf.mxu0  ;;  %v420_v29 = vpop.f32.mrf.mxu1 }
 0x127   :  { %427 = vst [vmem:[#allocation2 + $0x8] sm:$0xff] %v376_v26  ;;  %429 = vst [vmem:[#allocation2 + $0x28] sm:$0xff] %v419_v27  ;;  %v378_v30 = vadd.f32 %v377_v28, %v164_v14  ;;  %v421_v31 = vadd.f32 %v420_v29, %v172_v15 }
 0x129   :  { %428 = vst [vmem:[#allocation2 + $0x20] sm:$0xff] %v378_v30  ;;  %430 = vst [vmem:[#allocation2 + $0x38] sm:$0xff] %v421_v31 }
 0x12a   :  { %v431_v32 = vld [vmem:[#allocation2 + $0x30] sm:$0x3]  ;;  %v433_v18 = vld [vmem:[#allocation2 + $0x18] sm:$0x3] }
 0x12c   :  { %v432_v5 = vld [vmem:[#allocation2] sm:$0x3]  ;;  %v434_v14 = vld [vmem:[#allocation2 + $0x10] sm:$0x3] }
 0x140   :  { %v661_v33 = vpop.f32.mrf.mxu0  ;;  %v702_v34 = vpop.f32.mrf.mxu1 }
 0x141   :  { %v709_v37 = vadd.f32 %v661_v33, %v431_v32  ;;  %v711_v19 = vadd.f32 %v702_v34, %v433_v18 }
 0x142   :  { %v663_v9 = vpop.f32.mrf.mxu0  ;;  %v704_v16 = vpop.f32.mrf.mxu1 }
 0x143   :  { %5100 = vtanh.f32 %v709_v37  ;;  %v710_v17 = vadd.f32 %v663_v9, %v432_v5  ;;  %v712_v15 = vadd.f32 %v704_v16, %v434_v14 }
 0x144   :  { %v665_v12 = vpop.f32.mrf.mxu0  ;;  %v706_v13 = vpop.f32.mrf.mxu1 }
 0x145   :  { %5102 = vtanh.f32 %v710_v17  ;;  %v730_v12 = vld [vmem:[#allocation2 + $0x30] sm:$0xc] }
 0x146   :  { %v666_v20 = vpop.f32.mrf.mxu0  ;;  %v707_v21 = vpop.f32.mrf.mxu1  ;;  %5104 = vtanh.f32 %v711_v19 }
 0x147   :  { %5106 = vtanh.f32 %v712_v15  ;;  %v731_v15 = vld [vmem:[#allocation2] sm:$0xc] }
 0x150   :  { %v5101_v22 = vpop.eup %5100 }
 0x151   :  { %v714_v23 = vmul.f32 0.5, %v5101_v22 }
 0x152   :  { %v5103_v24 = vpop.eup %5102 }
 0x153   :  { %v715_v25 = vadd.f32 0.5, %v714_v23  ;;  %v717_v26 = vmul.f32 0.5, %v5103_v24  ;;  %v5105_v28 = vpop.eup %5104 }
 0x154   :  { %v5107_v32 = vpop.eup %5106 }
 0x155   :  { %v718_v27 = vadd.f32 0.5, %v717_v26  ;;  %v724_v30 = vmul.f32 %v5105_v28, %v715_v25  ;;  %v721_v33 = vmul.f32 0.5, %v5107_v32  ;;  %v732_v25 = vld [vmem:[#allocation2 + $0x18] sm:$0xc]  ;;  %v733_v28 = vld [vmem:[#allocation2 + $0x10] sm:$0xc] }
 0x157   :  { %v723_v29 = vmul.f32 0.0, %v718_v27  ;;  %v722_v34 = vadd.f32 0.5, %v721_v33 }
 0x159   :  { %v5812_v31 = vadd.f32 %v724_v30, %v723_v29 }
 0x15b   :  { %5108 = vtanh.f32 %v5812_v31 }
 0x168   :  { %v5109_v37 = vpop.eup %5108 }
 0x169   :  { %v727_v5 = vmul.f32 %v5109_v37, %v722_v34 }
 0x16b   :  { %v728_v9 = vpack.c.bf16 %v727_v5, %v727_v5  ;;  %v1035_v5 = vrot.slane %v5812_v31, 6 }
 0x16d   :  { %729 = vst [vmem:[#allocation3] sm:$0x1] %v728_v9  ;;  %959 = vmatmul.mubr.bf16.vlgmr.msra.gmra.mxu0 %v728_v9  ;;  %1000 = vmatmul.mubr.bf16.vlgmr.msra.gmra.mxu1 %v728_v9 }
 0x16e   :  { %1244 = vmatpush1.bf16.msra.mxu0 %v5663_v38  ;;  %1285 = vmatpush1.bf16.msra.mxu1 %v5665_v39 }
 0x16f   :  { %1245 = vmatprep.subr.bf16.mxu0 %v5669_v40  ;;  %1286 = vmatprep.subr.bf16.mxu1 %v5671_v41 }
 0x170   :  { %1275 = vmatprep.mubr.bf16.mxu0 %v5580_v0  ;;  %1316 = vmatprep.mubr.bf16.mxu1 %v5580_v0 }
 0x172   :  { %1246 = vmatpush1.bf16.msra.mxu0 %v5675_v42  ;;  %1287 = vmatpush1.bf16.msra.mxu1 %v5677_v43 }
 0x173   :  { %1247 = vmatprep.subr.bf16.mxu0 %v5681_v44  ;;  %1288 = vmatprep.subr.bf16.mxu1 %v5683_v45 }
 0x176   :  { %1248 = vmatpush1.bf16.msra.mxu0 %v5689_v46  ;;  %1289 = vmatpush1.bf16.msra.mxu1 %v5691_v47 }
 0x177   :  { %1249 = vmatprep.subr.bf16.mxu0 %v5695_v48  ;;  %1290 = vmatprep.subr.bf16.mxu1 %v5697_v49 }
 0x17a   :  { %1250 = vmatpush1.bf16.msra.mxu0 %v5699_v50  ;;  %1291 = vmatpush1.bf16.msra.mxu1 %v5701_v51 }
 0x17b   :  { %1251 = vmatprep.subr.bf16.mxu0 %v5703_v52  ;;  %1292 = vmatprep.subr.bf16.mxu1 %v5705_v53 }
 0x17e   :  { %1252 = vmatpush1.bf16.msra.mxu0 %v5711_v54  ;;  %1293 = vmatpush1.bf16.msra.mxu1 %v5713_v55 }
 0x17f   :  { %1253 = vmatprep.subr.bf16.mxu0 %v5715_v56  ;;  %1294 = vmatprep.subr.bf16.mxu1 %v5717_v57 }
 0x182   :  { %1254 = vmatpush1.bf16.msra.mxu0 %v5723_v58  ;;  %1295 = vmatpush1.bf16.msra.mxu1 %v5725_v59 }
 0x183   :  { %1255 = vmatprep.subr.bf16.mxu0 %v5727_v60  ;;  %1296 = vmatprep.subr.bf16.mxu1 %v5729_v61 }
 0x186   :  { %1256 = vmatpush1.bf16.msra.mxu0 %v5737_v62  ;;  %1297 = vmatpush1.bf16.msra.mxu1 %v5739_v63 }
 0x187   :  { %1257 = vmatprep.subr.bf16.mxu0 %v5743_v1  ;;  %1298 = vmatprep.subr.bf16.mxu1 %v5745_v2 }
 0x18a   :  { %1258 = vmatpush1.bf16.msra.mxu0 %v5749_v3  ;;  %1299 = vmatpush1.bf16.msra.mxu1 %v5751_v4 }
 0x18b   :  { %1560 = vmatprep.subr.bf16.mxu0 %v5659_v35  ;;  %1601 = vmatprep.subr.bf16.mxu1 %v5661_v36 }
 0x22d   :  { %v960_v16 = vpop.f32.mrf.mxu0  ;;  %v1001_v17 = vpop.f32.mrf.mxu1 }
 0x22e   :  { %v1012_v18 = vrot.slane %v960_v16, 6  ;;  %v1014_v21 = vrot.slane %v1001_v17, 6 }
 0x22f   :  { %v962_v13 = vpop.f32.mrf.mxu0  ;;  %v1003_v19 = vpop.f32.mrf.mxu1 }
 0x230   :  { %v1020_v20 = vadd.f32 %v1012_v18, %v730_v12  ;;  %v1013_v14 = vrot.slane %v962_v13, 6  ;;  %v1022_v35 = vadd.f32 %v1014_v21, %v732_v25  ;;  %v1015_v36 = vrot.slane %v1003_v19, 6 }
 0x231   :  { %v964_v22 = vpop.f32.mrf.mxu0  ;;  %v1005_v23 = vpop.f32.mrf.mxu1 }
 0x232   :  { %5110 = vtanh.f32 %v1020_v20  ;;  %v1021_v24 = vadd.f32 %v1013_v14, %v731_v15  ;;  %v1023_v29 = vadd.f32 %v1015_v36, %v733_v28  ;;  %v5891_v28 = vld [vmem:[#allocation11 + $0xe4] ss:$16 sps:$4 sm:$0xff]  }
 0x233   :  { %v965_v26 = vpop.f32.mrf.mxu0  ;;  %v1006_v27 = vpop.f32.mrf.mxu1 }
 0x234   :  { %5112 = vtanh.f32 %v1021_v24 }
 0x235   :  { %5114 = vtanh.f32 %v1022_v35 }
 0x236   :  { %5116 = vtanh.f32 %v1023_v29  ;;  %v5893_v29 = vld [vmem:[#allocation11 + $0xec] ss:$16 sps:$4 sm:$0xff]  }
 0x23f   :  { %v5111_v30 = vpop.eup %5110 }
 0x240   :  { %v1025_v32 = vmul.f32 0.5, %v5111_v30  ;;  %v5895_v30 = vld [vmem:[#allocation11 + $0xe0] ss:$16 sps:$4 sm:$0xff]  }
 0x241   :  { %v5113_v33 = vpop.eup %5112 }
 0x242   :  { %v1026_v34 = vadd.f32 0.5, %v1025_v32  ;;  %v1028_v37 = vmul.f32 0.5, %v5113_v33  ;;  %v5115_v16 = vpop.eup %5114  ;;  %v5897_v32 = vld [vmem:[#allocation11 + $0xe8] ss:$16 sps:$4 sm:$0xff]   ;;  %v5903_v33 = vld [vmem:[#allocation11 + $0xc4] ss:$16 sps:$4 sm:$0xff]  }
 0x243   :  { %v5117_v13 = vpop.eup %5116 }
 0x244   :  { %v1029_v9 = vadd.f32 0.5, %v1028_v37  ;;  %v1038_v18 = vmul.f32 %v5115_v16, %v1026_v34  ;;  %v1032_v19 = vmul.f32 0.5, %v5117_v13  ;;  %v5905_v34 = vld [vmem:[#allocation11 + $0xcc] ss:$16 sps:$4 sm:$0xff]   ;;  %v5907_v37 = vld [vmem:[#allocation11 + $0xc0] ss:$16 sps:$4 sm:$0xff]  }
 0x245   :  { %v5917_v16 = vld [vmem:[#allocation11 + $0xac] ss:$16 sps:$4 sm:$0xff]  }
 0x246   :  { %v1037_v17 = vmul.f32 %v1035_v5, %v1029_v9  ;;  %v1033_v20 = vadd.f32 0.5, %v1032_v19  ;;  %v5909_v5 = vld [vmem:[#allocation11 + $0xc8] ss:$16 sps:$4 sm:$0xff]   ;;  %v5915_v9 = vld [vmem:[#allocation11 + $0xa4] ss:$16 sps:$4 sm:$0xff]  }
 0x247   :  { %v5929_v13 = vld [vmem:[#allocation11 + $0x8c] ss:$16 sps:$4 sm:$0xff]   ;;  %v5931_v19 = vld [vmem:[#allocation11 + $0x80] ss:$16 sps:$4 sm:$0xff]  }
 0x248   :  { %v5850_v12 = vadd.f32 %v1038_v18, %v1037_v17  ;;  %v5919_v17 = vld [vmem:[#allocation11 + $0xa0] ss:$16 sps:$4 sm:$0xff]   ;;  %v5921_v18 = vld [vmem:[#allocation11 + $0xa8] ss:$16 sps:$4 sm:$0xff]  }
 0x24a   :  { %5118 = vtanh.f32 %v5850_v12 }
 0x257   :  { %v5119_v21 = vpop.eup %5118 }
 0x258   :  { %v1041_v14 = vmul.f32 %v5119_v21, %v1033_v20  ;;  %v5933_v20 = vld [vmem:[#allocation11 + $0x88] ss:$16 sps:$4 sm:$0xff]   ;;  %v5939_v21 = vld [vmem:[#allocation11 + $0x64] ss:$16 sps:$4 sm:$0xff]  }
 0x25a   :  { %v1042_v15 = vpack.c.bf16 %v1041_v14, %v1041_v14  ;;  %v5941_v14 = vld [vmem:[#allocation11 + $0x6c] ss:$16 sps:$4 sm:$0xff]  }
 0x25c   :  { %1043 = vst [vmem:[#allocation3] sm:$0x2] %v1042_v15  ;;  %v1081_v22 = vrot.slane %v1042_v15, 1  ;;  %v5943_v15 = vld [vmem:[#allocation11 + $0x60] ss:$16 sps:$4 sm:$0xff]  }
 0x25e   :  { %1276 = vmatmul.mubr.bf16.vlgmr.msra.gmra.mxu0 %v1081_v22  ;;  %1317 = vmatmul.mubr.bf16.vlgmr.msra.gmra.mxu1 %v1081_v22  ;;  %v5945_v22 = vld [vmem:[#allocation11 + $0x68] ss:$16 sps:$4 sm:$0xff]  }
 0x25f   :  { %1561 = vmatpush1.bf16.msra.mxu0 %v5663_v38  ;;  %1602 = vmatpush1.bf16.msra.mxu1 %v5665_v39 }
 0x260   :  { %1562 = vmatprep.subr.bf16.mxu0 %v5669_v40  ;;  %1603 = vmatprep.subr.bf16.mxu1 %v5671_v41  ;;  %v1044_v41 = vld [vmem:[#allocation2 + $0x30] sm:$0x30] }
 0x261   :  { %1592 = vmatprep.mubr.bf16.mxu0 %v5580_v0  ;;  %1633 = vmatprep.mubr.bf16.mxu1 %v5580_v0 }
 0x263   :  { %1563 = vmatpush1.bf16.msra.mxu0 %v5675_v42  ;;  %1604 = vmatpush1.bf16.msra.mxu1 %v5677_v43 }
 0x264   :  { %1564 = vmatprep.subr.bf16.mxu0 %v5681_v44  ;;  %1605 = vmatprep.subr.bf16.mxu1 %v5683_v45 }
 0x267   :  { %1565 = vmatpush1.bf16.msra.mxu0 %v5689_v46  ;;  %1606 = vmatpush1.bf16.msra.mxu1 %v5691_v47  ;;  %v1045_v47 = vld [vmem:[#allocation2] sm:$0x30] }
 0x268   :  { %1566 = vmatprep.subr.bf16.mxu0 %v5695_v48  ;;  %1607 = vmatprep.subr.bf16.mxu1 %v5697_v49 }
 0x26b   :  { %1567 = vmatpush1.bf16.msra.mxu0 %v5699_v50  ;;  %1608 = vmatpush1.bf16.msra.mxu1 %v5701_v51  ;;  %v1046_v51 = vld [vmem:[#allocation2 + $0x18] sm:$0x30] }
 0x26c   :  { %1568 = vmatprep.subr.bf16.mxu0 %v5703_v52  ;;  %1609 = vmatprep.subr.bf16.mxu1 %v5705_v53 }
 0x26f   :  { %1569 = vmatpush1.bf16.msra.mxu0 %v5711_v54  ;;  %1610 = vmatpush1.bf16.msra.mxu1 %v5713_v55 }
 0x270   :  { %1570 = vmatprep.subr.bf16.mxu0 %v5715_v56  ;;  %1611 = vmatprep.subr.bf16.mxu1 %v5717_v57  ;;  %v1047_v56 = vld [vmem:[#allocation2 + $0x10] sm:$0x30] }
 0x273   :  { %1571 = vmatpush1.bf16.msra.mxu0 %v5723_v58  ;;  %1612 = vmatpush1.bf16.msra.mxu1 %v5725_v59 }
 0x274   :  { %1572 = vmatprep.subr.bf16.mxu0 %v5727_v60  ;;  %1613 = vmatprep.subr.bf16.mxu1 %v5729_v61 }
 0x277   :  { %1573 = vmatpush1.bf16.msra.mxu0 %v5737_v62  ;;  %1614 = vmatpush1.bf16.msra.mxu1 %v5739_v63 }
 0x278   :  { %1574 = vmatprep.subr.bf16.mxu0 %v5743_v1  ;;  %1615 = vmatprep.subr.bf16.mxu1 %v5745_v2  ;;  %v1352_v1 = vrot.slane %v5850_v12, 6  ;;  %v5927_v12 = vld [vmem:[#allocation11 + $0x84] ss:$16 sps:$4 sm:$0xff]  }
 0x27b   :  { %1575 = vmatpush1.bf16.msra.mxu0 %v5749_v3  ;;  %1616 = vmatpush1.bf16.msra.mxu1 %v5751_v4 }
 0x27c   :  { %1877 = vmatprep.subr.bf16.mxu0 %v5891_v28  ;;  %1918 = vmatprep.subr.bf16.mxu1 %v5893_v29 }
 0x31e   :  { %v1277_v38 = vpop.f32.mrf.mxu0  ;;  %v1318_v39 = vpop.f32.mrf.mxu1 }
 0x31f   :  { %v1329_v40 = vrot.slane %v1277_v38, 4  ;;  %v1331_v45 = vrot.slane %v1318_v39, 4  ;;  %v5951_v38 = vld [vmem:[#allocation11 + $0x44] ss:$16 sps:$4 sm:$0xff]   ;;  %v5953_v39 = vld [vmem:[#allocation11 + $0x4c] ss:$16 sps:$4 sm:$0xff]  }
 0x320   :  { %v1279_v42 = vpop.f32.mrf.mxu0  ;;  %v1320_v43 = vpop.f32.mrf.mxu1 }
 0x321   :  { %v1337_v44 = vadd.f32 %v1329_v40, %v1044_v41  ;;  %v1330_v46 = vrot.slane %v1279_v42, 4  ;;  %v1339_v54 = vadd.f32 %v1331_v45, %v1046_v51  ;;  %v1332_v55 = vrot.slane %v1320_v43, 4  ;;  %v5955_v40 = vld [vmem:[#allocation11 + $0x40] ss:$16 sps:$4 sm:$0xff]   ;;  %v5957_v41 = vld [vmem:[#allocation11 + $0x48] ss:$16 sps:$4 sm:$0xff]  }
 0x322   :  { %v1281_v48 = vpop.f32.mrf.mxu0  ;;  %v1322_v49 = vpop.f32.mrf.mxu1  ;;  %v5963_v42 = vld [vmem:[#allocation11 + $0x24] ss:$16 sps:$4 sm:$0xff]   ;;  %v5965_v43 = vld [vmem:[#allocation11 + $0x2c] ss:$16 sps:$4 sm:$0xff]   ;;  %v5969_v45 = vld [vmem:[#allocation11 + $0x28] ss:$16 sps:$4 sm:$0xff]  }
 0x323   :  { %5120 = vtanh.f32 %v1337_v44  ;;  %v1338_v50 = vadd.f32 %v1330_v46, %v1045_v47  ;;  %v1340_v57 = vadd.f32 %v1332_v55, %v1047_v56  ;;  %v5967_v44 = vld [vmem:[#allocation11 + $0x20] ss:$16 sps:$4 sm:$0xff]   ;;  %v5973_v46 = vld [vmem:[#allocation11 + $0x4] ss:$16 sps:$4 sm:$0xff]   ;;  %v5975_v47 = vld [vmem:[#allocation11 + $0xc] ss:$16 sps:$4 sm:$0xff]  }
 0x324   :  { %v1282_v52 = vpop.f32.mrf.mxu0  ;;  %v1323_v53 = vpop.f32.mrf.mxu1  ;;  %v5979_v48 = vld [vmem:[#allocation11] ss:$16 sps:$4 sm:$0xff]   ;;  %v5981_v49 = vld [vmem:[#allocation11 + $0x8] ss:$16 sps:$4 sm:$0xff]  }
 0x325   :  { %5122 = vtanh.f32 %v1338_v50  ;;  %v1361_v53 = vld [vmem:[#allocation2 + $0x30] sm:$0xc0] }
 0x326   :  { %5124 = vtanh.f32 %v1339_v54 }
 0x327   :  { %5126 = vtanh.f32 %v1340_v57 }
 0x330   :  { %v5121_v58 = vpop.eup %5120 }
 0x331   :  { %v1342_v59 = vmul.f32 0.5, %v5121_v58 }
 0x332   :  { %v5123_v60 = vpop.eup %5122 }
 0x333   :  { %v1343_v61 = vadd.f32 0.5, %v1342_v59  ;;  %v1345_v62 = vmul.f32 0.5, %v5123_v60  ;;  %v5125_v2 = vpop.eup %5124  ;;  %v1362_v59 = vld [vmem:[#allocation2] sm:$0xc0] }
 0x334   :  { %v5127_v23 = vpop.eup %5126 }
 0x335   :  { %v1346_v63 = vadd.f32 0.5, %v1345_v62  ;;  %v1355_v4 = vmul.f32 %v5125_v2, %v1343_v61  ;;  %v1349_v24 = vmul.f32 0.5, %v5127_v23  ;;  %v1364_v23 = vld [vmem:[#allocation2 + $0x10] sm:$0xc0] }
 0x337   :  { %v1354_v3 = vmul.f32 %v1352_v1, %v1346_v63  ;;  %v1350_v25 = vadd.f32 0.5, %v1349_v24  ;;  %v1363_v63 = vld [vmem:[#allocation2 + $0x18] sm:$0xc0] }
 0x339   :  { %v5886_v31 = vadd.f32 %v1355_v4, %v1354_v3 }
 0x33b   :  { %5128 = vtanh.f32 %v5886_v31 }
 0x348   :  { %v5129_v26 = vpop.eup %5128 }
 0x349   :  { %v1358_v27 = vmul.f32 %v5129_v26, %v1350_v25 }
 0x34b   :  { %v1359_v35 = vpack.c.bf16 %v1358_v27, %v1358_v27 }
 0x34d   :  { %1360 = vst [vmem:[#allocation3] sm:$0x4] %v1359_v35  ;;  %v1398_v36 = vrot.slane %v1359_v35, 2 }
 0x34f   :  { %1593 = vmatmul.mubr.bf16.vlgmr.msra.gmra.mxu0 %v1398_v36  ;;  %1634 = vmatmul.mubr.bf16.vlgmr.msra.gmra.mxu1 %v1398_v36 }
 0x350   :  { %1909 = vmatprep.mubr.bf16.mxu0 %v5580_v0  ;;  %1950 = vmatprep.mubr.bf16.mxu1 %v5580_v0 }
 0x351   :  { %1878 = vmatpush1.bf16.msra.mxu0 %v5895_v30  ;;  %1919 = vmatpush1.bf16.msra.mxu1 %v5897_v32 }
 0x352   :  { %1879 = vmatprep.subr.bf16.mxu0 %v5903_v33  ;;  %1920 = vmatprep.subr.bf16.mxu1 %v5905_v34 }
 0x355   :  { %1880 = vmatpush1.bf16.msra.mxu0 %v5907_v37  ;;  %1921 = vmatpush1.bf16.msra.mxu1 %v5909_v5 }
 0x356   :  { %1881 = vmatprep.subr.bf16.mxu0 %v5915_v9  ;;  %1922 = vmatprep.subr.bf16.mxu1 %v5917_v16 }
 0x359   :  { %1882 = vmatpush1.bf16.msra.mxu0 %v5919_v17  ;;  %1923 = vmatpush1.bf16.msra.mxu1 %v5921_v18 }
 0x35a   :  { %1883 = vmatprep.subr.bf16.mxu0 %v5927_v12  ;;  %1924 = vmatprep.subr.bf16.mxu1 %v5929_v13 }
 0x35d   :  { %1884 = vmatpush1.bf16.msra.mxu0 %v5931_v19  ;;  %1925 = vmatpush1.bf16.msra.mxu1 %v5933_v20 }
 0x35e   :  { %1885 = vmatprep.subr.bf16.mxu0 %v5939_v21  ;;  %1926 = vmatprep.subr.bf16.mxu1 %v5941_v14 }
 0x361   :  { %1886 = vmatpush1.bf16.msra.mxu0 %v5943_v15  ;;  %1927 = vmatpush1.bf16.msra.mxu1 %v5945_v22 }
 0x362   :  { %1887 = vmatprep.subr.bf16.mxu0 %v5951_v38  ;;  %1928 = vmatprep.subr.bf16.mxu1 %v5953_v39 }
 0x365   :  { %1888 = vmatpush1.bf16.msra.mxu0 %v5955_v40  ;;  %1929 = vmatpush1.bf16.msra.mxu1 %v5957_v41 }
 0x366   :  { %1889 = vmatprep.subr.bf16.mxu0 %v5963_v42  ;;  %1930 = vmatprep.subr.bf16.mxu1 %v5965_v43 }
 0x369   :  { %1890 = vmatpush1.bf16.msra.mxu0 %v5967_v44  ;;  %1931 = vmatpush1.bf16.msra.mxu1 %v5969_v45 }
 0x36a   :  { %1891 = vmatprep.subr.bf16.mxu0 %v5973_v46  ;;  %1932 = vmatprep.subr.bf16.mxu1 %v5975_v47 }
 0x36d   :  { %1892 = vmatpush1.bf16.msra.mxu0 %v5979_v48  ;;  %1933 = vmatpush1.bf16.msra.mxu1 %v5981_v49 }
 0x36e   :  { %2179 = vmatprep.subr.bf16.mxu0 %v5891_v28  ;;  %2220 = vmatprep.subr.bf16.mxu1 %v5893_v29 }
 0x40f   :  { %v1594_v50 = vpop.f32.mrf.mxu0  ;;  %v1635_v51 = vpop.f32.mrf.mxu1 }
 0x410   :  { %v1646_v52 = vrot.slane %v1594_v50, 2  ;;  %v1648_v57 = vrot.slane %v1635_v51, 2  ;;  %v1669_v51 = vrot.slane %v5886_v31, 6  ;;  %v1678_v31 = vld [vmem:[#allocation2 + $0x8] sm:$0x3] }
 0x411   :  { %v1596_v54 = vpop.f32.mrf.mxu0  ;;  %v1637_v55 = vpop.f32.mrf.mxu1 }
 0x412   :  { %v1654_v56 = vadd.f32 %v1646_v52, %v1361_v53  ;;  %v1647_v58 = vrot.slane %v1596_v54, 2  ;;  %v1656_v3 = vadd.f32 %v1648_v57, %v1363_v63  ;;  %v1649_v4 = vrot.slane %v1637_v55, 2 }
 0x413   :  { %v1598_v60 = vpop.f32.mrf.mxu0  ;;  %v1639_v61 = vpop.f32.mrf.mxu1 }
 0x414   :  { %5130 = vtanh.f32 %v1654_v56  ;;  %v1655_v62 = vadd.f32 %v1647_v58, %v1362_v59  ;;  %v1657_v24 = vadd.f32 %v1649_v4, %v1364_v23 }
 0x415   :  { %v1599_v1 = vpop.f32.mrf.mxu0  ;;  %v1640_v2 = vpop.f32.mrf.mxu1 }
 0x416   :  { %5132 = vtanh.f32 %v1655_v62 }
 0x417   :  { %5134 = vtanh.f32 %v1656_v3  ;;  %v1679_v3 = vld [vmem:[#allocation2 + $0x20] sm:$0x3] }
 0x418   :  { %5136 = vtanh.f32 %v1657_v24 }
 0x421   :  { %v5131_v25 = vpop.eup %5130 }
 0x422   :  { %v1659_v26 = vmul.f32 0.5, %v5131_v25  ;;  %v1680_v25 = vld [vmem:[#allocation2 + $0x28] sm:$0x3] }
 0x423   :  { %v5133_v27 = vpop.eup %5132 }
 0x424   :  { %v1660_v35 = vadd.f32 0.5, %v1659_v26  ;;  %v1662_v36 = vmul.f32 0.5, %v5133_v27  ;;  %v5135_v52 = vpop.eup %5134 }
 0x425   :  { %v5137_v57 = vpop.eup %5136 }
 0x426   :  { %v1663_v50 = vadd.f32 0.5, %v1662_v36  ;;  %v1672_v54 = vmul.f32 %v5135_v52, %v1660_v35  ;;  %v1666_v55 = vmul.f32 0.5, %v5137_v57 }
 0x428   :  { %v1671_v53 = vmul.f32 %v1669_v51, %v1663_v50  ;;  %v1667_v58 = vadd.f32 0.5, %v1666_v55  ;;  %v1681_v51 = vld [vmem:[#allocation2 + $0x38] sm:$0x3] }
 0x42a   :  { %v5990_v56 = vadd.f32 %v1672_v54, %v1671_v53 }
 0x42c   :  { %5138 = vtanh.f32 %v5990_v56 }
 0x439   :  { %v5139_v59 = vpop.eup %5138 }
 0x43a   :  { %v1675_v60 = vmul.f32 %v5139_v59, %v1667_v58 }
 0x43c   :  { %v1676_v61 = vpack.c.bf16 %v1675_v60, %v1675_v60  ;;  %v1974_v60 = vrot.slane %v5990_v56, 6 }
 0x43e   :  { %1677 = vst [vmem:[#allocation3] sm:$0x8] %v1676_v61  ;;  %v1715_v62 = vrot.slane %v1676_v61, 3 }
 0x440   :  { %1910 = vmatmul.mubr.bf16.vlgmr.msra.gmra.mxu0 %v1715_v62  ;;  %1951 = vmatmul.mubr.bf16.vlgmr.msra.gmra.mxu1 %v1715_v62 }
 0x441   :  { %2180 = vmatpush1.bf16.msra.mxu0 %v5895_v30  ;;  %2221 = vmatpush1.bf16.msra.mxu1 %v5897_v32 }
 0x442   :  { %2181 = vmatprep.subr.bf16.mxu0 %v5903_v33  ;;  %2222 = vmatprep.subr.bf16.mxu1 %v5905_v34 }
 0x443   :  { %2211 = vmatprep.mubr.bf16.mxu0 %v5580_v0  ;;  %2252 = vmatprep.mubr.bf16.mxu1 %v5580_v0 }
 0x445   :  { %2182 = vmatpush1.bf16.msra.mxu0 %v5907_v37  ;;  %2223 = vmatpush1.bf16.msra.mxu1 %v5909_v5 }
 0x446   :  { %2183 = vmatprep.subr.bf16.mxu0 %v5915_v9  ;;  %2224 = vmatprep.subr.bf16.mxu1 %v5917_v16 }
 0x449   :  { %2184 = vmatpush1.bf16.msra.mxu0 %v5919_v17  ;;  %2225 = vmatpush1.bf16.msra.mxu1 %v5921_v18 }
 0x44a   :  { %2185 = vmatprep.subr.bf16.mxu0 %v5927_v12  ;;  %2226 = vmatprep.subr.bf16.mxu1 %v5929_v13 }
 0x44d   :  { %2186 = vmatpush1.bf16.msra.mxu0 %v5931_v19  ;;  %2227 = vmatpush1.bf16.msra.mxu1 %v5933_v20 }
 0x44e   :  { %2187 = vmatprep.subr.bf16.mxu0 %v5939_v21  ;;  %2228 = vmatprep.subr.bf16.mxu1 %v5941_v14 }
 0x451   :  { %2188 = vmatpush1.bf16.msra.mxu0 %v5943_v15  ;;  %2229 = vmatpush1.bf16.msra.mxu1 %v5945_v22 }
 0x452   :  { %2189 = vmatprep.subr.bf16.mxu0 %v5951_v38  ;;  %2230 = vmatprep.subr.bf16.mxu1 %v5953_v39 }
 0x455   :  { %2190 = vmatpush1.bf16.msra.mxu0 %v5955_v40  ;;  %2231 = vmatpush1.bf16.msra.mxu1 %v5957_v41 }
 0x456   :  { %2191 = vmatprep.subr.bf16.mxu0 %v5963_v42  ;;  %2232 = vmatprep.subr.bf16.mxu1 %v5965_v43 }
 0x459   :  { %2192 = vmatpush1.bf16.msra.mxu0 %v5967_v44  ;;  %2233 = vmatpush1.bf16.msra.mxu1 %v5969_v45 }
 0x45a   :  { %2193 = vmatprep.subr.bf16.mxu0 %v5973_v46  ;;  %2234 = vmatprep.subr.bf16.mxu1 %v5975_v47 }
 0x45d   :  { %2194 = vmatpush1.bf16.msra.mxu0 %v5979_v48  ;;  %2235 = vmatpush1.bf16.msra.mxu1 %v5981_v49 }
 0x45e   :  { %2496 = vmatprep.subr.bf16.mxu0 %v5891_v28  ;;  %2537 = vmatprep.subr.bf16.mxu1 %v5893_v29 }
 0x500   :  { %v1911_v63 = vpop.f32.mrf.mxu0  ;;  %v1952_v1 = vpop.f32.mrf.mxu1 }
 0x501   :  { %v1959_v2 = vadd.f32 %v1911_v63, %v1678_v31  ;;  %v1961_v35 = vadd.f32 %v1952_v1, %v1680_v25 }
 0x502   :  { %v1913_v4 = vpop.f32.mrf.mxu0  ;;  %v1954_v23 = vpop.f32.mrf.mxu1 }
 0x503   :  { %5140 = vtanh.f32 %v1959_v2  ;;  %v1960_v24 = vadd.f32 %v1913_v4, %v1679_v3  ;;  %v1962_v52 = vadd.f32 %v1954_v23, %v1681_v51 }
 0x504   :  { %v1915_v26 = vpop.f32.mrf.mxu0  ;;  %v1956_v27 = vpop.f32.mrf.mxu1 }
 0x505   :  { %5142 = vtanh.f32 %v1960_v24  ;;  %v1983_v27 = vld [vmem:[#allocation2 + $0x8] sm:$0xc] }
 0x506   :  { %v1916_v36 = vpop.f32.mrf.mxu0  ;;  %v1957_v50 = vpop.f32.mrf.mxu1  ;;  %5144 = vtanh.f32 %v1961_v35 }
 0x507   :  { %5146 = vtanh.f32 %v1962_v52 }
 0x510   :  { %v5141_v53 = vpop.eup %5140 }
 0x511   :  { %v1964_v54 = vmul.f32 0.5, %v5141_v53  ;;  %v1984_v53 = vld [vmem:[#allocation2 + $0x20] sm:$0xc] }
 0x512   :  { %v5143_v57 = vpop.eup %5142 }
 0x513   :  { %v1965_v55 = vadd.f32 0.5, %v1964_v54  ;;  %v1967_v58 = vmul.f32 0.5, %v5143_v57  ;;  %v5145_v61 = vpop.eup %5144 }
 0x514   :  { %v5147_v1 = vpop.eup %5146 }
 0x515   :  { %v1968_v59 = vadd.f32 0.5, %v1967_v58  ;;  %v1977_v31 = vmul.f32 %v5145_v61, %v1965_v55  ;;  %v1971_v2 = vmul.f32 0.5, %v5147_v1  ;;  %v1985_v58 = vld [vmem:[#allocation2 + $0x28] sm:$0xc]  ;;  %v1986_v61 = vld [vmem:[#allocation2 + $0x38] sm:$0xc] }
 0x517   :  { %v1976_v62 = vmul.f32 %v1974_v60, %v1968_v59  ;;  %v1972_v3 = vadd.f32 0.5, %v1971_v2 }
 0x519   :  { %v6028_v63 = vadd.f32 %v1977_v31, %v1976_v62 }
 0x51b   :  { %5148 = vtanh.f32 %v6028_v63 }
 0x528   :  { %v5149_v4 = vpop.eup %5148 }
 0x529   :  { %v1980_v23 = vmul.f32 %v5149_v4, %v1972_v3 }
 0x52b   :  { %v1981_v24 = vpack.c.bf16 %v1980_v23, %v1980_v23 }
 0x52d   :  { %1982 = vst [vmem:[#allocation3 + $0x4] sm:$0x1] %v1981_v24  ;;  %2212 = vmatmul.mubr.bf16.vlgmr.msra.gmra.mxu0 %v1981_v24  ;;  %2253 = vmatmul.mubr.bf16.vlgmr.msra.gmra.mxu1 %v1981_v24  ;;  %v2288_v24 = vrot.slane %v6028_v63, 6 }
 0x52e   :  { %2497 = vmatpush1.bf16.msra.mxu0 %v5895_v30  ;;  %2538 = vmatpush1.bf16.msra.mxu1 %v5897_v32 }
 0x52f   :  { %2498 = vmatprep.subr.bf16.mxu0 %v5903_v33  ;;  %2539 = vmatprep.subr.bf16.mxu1 %v5905_v34 }
 0x530   :  { %2528 = vmatprep.mubr.bf16.mxu0 %v5580_v0  ;;  %2569 = vmatprep.mubr.bf16.mxu1 %v5580_v0 }
 0x532   :  { %2499 = vmatpush1.bf16.msra.mxu0 %v5907_v37  ;;  %2540 = vmatpush1.bf16.msra.mxu1 %v5909_v5 }
 0x533   :  { %2500 = vmatprep.subr.bf16.mxu0 %v5915_v9  ;;  %2541 = vmatprep.subr.bf16.mxu1 %v5917_v16 }
 0x536   :  { %2501 = vmatpush1.bf16.msra.mxu0 %v5919_v17  ;;  %2542 = vmatpush1.bf16.msra.mxu1 %v5921_v18 }
 0x537   :  { %2502 = vmatprep.subr.bf16.mxu0 %v5927_v12  ;;  %2543 = vmatprep.subr.bf16.mxu1 %v5929_v13 }
 0x53a   :  { %2503 = vmatpush1.bf16.msra.mxu0 %v5931_v19  ;;  %2544 = vmatpush1.bf16.msra.mxu1 %v5933_v20 }
 0x53b   :  { %2504 = vmatprep.subr.bf16.mxu0 %v5939_v21  ;;  %2545 = vmatprep.subr.bf16.mxu1 %v5941_v14 }
 0x53e   :  { %2505 = vmatpush1.bf16.msra.mxu0 %v5943_v15  ;;  %2546 = vmatpush1.bf16.msra.mxu1 %v5945_v22 }
 0x53f   :  { %2506 = vmatprep.subr.bf16.mxu0 %v5951_v38  ;;  %2547 = vmatprep.subr.bf16.mxu1 %v5953_v39 }
 0x542   :  { %2507 = vmatpush1.bf16.msra.mxu0 %v5955_v40  ;;  %2548 = vmatpush1.bf16.msra.mxu1 %v5957_v41 }
 0x543   :  { %2508 = vmatprep.subr.bf16.mxu0 %v5963_v42  ;;  %2549 = vmatprep.subr.bf16.mxu1 %v5965_v43 }
 0x546   :  { %2509 = vmatpush1.bf16.msra.mxu0 %v5967_v44  ;;  %2550 = vmatpush1.bf16.msra.mxu1 %v5969_v45 }
 0x547   :  { %2510 = vmatprep.subr.bf16.mxu0 %v5973_v46  ;;  %2551 = vmatprep.subr.bf16.mxu1 %v5975_v47 }
 0x54a   :  { %2511 = vmatpush1.bf16.msra.mxu0 %v5979_v48  ;;  %2552 = vmatpush1.bf16.msra.mxu1 %v5981_v49 }
 0x54b   :  { %2813 = vmatprep.subr.bf16.mxu0 %v5891_v28  ;;  %2854 = vmatprep.subr.bf16.mxu1 %v5893_v29 }
 0x5ed   :  { %v2213_v56 = vpop.f32.mrf.mxu0  ;;  %v2254_v25 = vpop.f32.mrf.mxu1 }
 0x5ee   :  { %v2265_v26 = vrot.slane %v2213_v56, 6  ;;  %v2267_v51 = vrot.slane %v2254_v25, 6 }
 0x5ef   :  { %v2215_v35 = vpop.f32.mrf.mxu0  ;;  %v2256_v36 = vpop.f32.mrf.mxu1 }
 0x5f0   :  { %v2273_v50 = vadd.f32 %v2265_v26, %v1983_v27  ;;  %v2266_v52 = vrot.slane %v2215_v35, 6  ;;  %v2275_v28 = vadd.f32 %v2267_v51, %v1985_v58  ;;  %v2268_v29 = vrot.slane %v2256_v36, 6 }
 0x5f1   :  { %v2217_v54 = vpop.f32.mrf.mxu0  ;;  %v2258_v57 = vpop.f32.mrf.mxu1 }
 0x5f2   :  { %5150 = vtanh.f32 %v2273_v50  ;;  %v2274_v55 = vadd.f32 %v2266_v52, %v1984_v53  ;;  %v2276_v62 = vadd.f32 %v2268_v29, %v1986_v61 }
 0x5f3   :  { %v2218_v59 = vpop.f32.mrf.mxu0  ;;  %v2259_v60 = vpop.f32.mrf.mxu1 }
 0x5f4   :  { %5152 = vtanh.f32 %v2274_v55 }
 0x5f5   :  { %5154 = vtanh.f32 %v2275_v28 }
 0x5f6   :  { %5156 = vtanh.f32 %v2276_v62 }
 0x5ff   :  { %v5151_v31 = vpop.eup %5150 }
 0x600   :  { %v2278_v1 = vmul.f32 0.5, %v5151_v31 }
 0x601   :  { %v5153_v2 = vpop.eup %5152 }
 0x602   :  { %v2279_v3 = vadd.f32 0.5, %v2278_v1  ;;  %v2281_v4 = vmul.f32 0.5, %v5153_v2  ;;  %v5155_v56 = vpop.eup %5154 }
 0x603   :  { %v5157_v35 = vpop.eup %5156 }
 0x604   :  { %v2282_v23 = vadd.f32 0.5, %v2281_v4  ;;  %v2291_v26 = vmul.f32 %v5155_v56, %v2279_v3  ;;  %v2285_v36 = vmul.f32 0.5, %v5157_v35 }
 0x606   :  { %v2290_v25 = vmul.f32 %v2288_v24, %v2282_v23  ;;  %v2286_v50 = vadd.f32 0.5, %v2285_v36 }
 0x608   :  { %v6066_v27 = vadd.f32 %v2291_v26, %v2290_v25 }
 0x60a   :  { %5158 = vtanh.f32 %v6066_v27 }
 0x617   :  { %v5159_v51 = vpop.eup %5158 }
 0x618   :  { %v2294_v52 = vmul.f32 %v5159_v51, %v2286_v50 }
 0x61a   :  { %v2295_v53 = vpack.c.bf16 %v2294_v52, %v2294_v52 }
 0x61c   :  { %2296 = vst [vmem:[#allocation3 + $0x4] sm:$0x2] %v2295_v53  ;;  %v2334_v54 = vrot.slane %v2295_v53, 1 }
 0x61e   :  { %2529 = vmatmul.mubr.bf16.vlgmr.msra.gmra.mxu0 %v2334_v54  ;;  %2570 = vmatmul.mubr.bf16.vlgmr.msra.gmra.mxu1 %v2334_v54 }
 0x61f   :  { %2814 = vmatpush1.bf16.msra.mxu0 %v5895_v30  ;;  %2855 = vmatpush1.bf16.msra.mxu1 %v5897_v32 }
 0x620   :  { %2815 = vmatprep.subr.bf16.mxu0 %v5903_v33  ;;  %2856 = vmatprep.subr.bf16.mxu1 %v5905_v34  ;;  %v2297_v34 = vld [vmem:[#allocation2 + $0x8] sm:$0x30] }
 0x621   :  { %2845 = vmatprep.mubr.bf16.mxu0 %v5580_v0  ;;  %2886 = vmatprep.mubr.bf16.mxu1 %v5580_v0 }
 0x623   :  { %2816 = vmatpush1.bf16.msra.mxu0 %v5907_v37  ;;  %2857 = vmatpush1.bf16.msra.mxu1 %v5909_v5 }
 0x624   :  { %2817 = vmatprep.subr.bf16.mxu0 %v5915_v9  ;;  %2858 = vmatprep.subr.bf16.mxu1 %v5917_v16 }
 0x627   :  { %2818 = vmatpush1.bf16.msra.mxu0 %v5919_v17  ;;  %2859 = vmatpush1.bf16.msra.mxu1 %v5921_v18  ;;  %v2298_v18 = vld [vmem:[#allocation2 + $0x20] sm:$0x30] }
 0x628   :  { %2819 = vmatprep.subr.bf16.mxu0 %v5927_v12  ;;  %2860 = vmatprep.subr.bf16.mxu1 %v5929_v13 }
 0x62b   :  { %2820 = vmatpush1.bf16.msra.mxu0 %v5931_v19  ;;  %2861 = vmatpush1.bf16.msra.mxu1 %v5933_v20  ;;  %v2299_v20 = vld [vmem:[#allocation2 + $0x28] sm:$0x30] }
 0x62c   :  { %2821 = vmatprep.subr.bf16.mxu0 %v5939_v21  ;;  %2862 = vmatprep.subr.bf16.mxu1 %v5941_v14 }
 0x62f   :  { %2822 = vmatpush1.bf16.msra.mxu0 %v5943_v15  ;;  %2863 = vmatpush1.bf16.msra.mxu1 %v5945_v22 }
 0x630   :  { %2823 = vmatprep.subr.bf16.mxu0 %v5951_v38  ;;  %2864 = vmatprep.subr.bf16.mxu1 %v5953_v39  ;;  %v2300_v38 = vld [vmem:[#allocation2 + $0x38] sm:$0x30] }
 0x633   :  { %2824 = vmatpush1.bf16.msra.mxu0 %v5955_v40  ;;  %2865 = vmatpush1.bf16.msra.mxu1 %v5957_v41 }
 0x634   :  { %2825 = vmatprep.subr.bf16.mxu0 %v5963_v42  ;;  %2866 = vmatprep.subr.bf16.mxu1 %v5965_v43 }
 0x637   :  { %2826 = vmatpush1.bf16.msra.mxu0 %v5967_v44  ;;  %2867 = vmatpush1.bf16.msra.mxu1 %v5969_v45 }
 0x638   :  { %2827 = vmatprep.subr.bf16.mxu0 %v5973_v46  ;;  %2868 = vmatprep.subr.bf16.mxu1 %v5975_v47  ;;  %v2605_v46 = vrot.slane %v6066_v27, 6 }
 0x63b   :  { %2828 = vmatpush1.bf16.msra.mxu0 %v5979_v48  ;;  %2869 = vmatpush1.bf16.msra.mxu1 %v5981_v49 }
 0x6de   :  { %v2530_v30 = vpop.f32.mrf.mxu0  ;;  %v2571_v32 = vpop.f32.mrf.mxu1 }
 0x6df   :  { %v2582_v33 = vrot.slane %v2530_v30, 4  ;;  %v2584_v16 = vrot.slane %v2571_v32, 4 }
 0x6e0   :  { %v2532_v37 = vpop.f32.mrf.mxu0  ;;  %v2573_v5 = vpop.f32.mrf.mxu1 }
 0x6e1   :  { %v2590_v9 = vadd.f32 %v2582_v33, %v2297_v34  ;;  %v2583_v17 = vrot.slane %v2532_v37, 4  ;;  %v2592_v15 = vadd.f32 %v2584_v16, %v2299_v20  ;;  %v2585_v22 = vrot.slane %v2573_v5, 4 }
 0x6e2   :  { %v2534_v12 = vpop.f32.mrf.mxu0  ;;  %v2575_v13 = vpop.f32.mrf.mxu1 }
 0x6e3   :  { %5160 = vtanh.f32 %v2590_v9  ;;  %v2591_v19 = vadd.f32 %v2583_v17, %v2298_v18  ;;  %v2593_v39 = vadd.f32 %v2585_v22, %v2300_v38 }
 0x6e4   :  { %v2535_v21 = vpop.f32.mrf.mxu0  ;;  %v2576_v14 = vpop.f32.mrf.mxu1 }
 0x6e5   :  { %5162 = vtanh.f32 %v2591_v19 }
 0x6e6   :  { %5164 = vtanh.f32 %v2592_v15 }
 0x6e7   :  { %5166 = vtanh.f32 %v2593_v39 }
 0x6f0   :  { %v5161_v40 = vpop.eup %5160 }
 0x6f1   :  { %v2595_v41 = vmul.f32 0.5, %v5161_v40 }
 0x6f2   :  { %v5163_v42 = vpop.eup %5162 }
 0x6f3   :  { %v2596_v43 = vadd.f32 0.5, %v2595_v41  ;;  %v2598_v44 = vmul.f32 0.5, %v5163_v42  ;;  %v5165_v47 = vpop.eup %5164 }
 0x6f4   :  { %v5167_v57 = vpop.eup %5166 }
 0x6f5   :  { %v2599_v45 = vadd.f32 0.5, %v2598_v44  ;;  %v2608_v49 = vmul.f32 %v5165_v47, %v2596_v43  ;;  %v2602_v55 = vmul.f32 0.5, %v5167_v57 }
 0x6f7   :  { %v2607_v48 = vmul.f32 %v2605_v46, %v2599_v45  ;;  %v2603_v58 = vadd.f32 0.5, %v2602_v55 }
 0x6f9   :  { %v6102_v63 = vadd.f32 %v2608_v49, %v2607_v48 }
 0x6fb   :  { %5168 = vtanh.f32 %v6102_v63 }
 0x708   :  { %v5169_v59 = vpop.eup %5168 }
 0x709   :  { %v2611_v60 = vmul.f32 %v5169_v59, %v2603_v58 }
 0x70b   :  { %v2612_v28 = vpack.c.bf16 %v2611_v60, %v2611_v60 }
 0x70d   :  { %2613 = vst [vmem:[#allocation3 + $0x4] sm:$0x4] %v2612_v28  ;;  %v2651_v29 = vrot.slane %v2612_v28, 2 }
 0x70f   :  { %2846 = vmatmul.mubr.bf16.vlgmr.msra.gmra.mxu0 %v2651_v29  ;;  %2887 = vmatmul.mubr.bf16.vlgmr.msra.gmra.mxu1 %v2651_v29 }
 0x710   :  { %5516 = shalt.err (!%p5513_p1)  }
 0x711   :  { %106 = dma.hbm_to_vmem [thread:$0]  %s6479_s5, 4096, %s104_s12, [#allocation5] }
 0x712   :  { %s5525_s23 = scalar_lea.vmem %s117_s18, 4096  ;;  %p5530_p3 = scmp.lt.s32.totalorder %s117_s18, %s104_s12 }
 0x713   :  { %p5526_p2 = scmp.ne.s32.totalorder %s117_s18, %s5525_s23  ;;  %p5531_p4 = scmp.lt.s32.totalorder %s5509_s20, %s5525_s23 }
 0x715   :  { %p5532_p5 = por %p5531_p4, %p5530_p3 }
 0x717   :  { %p5533_p6 = pnand %p5532_p5, %p5526_p2 }
 0x719   :  { %5536 = shalt.err (!%p5533_p6)  }
 0x71a   :  { %119 = dma.hbm_to_vmem [thread:$0]  %s6480_s6, 4096, %s117_s18, [#allocation5 + $0x1]  ;;  %v2614_v1 = vld [vmem:[#allocation2 + $0x8] sm:$0xc0]  ;;  %v2615_v56 = vld [vmem:[#allocation2 + $0x20] sm:$0xc0] }
 0x71b   :  { %v2616_v35 = vld [vmem:[#allocation2 + $0x28] sm:$0xc0]  ;;  %v2617_v53 = vld [vmem:[#allocation2 + $0x38] sm:$0xc0]  ;;  %v2922_v9 = vrot.slane %v6102_v63, 6 }
 0x7cf   :  { %v2847_v61 = vpop.f32.mrf.mxu0  ;;  %v2888_v62 = vpop.f32.mrf.mxu1 }
 0x7d0   :  { %v2899_v31 = vrot.slane %v2847_v61, 2  ;;  %v2901_v23 = vrot.slane %v2888_v62, 2 }
 0x7d1   :  { %v2849_v2 = vpop.f32.mrf.mxu0  ;;  %v2890_v3 = vpop.f32.mrf.mxu1 }
 0x7d2   :  { %v2907_v4 = vadd.f32 %v2899_v31, %v2614_v1  ;;  %v2900_v24 = vrot.slane %v2849_v2, 2  ;;  %v2909_v51 = vadd.f32 %v2901_v23, %v2616_v35  ;;  %v2902_v52 = vrot.slane %v2890_v3, 2 }
 0x7d3   :  { %v2851_v25 = vpop.f32.mrf.mxu0  ;;  %v2892_v26 = vpop.f32.mrf.mxu1 }
 0x7d4   :  { %5170 = vtanh.f32 %v2907_v4  ;;  %v2908_v27 = vadd.f32 %v2900_v24, %v2615_v56  ;;  %v2910_v54 = vadd.f32 %v2902_v52, %v2617_v53 }
 0x7d5   :  { %v2852_v36 = vpop.f32.mrf.mxu0  ;;  %v2893_v50 = vpop.f32.mrf.mxu1 }
 0x7d6   :  { %5172 = vtanh.f32 %v2908_v27 }
 0x7d7   :  { %5174 = vtanh.f32 %v2909_v51 }
 0x7d8   :  { %5176 = vtanh.f32 %v2910_v54 }
 0x7e1   :  { %v5171_v30 = vpop.eup %5170 }
 0x7e2   :  { %v2912_v32 = vmul.f32 0.5, %v5171_v30 }
 0x7e3   :  { %v5173_v33 = vpop.eup %5172 }
 0x7e4   :  { %v2913_v34 = vadd.f32 0.5, %v2912_v32  ;;  %v2915_v37 = vmul.f32 0.5, %v5173_v33  ;;  %v5175_v16 = vpop.eup %5174 }
 0x7e5   :  { %v5177_v13 = vpop.eup %5176 }
 0x7e6   :  { %v2916_v5 = vadd.f32 0.5, %v2915_v37  ;;  %v2925_v18 = vmul.f32 %v5175_v16, %v2913_v34  ;;  %v2919_v19 = vmul.f32 0.5, %v5177_v13 }
 0x7e8   :  { %v2924_v17 = vmul.f32 %v2922_v9, %v2916_v5  ;;  %v2920_v20 = vadd.f32 0.5, %v2919_v19 }
 0x7ea   :  { %v2926_v12 = vadd.f32 %v2925_v18, %v2924_v17 }
 0x7ec   :  { %5178 = vtanh.f32 %v2926_v12 }
 0x7f9   :  { %v5179_v21 = vpop.eup %5178 }
 0x7fa   :  { %v2928_v14 = vmul.f32 %v5179_v21, %v2920_v20 }
 0x7fc   :  { %v2929_v15 = vpack.c.bf16 %v2928_v14, %v2928_v14 }
 0x7fe   :  { %2930 = vst [vmem:[#allocation3 + $0x4] sm:$0x8] %v2929_v15 }
 0x7ff   :  { %5563 = dma.done.wait [#allocation5], 4096 }
 0x800   :  { %5564 = vsyncadd [#allocation5], 4294963200 }
 0x801   :  { %5565 = dma.done.wait [#allocation5 + $0x1], 4096 }
 0x802   :  { %5566 = vsyncadd [#allocation5 + $0x1], 4294963200  ;;  %3191 = vmatprep.mubr.bf16.mxu0 %v5580_v0  ;;  %3234 = vmatprep.mubr.bf16.mxu1 %v5580_v0  ;;  %v5180_v22 = vld [vmem:[#allocation4 + $0xe4] ss:$16 sps:$4 sm:$0xff]   ;;  %v5182_v38 = vld [vmem:[#allocation4 + $0xec] ss:$16 sps:$4 sm:$0xff]  }
 0x803   :  { %3159 = vmatprep.subr.bf16.mxu0 %v5180_v22  ;;  %v5184_v39 = vld [vmem:[#allocation4 + $0xe0] ss:$16 sps:$4 sm:$0xff]   ;;  %v5185_v40 = vld [vmem:[#allocation4 + $0xe8] ss:$16 sps:$4 sm:$0xff]   ;;  %3202 = vmatprep.subr.bf16.mxu1 %v5182_v38  ;;  %v5186_v41 = vld [vmem:[#allocation4 + $0xc4] ss:$16 sps:$4 sm:$0xff]  }
 0x804   :  { %3160 = vmatpush1.bf16.msra.mxu0 %v5184_v39  ;;  %3203 = vmatpush1.bf16.msra.mxu1 %v5185_v40  ;;  %v5188_v42 = vld [vmem:[#allocation4 + $0xcc] ss:$16 sps:$4 sm:$0xff]   ;;  %v5190_v43 = vld [vmem:[#allocation4 + $0xc0] ss:$16 sps:$4 sm:$0xff]   ;;  %v5191_v44 = vld [vmem:[#allocation4 + $0xc8] ss:$16 sps:$4 sm:$0xff]  }
 0x805   :  { %3161 = vmatprep.subr.bf16.mxu0 %v5186_v41  ;;  %3204 = vmatprep.subr.bf16.mxu1 %v5188_v42  ;;  %v5192_v45 = vld [vmem:[#allocation4 + $0xa4] ss:$16 sps:$4 sm:$0xff]   ;;  %v5194_v46 = vld [vmem:[#allocation4 + $0xac] ss:$16 sps:$4 sm:$0xff]   ;;  %v5196_v47 = vld [vmem:[#allocation4 + $0xa0] ss:$16 sps:$4 sm:$0xff]  }
 0x806   :  { %v5197_v48 = vld [vmem:[#allocation4 + $0xa8] ss:$16 sps:$4 sm:$0xff]   ;;  %v5198_v49 = vld [vmem:[#allocation4 + $0x84] ss:$16 sps:$4 sm:$0xff]   ;;  %v5200_v63 = vld [vmem:[#allocation4 + $0x8c] ss:$16 sps:$4 sm:$0xff]  }
 0x807   :  { %v5202_v57 = vld [vmem:[#allocation4 + $0x80] ss:$16 sps:$4 sm:$0xff]   ;;  %v5203_v55 = vld [vmem:[#allocation4 + $0x88] ss:$16 sps:$4 sm:$0xff]   ;;  %v5204_v58 = vld [vmem:[#allocation4 + $0x64] ss:$16 sps:$4 sm:$0xff]  }
 0x808   :  { %3162 = vmatpush1.bf16.msra.mxu0 %v5190_v43  ;;  %3205 = vmatpush1.bf16.msra.mxu1 %v5191_v44  ;;  %v5206_v59 = vld [vmem:[#allocation4 + $0x6c] ss:$16 sps:$4 sm:$0xff]   ;;  %v5208_v60 = vld [vmem:[#allocation4 + $0x60] ss:$16 sps:$4 sm:$0xff]   ;;  %v5209_v28 = vld [vmem:[#allocation4 + $0x68] ss:$16 sps:$4 sm:$0xff]  }
 0x809   :  { %3163 = vmatprep.subr.bf16.mxu0 %v5192_v45  ;;  %3206 = vmatprep.subr.bf16.mxu1 %v5194_v46  ;;  %v5210_v29 = vld [vmem:[#allocation4 + $0x44] ss:$16 sps:$4 sm:$0xff]   ;;  %v5212_v61 = vld [vmem:[#allocation4 + $0x4c] ss:$16 sps:$4 sm:$0xff]   ;;  %v5214_v62 = vld [vmem:[#allocation4 + $0x40] ss:$16 sps:$4 sm:$0xff]  }
 0x80a   :  { %v5215_v31 = vld [vmem:[#allocation4 + $0x48] ss:$16 sps:$4 sm:$0xff]   ;;  %v5216_v1 = vld [vmem:[#allocation4 + $0x24] ss:$16 sps:$4 sm:$0xff]   ;;  %v5218_v2 = vld [vmem:[#allocation4 + $0x2c] ss:$16 sps:$4 sm:$0xff]  }
 0x80b   :  { %v5220_v3 = vld [vmem:[#allocation4 + $0x20] ss:$16 sps:$4 sm:$0xff]   ;;  %v5221_v4 = vld [vmem:[#allocation4 + $0x28] ss:$16 sps:$4 sm:$0xff]   ;;  %v5222_v23 = vld [vmem:[#allocation4 + $0x4] ss:$16 sps:$4 sm:$0xff]  }
 0x80c   :  { %3164 = vmatpush1.bf16.msra.mxu0 %v5196_v47  ;;  %3207 = vmatpush1.bf16.msra.mxu1 %v5197_v48  ;;  %v5224_v24 = vld [vmem:[#allocation4 + $0xc] ss:$16 sps:$4 sm:$0xff]   ;;  %v5226_v56 = vld [vmem:[#allocation4] ss:$16 sps:$4 sm:$0xff]   ;;  %v5227_v25 = vld [vmem:[#allocation4 + $0x8] ss:$16 sps:$4 sm:$0xff]  }
 0x80d   :  { %3165 = vmatprep.subr.bf16.mxu0 %v5198_v49  ;;  %3208 = vmatprep.subr.bf16.mxu1 %v5200_v63  ;;  %v6114_v26 = vld [vmem:[#allocation4 + $0x1e4] ss:$16 sps:$4 sm:$0xff]   ;;  %v6116_v27 = vld [vmem:[#allocation4 + $0x1ec] ss:$16 sps:$4 sm:$0xff]   ;;  %v6118_v36 = vld [vmem:[#allocation4 + $0x1e0] ss:$16 sps:$4 sm:$0xff]  }
 0x80e   :  { %v5228_v35 = vld [vmem:[#allocation3] sm:$0xff]   ;;  %v6122_v51 = vld [vmem:[#allocation4 + $0x1c4] ss:$16 sps:$4 sm:$0xff]   ;;  %v6128_v53 = vld [vmem:[#allocation4 + $0x1c0] ss:$16 sps:$4 sm:$0xff]   ;;  %vm5584_vm0 = vmmov 0  }
 0x80f   :  { %v6120_v50 = vld [vmem:[#allocation4 + $0x1e8] ss:$16 sps:$4 sm:$0xff]   ;;  %v6126_v52 = vld [vmem:[#allocation4 + $0x1cc] ss:$16 sps:$4 sm:$0xff]   ;;  %v6136_v30 = vld [vmem:[#allocation4 + $0x1a4] ss:$16 sps:$4 sm:$0xff]  }
 0x810   :  { %3166 = vmatpush1.bf16.msra.mxu0 %v5202_v57  ;;  %3209 = vmatpush1.bf16.msra.mxu1 %v5203_v55  ;;  %v6132_v54 = vld [vmem:[#allocation4 + $0x1c8] ss:$16 sps:$4 sm:$0xff]   ;;  %v6138_v32 = vld [vmem:[#allocation4 + $0x1ac] ss:$16 sps:$4 sm:$0xff]   ;;  %v6144_v33 = vld [vmem:[#allocation4 + $0x1a0] ss:$16 sps:$4 sm:$0xff]  }
 0x811   :  { %3167 = vmatprep.subr.bf16.mxu0 %v5204_v58  ;;  %3210 = vmatprep.subr.bf16.mxu1 %v5206_v59  ;;  %v6146_v34 = vld [vmem:[#allocation4 + $0x1a8] ss:$16 sps:$4 sm:$0xff]   ;;  %v6148_v37 = vld [vmem:[#allocation4 + $0x184] ss:$16 sps:$4 sm:$0xff]   ;;  %v6152_v5 = vld [vmem:[#allocation4 + $0x18c] ss:$16 sps:$4 sm:$0xff]  }
 0x812   :  { %v6154_v9 = vld [vmem:[#allocation4 + $0x180] ss:$16 sps:$4 sm:$0xff]   ;;  %v6156_v16 = vld [vmem:[#allocation4 + $0x188] ss:$16 sps:$4 sm:$0xff]   ;;  %v6158_v17 = vld [vmem:[#allocation4 + $0x164] ss:$16 sps:$4 sm:$0xff]  }
 0x813   :  { %v6160_v18 = vld [vmem:[#allocation4 + $0x16c] ss:$16 sps:$4 sm:$0xff]   ;;  %v6166_v12 = vld [vmem:[#allocation4 + $0x160] ss:$16 sps:$4 sm:$0xff]   ;;  %v6168_v13 = vld [vmem:[#allocation4 + $0x168] ss:$16 sps:$4 sm:$0xff]  }
 0x814   :  { %3168 = vmatpush1.bf16.msra.mxu0 %v5208_v60  ;;  %3211 = vmatpush1.bf16.msra.mxu1 %v5209_v28  ;;  %v6174_v19 = vld [vmem:[#allocation4 + $0x144] ss:$16 sps:$4 sm:$0xff]   ;;  %v6176_v20 = vld [vmem:[#allocation4 + $0x14c] ss:$16 sps:$4 sm:$0xff]   ;;  %v6180_v21 = vld [vmem:[#allocation4 + $0x140] ss:$16 sps:$4 sm:$0xff]  }
 0x815   :  { %3169 = vmatprep.subr.bf16.mxu0 %v5210_v29  ;;  %3212 = vmatprep.subr.bf16.mxu1 %v5212_v61  ;;  %v6182_v14 = vld [vmem:[#allocation4 + $0x148] ss:$16 sps:$4 sm:$0xff]   ;;  %v6186_v15 = vld [vmem:[#allocation4 + $0x124] ss:$16 sps:$4 sm:$0xff]   ;;  %v6188_v22 = vld [vmem:[#allocation4 + $0x12c] ss:$16 sps:$4 sm:$0xff]  }
 0x816   :  { %v6192_v38 = vld [vmem:[#allocation4 + $0x120] ss:$16 sps:$4 sm:$0xff]   ;;  %v6194_v39 = vld [vmem:[#allocation4 + $0x128] ss:$16 sps:$4 sm:$0xff]   ;;  %v6198_v40 = vld [vmem:[#allocation4 + $0x104] ss:$16 sps:$4 sm:$0xff]  }
 0x817   :  { %v6200_v41 = vld [vmem:[#allocation4 + $0x10c] ss:$16 sps:$4 sm:$0xff]   ;;  %v6204_v42 = vld [vmem:[#allocation4 + $0x100] ss:$16 sps:$4 sm:$0xff]   ;;  %v6206_v43 = vld [vmem:[#allocation4 + $0x108] ss:$16 sps:$4 sm:$0xff]  }
 0x818   :  { %3170 = vmatpush1.bf16.msra.mxu0 %v5214_v62  ;;  %3213 = vmatpush1.bf16.msra.mxu1 %v5215_v31  ;;  %v2971_v44 = vld [vmem:[#allocation12] sm:$0xf]  ;;  %s5585_s25 = smov [#allocation15]  }
 0x819   :  { %3171 = vmatprep.subr.bf16.mxu0 %v5216_v1  ;;  %3214 = vmatprep.subr.bf16.mxu1 %v5218_v2  ;;  %v2976_v45 = vrot.slane %v2971_v44, %v159_v7  ;;  %v2984_v46 = vrot.slane %v2971_v44, %v167_v8  ;;  %v2980_v47 = vrot.slane %v2971_v44, %v163_v10  ;;  %s4522_s26 = sshll.u32 %s5585_s25, 4  ;;  %s4523_s26 = int_to_ptr.vmem [resolvable:$true] %s4522_s26 }
 0x81a   :  { %v2988_v48 = vrot.slane %v2971_v44, %v171_v11  ;;  %s5537_s27 = scalar_lea.vmem %s4523_s26, 32  ;;  %p5542_p8 = scmp.lt.s32.totalorder %s4523_s26, %s4523_s26 }
 0x81b   :  { %p5538_p7 = scmp.ne.s32.totalorder %s4523_s26, %s5537_s27  ;;  %p5543_p9 = scmp.lt.s32.totalorder %s5537_s27, %s5537_s27 }
 0x81c   :  { %3172 = vmatpush1.bf16.msra.mxu0 %v5220_v3  ;;  %3215 = vmatpush1.bf16.msra.mxu1 %v5221_v4 }
 0x81d   :  { %3173 = vmatprep.subr.bf16.mxu0 %v5222_v23  ;;  %3216 = vmatprep.subr.bf16.mxu1 %v5224_v24  ;;  %p5544_p10 = por %p5543_p9, %p5542_p8 }
 0x81f   :  { %p5545_p11 = pnand %p5544_p10, %p5538_p7 }
 0x820   :  { %3174 = vmatpush1.bf16.msra.mxu0 %v5226_v56  ;;  %3217 = vmatpush1.bf16.msra.mxu1 %v5227_v25 }
 0x821   :  { %3449 = vmatprep.subr.bf16.mxu0 %v6114_v26  ;;  %3490 = vmatprep.subr.bf16.mxu1 %v6116_v27 }
 0x823   :  { %3192 = vmatmul.mubr.bf16.vlgmr.msra.gmra.mxu0 %v5228_v35  ;;  %3235 = vmatmul.mubr.bf16.vlgmr.msra.gmra.mxu1 %v5228_v35 }
 0x824   :  { %3450 = vmatpush1.bf16.msra.mxu0 %v6118_v36  ;;  %3491 = vmatpush1.bf16.msra.mxu1 %v6120_v50 }
 0x825   :  { %3451 = vmatprep.subr.bf16.mxu0 %v6122_v51  ;;  %3492 = vmatprep.subr.bf16.mxu1 %v6126_v52 }
 0x826   :  { %3481 = vmatprep.mubr.bf16.mxu0 %v5580_v0  ;;  %3522 = vmatprep.mubr.bf16.mxu1 %v5580_v0 }
 0x828   :  { %3452 = vmatpush1.bf16.msra.mxu0 %v6128_v53  ;;  %3493 = vmatpush1.bf16.msra.mxu1 %v6132_v54 }
 0x829   :  { %3453 = vmatprep.subr.bf16.mxu0 %v6136_v30  ;;  %3494 = vmatprep.subr.bf16.mxu1 %v6138_v32 }
 0x82c   :  { %3454 = vmatpush1.bf16.msra.mxu0 %v6144_v33  ;;  %3495 = vmatpush1.bf16.msra.mxu1 %v6146_v34 }
 0x82d   :  { %3455 = vmatprep.subr.bf16.mxu0 %v6148_v37  ;;  %3496 = vmatprep.subr.bf16.mxu1 %v6152_v5 }
 0x830   :  { %3456 = vmatpush1.bf16.msra.mxu0 %v6154_v9  ;;  %3497 = vmatpush1.bf16.msra.mxu1 %v6156_v16 }
 0x831   :  { %3457 = vmatprep.subr.bf16.mxu0 %v6158_v17  ;;  %3498 = vmatprep.subr.bf16.mxu1 %v6160_v18 }
 0x834   :  { %3458 = vmatpush1.bf16.msra.mxu0 %v6166_v12  ;;  %3499 = vmatpush1.bf16.msra.mxu1 %v6168_v13 }
 0x835   :  { %3459 = vmatprep.subr.bf16.mxu0 %v6174_v19  ;;  %3500 = vmatprep.subr.bf16.mxu1 %v6176_v20 }
 0x838   :  { %3460 = vmatpush1.bf16.msra.mxu0 %v6180_v21  ;;  %3501 = vmatpush1.bf16.msra.mxu1 %v6182_v14 }
 0x839   :  { %3461 = vmatprep.subr.bf16.mxu0 %v6186_v15  ;;  %3502 = vmatprep.subr.bf16.mxu1 %v6188_v22 }
 0x83c   :  { %3462 = vmatpush1.bf16.msra.mxu0 %v6192_v38  ;;  %3503 = vmatpush1.bf16.msra.mxu1 %v6194_v39 }
 0x83d   :  { %3463 = vmatprep.subr.bf16.mxu0 %v6198_v40  ;;  %3504 = vmatprep.subr.bf16.mxu1 %v6200_v41 }
 0x840   :  { %3464 = vmatpush1.bf16.msra.mxu0 %v6204_v42  ;;  %3505 = vmatpush1.bf16.msra.mxu1 %v6206_v43 }
 0x841   :  { %3555 = vmatprep.subr.bf16.mxu0 %v6114_v26  ;;  %3596 = vmatprep.subr.bf16.mxu1 %v6116_v27 }
 0x843   :  { %3482 = vmatmul.mubr.bf16.vlgmr.msra.gmra.mxu0 %v5580_v0  ;;  %3523 = vmatmul.mubr.bf16.vlgmr.msra.gmra.mxu1 %v5580_v0 }
 0x844   :  { %3556 = vmatpush1.bf16.msra.mxu0 %v6118_v36  ;;  %3597 = vmatpush1.bf16.msra.mxu1 %v6120_v50 }
 0x845   :  { %3557 = vmatprep.subr.bf16.mxu0 %v6122_v51  ;;  %3598 = vmatprep.subr.bf16.mxu1 %v6126_v52 }
 0x846   :  { %3587 = vmatprep.mubr.bf16.mxu0 %v5580_v0  ;;  %3628 = vmatprep.mubr.bf16.mxu1 %v5580_v0 }
 0x848   :  { %3558 = vmatpush1.bf16.msra.mxu0 %v6128_v53  ;;  %3599 = vmatpush1.bf16.msra.mxu1 %v6132_v54 }
 0x849   :  { %3559 = vmatprep.subr.bf16.mxu0 %v6136_v30  ;;  %3600 = vmatprep.subr.bf16.mxu1 %v6138_v32 }
 0x84c   :  { %3560 = vmatpush1.bf16.msra.mxu0 %v6144_v33  ;;  %3601 = vmatpush1.bf16.msra.mxu1 %v6146_v34 }
 0x84d   :  { %3561 = vmatprep.subr.bf16.mxu0 %v6148_v37  ;;  %3602 = vmatprep.subr.bf16.mxu1 %v6152_v5 }
 0x850   :  { %3562 = vmatpush1.bf16.msra.mxu0 %v6154_v9  ;;  %3603 = vmatpush1.bf16.msra.mxu1 %v6156_v16 }
 0x851   :  { %3563 = vmatprep.subr.bf16.mxu0 %v6158_v17  ;;  %3604 = vmatprep.subr.bf16.mxu1 %v6160_v18 }
 0x854   :  { %3564 = vmatpush1.bf16.msra.mxu0 %v6166_v12  ;;  %3605 = vmatpush1.bf16.msra.mxu1 %v6168_v13 }
 0x855   :  { %3565 = vmatprep.subr.bf16.mxu0 %v6174_v19  ;;  %3606 = vmatprep.subr.bf16.mxu1 %v6176_v20 }
 0x858   :  { %3566 = vmatpush1.bf16.msra.mxu0 %v6180_v21  ;;  %3607 = vmatpush1.bf16.msra.mxu1 %v6182_v14 }
 0x859   :  { %3567 = vmatprep.subr.bf16.mxu0 %v6186_v15  ;;  %3608 = vmatprep.subr.bf16.mxu1 %v6188_v22 }
 0x85c   :  { %3568 = vmatpush1.bf16.msra.mxu0 %v6192_v38  ;;  %3609 = vmatpush1.bf16.msra.mxu1 %v6194_v39 }
 0x85d   :  { %3569 = vmatprep.subr.bf16.mxu0 %v6198_v40  ;;  %3610 = vmatprep.subr.bf16.mxu1 %v6200_v41 }
 0x860   :  { %3570 = vmatpush1.bf16.msra.mxu0 %v6204_v42  ;;  %3611 = vmatpush1.bf16.msra.mxu1 %v6206_v43 }
 0x861   :  { %3679 = vmatprep.subr.bf16.mxu0 %v6114_v26  ;;  %3720 = vmatprep.subr.bf16.mxu1 %v6116_v27 }
 0x8e3   :  { %v3193_v49 = vpop.f32.mrf.mxu0  ;;  %v3236_v63 = vpop.f32.mrf.mxu1 }
 0x8e4   :  { %v3194_v57 = vadd.f32 %v3193_v49, %v2976_v45  ;;  %v3237_v55 = vadd.f32 %v3236_v63, %v2984_v46 }
 0x8e5   :  { %v3195_v58 = vpop.f32.mrf.mxu0  ;;  %v3238_v59 = vpop.f32.mrf.mxu1 }
 0x8e6   :  { %3245 = vst [vmem:[#allocation2 + $0x30] sm:$0xff] %v3194_v57  ;;  %3247 = vst [vmem:[#allocation2 + $0x18] sm:$0xff] %v3237_v55  ;;  %v3196_v60 = vadd.f32 %v3195_v58, %v2980_v47  ;;  %v3239_v28 = vadd.f32 %v3238_v59, %v2988_v48 }
 0x8e7   :  { %v3197_v7 = vpop.f32.mrf.mxu0  ;;  %v3240_v29 = vpop.f32.mrf.mxu1 }
 0x8e8   :  { %3246 = vst [vmem:[#allocation2] sm:$0xff] %v3196_v60  ;;  %3248 = vst [vmem:[#allocation2 + $0x10] sm:$0xff] %v3239_v28  ;;  %v3198_v8 = vadd.f32 %v3197_v7, %v2976_v45  ;;  %v3241_v61 = vadd.f32 %v3240_v29, %v2984_v46 }
 0x8e9   :  { %v3199_v10 = vpop.f32.mrf.mxu0  ;;  %v3242_v62 = vpop.f32.mrf.mxu1 }
 0x8ea   :  { %3249 = vst [vmem:[#allocation2 + $0x8] sm:$0xff] %v3198_v8  ;;  %3251 = vst [vmem:[#allocation2 + $0x28] sm:$0xff] %v3241_v61  ;;  %v3200_v6 = vadd.f32 %v3199_v10, %v2980_v47  ;;  %v3243_v11 = vadd.f32 %v3242_v62, %v2988_v48 }
 0x8ec   :  { %3250 = vst [vmem:[#allocation2 + $0x20] sm:$0xff] %v3200_v6  ;;  %3252 = vst [vmem:[#allocation2 + $0x38] sm:$0xff] %v3243_v11 }
 0x8ed   :  { %v3253_v31 = vld [vmem:[#allocation2 + $0x30] sm:$0x3]  ;;  %v3255_v25 = vld [vmem:[#allocation2 + $0x18] sm:$0x3] }
 0x8ef   :  { %v3254_v4 = vld [vmem:[#allocation2] sm:$0x3]  ;;  %v3256_v47 = vld [vmem:[#allocation2 + $0x10] sm:$0x3] }
 0x903   :  { %v3483_v1 = vpop.f32.mrf.mxu0  ;;  %v3524_v2 = vpop.f32.mrf.mxu1 }
 0x904   :  { %v3531_v3 = vadd.f32 %v3483_v1, %v3253_v31  ;;  %v3533_v45 = vadd.f32 %v3524_v2, %v3255_v25 }
 0x905   :  { %v3485_v23 = vpop.f32.mrf.mxu0  ;;  %v3526_v24 = vpop.f32.mrf.mxu1 }
 0x906   :  { %5285 = vtanh.f32 %v3531_v3  ;;  %v3532_v56 = vadd.f32 %v3485_v23, %v3254_v4  ;;  %v3534_v48 = vadd.f32 %v3526_v24, %v3256_v47  ;;  %v3551_v4 = vld [vmem:[#allocation2 + $0x30] sm:$0xc]  ;;  %v3553_v47 = vld [vmem:[#allocation2 + $0x18] sm:$0xc] }
 0x907   :  { %v3487_v35 = vpop.f32.mrf.mxu0  ;;  %v3528_v44 = vpop.f32.mrf.mxu1 }
 0x908   :  { %5287 = vtanh.f32 %v3532_v56  ;;  %v3552_v44 = vld [vmem:[#allocation2] sm:$0xc] }
 0x909   :  { %v3488_v46 = vpop.f32.mrf.mxu0  ;;  %v3529_v49 = vpop.f32.mrf.mxu1  ;;  %5289 = vtanh.f32 %v3533_v45 }
 0x90a   :  { %5291 = vtanh.f32 %v3534_v48 }
 0x913   :  { %v5286_v63 = vpop.eup %5285 }
 0x914   :  { %v3536_v57 = vmul.f32 0.5, %v5286_v63 }
 0x915   :  { %v5288_v55 = vpop.eup %5287 }
 0x916   :  { %v3537_v58 = vadd.f32 0.5, %v3536_v57  ;;  %v3539_v59 = vmul.f32 0.5, %v5288_v55  ;;  %v5290_v28 = vpop.eup %5289 }
 0x917   :  { %v5292_v61 = vpop.eup %5291 }
 0x918   :  { %v3540_v60 = vadd.f32 0.5, %v3539_v59  ;;  %v3546_v29 = vmul.f32 %v5290_v28, %v3537_v58  ;;  %v3543_v10 = vmul.f32 0.5, %v5292_v61  ;;  %v3554_v58 = vld [vmem:[#allocation2 + $0x10] sm:$0xc] }
 0x91a   :  { %v3545_v7 = vmul.f32 0.0, %v3540_v60  ;;  %v3544_v62 = vadd.f32 0.5, %v3543_v10 }
 0x91c   :  { %v6258_v8 = vadd.f32 %v3546_v29, %v3545_v7 }
 0x91e   :  { %5293 = vtanh.f32 %v6258_v8  ;;  %v3664_v10 = vrot.slane %v6258_v8, 6 }
 0x92b   :  { %v5294_v6 = vpop.eup %5293 }
 0x92c   :  { %v3549_v11 = vmul.f32 %v5294_v6, %v3544_v62 }
 0x92e   :  { %v3550_v31 = vpack.c.bf16 %v3549_v11, %v3549_v11 }
 0x930   :  { %3588 = vmatmul.mubr.bf16.vlgmr.msra.gmra.mxu0 %v3550_v31  ;;  %3629 = vmatmul.mubr.bf16.vlgmr.msra.gmra.mxu1 %v3550_v31 }
 0x931   :  { %3680 = vmatpush1.bf16.msra.mxu0 %v6118_v36  ;;  %3721 = vmatpush1.bf16.msra.mxu1 %v6120_v50 }
 0x932   :  { %3681 = vmatprep.subr.bf16.mxu0 %v6122_v51  ;;  %3722 = vmatprep.subr.bf16.mxu1 %v6126_v52 }
 0x933   :  { %3711 = vmatprep.mubr.bf16.mxu0 %v5580_v0  ;;  %3752 = vmatprep.mubr.bf16.mxu1 %v5580_v0 }
 0x935   :  { %3682 = vmatpush1.bf16.msra.mxu0 %v6128_v53  ;;  %3723 = vmatpush1.bf16.msra.mxu1 %v6132_v54 }
 0x936   :  { %3683 = vmatprep.subr.bf16.mxu0 %v6136_v30  ;;  %3724 = vmatprep.subr.bf16.mxu1 %v6138_v32 }
 0x939   :  { %3684 = vmatpush1.bf16.msra.mxu0 %v6144_v33  ;;  %3725 = vmatpush1.bf16.msra.mxu1 %v6146_v34 }
 0x93a   :  { %3685 = vmatprep.subr.bf16.mxu0 %v6148_v37  ;;  %3726 = vmatprep.subr.bf16.mxu1 %v6152_v5 }
 0x93d   :  { %3686 = vmatpush1.bf16.msra.mxu0 %v6154_v9  ;;  %3727 = vmatpush1.bf16.msra.mxu1 %v6156_v16 }
 0x93e   :  { %3687 = vmatprep.subr.bf16.mxu0 %v6158_v17  ;;  %3728 = vmatprep.subr.bf16.mxu1 %v6160_v18 }
 0x941   :  { %3688 = vmatpush1.bf16.msra.mxu0 %v6166_v12  ;;  %3729 = vmatpush1.bf16.msra.mxu1 %v6168_v13 }
 0x942   :  { %3689 = vmatprep.subr.bf16.mxu0 %v6174_v19  ;;  %3730 = vmatprep.subr.bf16.mxu1 %v6176_v20 }
 0x945   :  { %3690 = vmatpush1.bf16.msra.mxu0 %v6180_v21  ;;  %3731 = vmatpush1.bf16.msra.mxu1 %v6182_v14 }
 0x946   :  { %3691 = vmatprep.subr.bf16.mxu0 %v6186_v15  ;;  %3732 = vmatprep.subr.bf16.mxu1 %v6188_v22 }
 0x949   :  { %3692 = vmatpush1.bf16.msra.mxu0 %v6192_v38  ;;  %3733 = vmatpush1.bf16.msra.mxu1 %v6194_v39 }
 0x94a   :  { %3693 = vmatprep.subr.bf16.mxu0 %v6198_v40  ;;  %3734 = vmatprep.subr.bf16.mxu1 %v6200_v41 }
 0x94d   :  { %3694 = vmatpush1.bf16.msra.mxu0 %v6204_v42  ;;  %3735 = vmatpush1.bf16.msra.mxu1 %v6206_v43 }
 0x94e   :  { %3803 = vmatprep.subr.bf16.mxu0 %v6114_v26  ;;  %3844 = vmatprep.subr.bf16.mxu1 %v6116_v27 }
 0x9f0   :  { %v3589_v1 = vpop.f32.mrf.mxu0  ;;  %v3630_v2 = vpop.f32.mrf.mxu1 }
 0x9f1   :  { %v3641_v3 = vrot.slane %v3589_v1, 6  ;;  %v3643_v25 = vrot.slane %v3630_v2, 6 }
 0x9f2   :  { %v3591_v23 = vpop.f32.mrf.mxu0  ;;  %v3632_v24 = vpop.f32.mrf.mxu1 }
 0x9f3   :  { %v3649_v56 = vadd.f32 %v3641_v3, %v3551_v4  ;;  %v3642_v35 = vrot.slane %v3591_v23, 6  ;;  %v3651_v57 = vadd.f32 %v3643_v25, %v3553_v47  ;;  %v3644_v55 = vrot.slane %v3632_v24, 6 }
 0x9f4   :  { %v3593_v45 = vpop.f32.mrf.mxu0  ;;  %v3634_v46 = vpop.f32.mrf.mxu1 }
 0x9f5   :  { %5295 = vtanh.f32 %v3649_v56  ;;  %v3650_v49 = vadd.f32 %v3642_v35, %v3552_v44  ;;  %v3652_v59 = vadd.f32 %v3644_v55, %v3554_v58  ;;  %v3672_v45 = vld [vmem:[#allocation2 + $0x30] sm:$0x30] }
 0x9f6   :  { %v3594_v48 = vpop.f32.mrf.mxu0  ;;  %v3635_v63 = vpop.f32.mrf.mxu1 }
 0x9f7   :  { %5297 = vtanh.f32 %v3650_v49 }
 0x9f8   :  { %5299 = vtanh.f32 %v3651_v57  ;;  %v3673_v57 = vld [vmem:[#allocation2] sm:$0x30] }
 0x9f9   :  { %5301 = vtanh.f32 %v3652_v59 }
 0xa02   :  { %v5296_v60 = vpop.eup %5295 }
 0xa03   :  { %v3654_v28 = vmul.f32 0.5, %v5296_v60  ;;  %v3674_v60 = vld [vmem:[#allocation2 + $0x18] sm:$0x30] }
 0xa04   :  { %v5298_v7 = vpop.eup %5297 }
 0xa05   :  { %v3655_v29 = vadd.f32 0.5, %v3654_v28  ;;  %v3657_v61 = vmul.f32 0.5, %v5298_v7  ;;  %v5300_v6 = vpop.eup %5299 }
 0xa06   :  { %v5302_v2 = vpop.eup %5301 }
 0xa07   :  { %v3658_v62 = vadd.f32 0.5, %v3657_v61  ;;  %v3667_v31 = vmul.f32 %v5300_v6, %v3655_v29  ;;  %v3661_v3 = vmul.f32 0.5, %v5302_v2 }
 0xa09   :  { %v3666_v11 = vmul.f32 %v3664_v10, %v3658_v62  ;;  %v3662_v4 = vadd.f32 0.5, %v3661_v3  ;;  %v3675_v10 = vld [vmem:[#allocation2 + $0x10] sm:$0x30] }
 0xa0b   :  { %v6296_v1 = vadd.f32 %v3667_v31, %v3666_v11 }
 0xa0d   :  { %5303 = vtanh.f32 %v6296_v1 }
 0xa1a   :  { %v5304_v23 = vpop.eup %5303 }
 0xa1b   :  { %v3670_v24 = vmul.f32 %v5304_v23, %v3662_v4  ;;  %v3788_v23 = vrot.slane %v6296_v1, 6 }
 0xa1d   :  { %v3671_v56 = vpack.c.bf16 %v3670_v24, %v3670_v24 }
 0xa1f   :  { %v3677_v25 = vrot.slane %v3671_v56, 1 }
 0xa21   :  { %3712 = vmatmul.mubr.bf16.vlgmr.msra.gmra.mxu0 %v3677_v25  ;;  %3753 = vmatmul.mubr.bf16.vlgmr.msra.gmra.mxu1 %v3677_v25 }
 0xa22   :  { %3804 = vmatpush1.bf16.msra.mxu0 %v6118_v36  ;;  %3845 = vmatpush1.bf16.msra.mxu1 %v6120_v50 }
 0xa23   :  { %3805 = vmatprep.subr.bf16.mxu0 %v6122_v51  ;;  %3846 = vmatprep.subr.bf16.mxu1 %v6126_v52 }
 0xa24   :  { %3835 = vmatprep.mubr.bf16.mxu0 %v5580_v0  ;;  %3876 = vmatprep.mubr.bf16.mxu1 %v5580_v0 }
 0xa26   :  { %3806 = vmatpush1.bf16.msra.mxu0 %v6128_v53  ;;  %3847 = vmatpush1.bf16.msra.mxu1 %v6132_v54 }
 0xa27   :  { %3807 = vmatprep.subr.bf16.mxu0 %v6136_v30  ;;  %3848 = vmatprep.subr.bf16.mxu1 %v6138_v32 }
 0xa2a   :  { %3808 = vmatpush1.bf16.msra.mxu0 %v6144_v33  ;;  %3849 = vmatpush1.bf16.msra.mxu1 %v6146_v34 }
 0xa2b   :  { %3809 = vmatprep.subr.bf16.mxu0 %v6148_v37  ;;  %3850 = vmatprep.subr.bf16.mxu1 %v6152_v5 }
 0xa2e   :  { %3810 = vmatpush1.bf16.msra.mxu0 %v6154_v9  ;;  %3851 = vmatpush1.bf16.msra.mxu1 %v6156_v16 }
 0xa2f   :  { %3811 = vmatprep.subr.bf16.mxu0 %v6158_v17  ;;  %3852 = vmatprep.subr.bf16.mxu1 %v6160_v18 }
 0xa32   :  { %3812 = vmatpush1.bf16.msra.mxu0 %v6166_v12  ;;  %3853 = vmatpush1.bf16.msra.mxu1 %v6168_v13 }
 0xa33   :  { %3813 = vmatprep.subr.bf16.mxu0 %v6174_v19  ;;  %3854 = vmatprep.subr.bf16.mxu1 %v6176_v20 }
 0xa36   :  { %3814 = vmatpush1.bf16.msra.mxu0 %v6180_v21  ;;  %3855 = vmatpush1.bf16.msra.mxu1 %v6182_v14 }
 0xa37   :  { %3815 = vmatprep.subr.bf16.mxu0 %v6186_v15  ;;  %3856 = vmatprep.subr.bf16.mxu1 %v6188_v22 }
 0xa3a   :  { %3816 = vmatpush1.bf16.msra.mxu0 %v6192_v38  ;;  %3857 = vmatpush1.bf16.msra.mxu1 %v6194_v39 }
 0xa3b   :  { %3817 = vmatprep.subr.bf16.mxu0 %v6198_v40  ;;  %3858 = vmatprep.subr.bf16.mxu1 %v6200_v41 }
 0xa3e   :  { %3818 = vmatpush1.bf16.msra.mxu0 %v6204_v42  ;;  %3859 = vmatpush1.bf16.msra.mxu1 %v6206_v43 }
 0xa3f   :  { %3927 = vmatprep.subr.bf16.mxu0 %v6114_v26  ;;  %3968 = vmatprep.subr.bf16.mxu1 %v6116_v27 }
 0xae1   :  { %v3713_v8 = vpop.f32.mrf.mxu0  ;;  %v3754_v35 = vpop.f32.mrf.mxu1 }
 0xae2   :  { %v3765_v44 = vrot.slane %v3713_v8, 4  ;;  %v3767_v48 = vrot.slane %v3754_v35, 4 }
 0xae3   :  { %v3715_v46 = vpop.f32.mrf.mxu0  ;;  %v3756_v49 = vpop.f32.mrf.mxu1 }
 0xae4   :  { %v3773_v47 = vadd.f32 %v3765_v44, %v3672_v45  ;;  %v3766_v63 = vrot.slane %v3715_v46, 4  ;;  %v3775_v29 = vadd.f32 %v3767_v48, %v3674_v60  ;;  %v3768_v61 = vrot.slane %v3756_v49, 4 }
 0xae5   :  { %v3717_v55 = vpop.f32.mrf.mxu0  ;;  %v3758_v58 = vpop.f32.mrf.mxu1 }
 0xae6   :  { %5305 = vtanh.f32 %v3773_v47  ;;  %v3774_v59 = vadd.f32 %v3766_v63, %v3673_v57  ;;  %v3776_v62 = vadd.f32 %v3768_v61, %v3675_v10  ;;  %v3796_v55 = vld [vmem:[#allocation2 + $0x30] sm:$0xc0] }
 0xae7   :  { %v3718_v28 = vpop.f32.mrf.mxu0  ;;  %v3759_v7 = vpop.f32.mrf.mxu1 }
 0xae8   :  { %5307 = vtanh.f32 %v3774_v59 }
 0xae9   :  { %5309 = vtanh.f32 %v3775_v29  ;;  %v3797_v29 = vld [vmem:[#allocation2] sm:$0xc0] }
 0xaea   :  { %5311 = vtanh.f32 %v3776_v62 }
 0xaf3   :  { %v5306_v6 = vpop.eup %5305 }
 0xaf4   :  { %v3778_v11 = vmul.f32 0.5, %v5306_v6  ;;  %v3798_v6 = vld [vmem:[#allocation2 + $0x18] sm:$0xc0] }
 0xaf5   :  { %v5308_v31 = vpop.eup %5307 }
 0xaf6   :  { %v3779_v2 = vadd.f32 0.5, %v3778_v11  ;;  %v3781_v3 = vmul.f32 0.5, %v5308_v31  ;;  %v5310_v24 = vpop.eup %5309 }
 0xaf7   :  { %v5312_v35 = vpop.eup %5311 }
 0xaf8   :  { %v3782_v4 = vadd.f32 0.5, %v3781_v3  ;;  %v3791_v25 = vmul.f32 %v5310_v24, %v3779_v2  ;;  %v3785_v44 = vmul.f32 0.5, %v5312_v35 }
 0xafa   :  { %v3790_v56 = vmul.f32 %v3788_v23, %v3782_v4  ;;  %v3786_v45 = vadd.f32 0.5, %v3785_v44  ;;  %v3799_v4 = vld [vmem:[#allocation2 + $0x10] sm:$0xc0] }
 0xafc   :  { %v6334_v8 = vadd.f32 %v3791_v25, %v3790_v56 }
 0xafe   :  { %5313 = vtanh.f32 %v6334_v8 }
 0xb0b   :  { %v5314_v46 = vpop.eup %5313 }
 0xb0c   :  { %v3794_v49 = vmul.f32 %v5314_v46, %v3786_v45  ;;  %v3912_v46 = vrot.slane %v6334_v8, 6  ;;  %v3921_v8 = vld [vmem:[#allocation2 + $0x20] sm:$0x3] }
 0xb0e   :  { %v3795_v47 = vpack.c.bf16 %v3794_v49, %v3794_v49 }
 0xb10   :  { %v3801_v48 = vrot.slane %v3795_v47, 2 }
 0xb12   :  { %3836 = vmatmul.mubr.bf16.vlgmr.msra.gmra.mxu0 %v3801_v48  ;;  %3877 = vmatmul.mubr.bf16.vlgmr.msra.gmra.mxu1 %v3801_v48 }
 0xb13   :  { %3928 = vmatpush1.bf16.msra.mxu0 %v6118_v36  ;;  %3969 = vmatpush1.bf16.msra.mxu1 %v6120_v50 }
 0xb14   :  { %3929 = vmatprep.subr.bf16.mxu0 %v6122_v51  ;;  %3970 = vmatprep.subr.bf16.mxu1 %v6126_v52 }
 0xb15   :  { %3959 = vmatprep.mubr.bf16.mxu0 %v5580_v0  ;;  %4000 = vmatprep.mubr.bf16.mxu1 %v5580_v0 }
 0xb17   :  { %3930 = vmatpush1.bf16.msra.mxu0 %v6128_v53  ;;  %3971 = vmatpush1.bf16.msra.mxu1 %v6132_v54 }
 0xb18   :  { %3931 = vmatprep.subr.bf16.mxu0 %v6136_v30  ;;  %3972 = vmatprep.subr.bf16.mxu1 %v6138_v32 }
 0xb1b   :  { %3932 = vmatpush1.bf16.msra.mxu0 %v6144_v33  ;;  %3973 = vmatpush1.bf16.msra.mxu1 %v6146_v34 }
 0xb1c   :  { %3933 = vmatprep.subr.bf16.mxu0 %v6148_v37  ;;  %3974 = vmatprep.subr.bf16.mxu1 %v6152_v5 }
 0xb1f   :  { %3934 = vmatpush1.bf16.msra.mxu0 %v6154_v9  ;;  %3975 = vmatpush1.bf16.msra.mxu1 %v6156_v16 }
 0xb20   :  { %3935 = vmatprep.subr.bf16.mxu0 %v6158_v17  ;;  %3976 = vmatprep.subr.bf16.mxu1 %v6160_v18 }
 0xb23   :  { %3936 = vmatpush1.bf16.msra.mxu0 %v6166_v12  ;;  %3977 = vmatpush1.bf16.msra.mxu1 %v6168_v13 }
 0xb24   :  { %3937 = vmatprep.subr.bf16.mxu0 %v6174_v19  ;;  %3978 = vmatprep.subr.bf16.mxu1 %v6176_v20 }
 0xb27   :  { %3938 = vmatpush1.bf16.msra.mxu0 %v6180_v21  ;;  %3979 = vmatpush1.bf16.msra.mxu1 %v6182_v14 }
 0xb28   :  { %3939 = vmatprep.subr.bf16.mxu0 %v6186_v15  ;;  %3980 = vmatprep.subr.bf16.mxu1 %v6188_v22 }
 0xb2b   :  { %3940 = vmatpush1.bf16.msra.mxu0 %v6192_v38  ;;  %3981 = vmatpush1.bf16.msra.mxu1 %v6194_v39 }
 0xb2c   :  { %3941 = vmatprep.subr.bf16.mxu0 %v6198_v40  ;;  %3982 = vmatprep.subr.bf16.mxu1 %v6200_v41 }
 0xb2f   :  { %3942 = vmatpush1.bf16.msra.mxu0 %v6204_v42  ;;  %3983 = vmatpush1.bf16.msra.mxu1 %v6206_v43 }
 0xb30   :  { %4036 = vmatprep.subr.bf16.mxu0 %v6114_v26  ;;  %4077 = vmatprep.subr.bf16.mxu1 %v6116_v27 }
 0xbd2   :  { %v3837_v1 = vpop.f32.mrf.mxu0  ;;  %v3878_v63 = vpop.f32.mrf.mxu1 }
 0xbd3   :  { %v3889_v57 = vrot.slane %v3837_v1, 2  ;;  %v3891_v28 = vrot.slane %v3878_v63, 2 }
 0xbd4   :  { %v3839_v58 = vpop.f32.mrf.mxu0  ;;  %v3880_v59 = vpop.f32.mrf.mxu1 }
 0xbd5   :  { %v3897_v60 = vadd.f32 %v3889_v57, %v3796_v55  ;;  %v3890_v7 = vrot.slane %v3839_v58, 2  ;;  %v3899_v2 = vadd.f32 %v3891_v28, %v3798_v6  ;;  %v3892_v3 = vrot.slane %v3880_v59, 2 }
 0xbd6   :  { %v3841_v61 = vpop.f32.mrf.mxu0  ;;  %v3882_v10 = vpop.f32.mrf.mxu1 }
 0xbd7   :  { %5315 = vtanh.f32 %v3897_v60  ;;  %v3898_v62 = vadd.f32 %v3890_v7, %v3797_v29  ;;  %v3900_v23 = vadd.f32 %v3892_v3, %v3799_v4  ;;  %v3922_v10 = vld [vmem:[#allocation2 + $0x28] sm:$0x3] }
 0xbd8   :  { %v3842_v11 = vpop.f32.mrf.mxu0  ;;  %v3883_v31 = vpop.f32.mrf.mxu1 }
 0xbd9   :  { %5317 = vtanh.f32 %v3898_v62 }
 0xbda   :  { %5319 = vtanh.f32 %v3899_v2 }
 0xbdb   :  { %5321 = vtanh.f32 %v3900_v23 }
 0xbe4   :  { %v5316_v24 = vpop.eup %5315 }
 0xbe5   :  { %v3902_v56 = vmul.f32 0.5, %v5316_v24 }
 0xbe6   :  { %v5318_v25 = vpop.eup %5317 }
 0xbe7   :  { %v3903_v35 = vadd.f32 0.5, %v3902_v56  ;;  %v3905_v44 = vmul.f32 0.5, %v5318_v25  ;;  %v5320_v49 = vpop.eup %5319 }
 0xbe8   :  { %v5322_v63 = vpop.eup %5321 }
 0xbe9   :  { %v3906_v45 = vadd.f32 0.5, %v3905_v44  ;;  %v3915_v48 = vmul.f32 %v5320_v49, %v3903_v35  ;;  %v3909_v57 = vmul.f32 0.5, %v5322_v63 }
 0xbeb   :  { %v3914_v47 = vmul.f32 %v3912_v46, %v3906_v45  ;;  %v3910_v55 = vadd.f32 0.5, %v3909_v57 }
 0xbed   :  { %v6372_v1 = vadd.f32 %v3915_v48, %v3914_v47 }
 0xbef   :  { %5323 = vtanh.f32 %v6372_v1  ;;  %v4024_v35 = vrot.slane %v6372_v1, 6  ;;  %v6416_v1 = vld [vmem:[#allocation4 + $0x1e8] ss:$16 sps:$4 sm:$0xff]  }
 0xbfc   :  { %v5324_v58 = vpop.eup %5323 }
 0xbfd   :  { %v3918_v59 = vmul.f32 %v5324_v58, %v3910_v55 }
 0xbff   :  { %v3919_v60 = vpack.c.bf16 %v3918_v59, %v3918_v59  ;;  %v6413_v59 = vld [vmem:[#allocation4 + $0x1e0] ss:$16 sps:$4 sm:$0xff]  }
 0xc01   :  { %v3925_v28 = vrot.slane %v3919_v60, 3  ;;  %v6419_v60 = vld [vmem:[#allocation4 + $0x1c4] ss:$16 sps:$4 sm:$0xff]  }
 0xc03   :  { %3960 = vmatmul.mubr.bf16.vlgmr.msra.gmra.mxu0 %v3925_v28  ;;  %4001 = vmatmul.mubr.bf16.vlgmr.msra.gmra.mxu1 %v3925_v28  ;;  %v6422_v28 = vld [vmem:[#allocation4 + $0x1cc] ss:$16 sps:$4 sm:$0xff]  }
 0xc04   :  { %4037 = vmatpush1.bf16.msra.mxu0 %v6118_v36  ;;  %4078 = vmatpush1.bf16.msra.mxu1 %v6120_v50  ;;  %v3920_v36 = vld [vmem:[#allocation2 + $0x8] sm:$0x3] }
 0xc05   :  { %4038 = vmatprep.subr.bf16.mxu0 %v6122_v51  ;;  %4079 = vmatprep.subr.bf16.mxu1 %v6126_v52 }
 0xc06   :  { %4068 = vmatprep.mubr.bf16.mxu0 %v5580_v0  ;;  %4109 = vmatprep.mubr.bf16.mxu1 %v5580_v0 }
 0xc08   :  { %4039 = vmatpush1.bf16.msra.mxu0 %v6128_v53  ;;  %4080 = vmatpush1.bf16.msra.mxu1 %v6132_v54 }
 0xc09   :  { %4040 = vmatprep.subr.bf16.mxu0 %v6136_v30  ;;  %4081 = vmatprep.subr.bf16.mxu1 %v6138_v32 }
 0xc0c   :  { %4041 = vmatpush1.bf16.msra.mxu0 %v6144_v33  ;;  %4082 = vmatpush1.bf16.msra.mxu1 %v6146_v34 }
 0xc0d   :  { %4042 = vmatprep.subr.bf16.mxu0 %v6148_v37  ;;  %4083 = vmatprep.subr.bf16.mxu1 %v6152_v5 }
 0xc10   :  { %4043 = vmatpush1.bf16.msra.mxu0 %v6154_v9  ;;  %4084 = vmatpush1.bf16.msra.mxu1 %v6156_v16 }
 0xc11   :  { %4044 = vmatprep.subr.bf16.mxu0 %v6158_v17  ;;  %4085 = vmatprep.subr.bf16.mxu1 %v6160_v18 }
 0xc14   :  { %4045 = vmatpush1.bf16.msra.mxu0 %v6166_v12  ;;  %4086 = vmatpush1.bf16.msra.mxu1 %v6168_v13 }
 0xc15   :  { %4046 = vmatprep.subr.bf16.mxu0 %v6174_v19  ;;  %4087 = vmatprep.subr.bf16.mxu1 %v6176_v20 }
 0xc18   :  { %4047 = vmatpush1.bf16.msra.mxu0 %v6180_v21  ;;  %4088 = vmatpush1.bf16.msra.mxu1 %v6182_v14 }
 0xc19   :  { %4048 = vmatprep.subr.bf16.mxu0 %v6186_v15  ;;  %4089 = vmatprep.subr.bf16.mxu1 %v6188_v22 }
 0xc1c   :  { %4049 = vmatpush1.bf16.msra.mxu0 %v6192_v38  ;;  %4090 = vmatpush1.bf16.msra.mxu1 %v6194_v39 }
 0xc1d   :  { %4050 = vmatprep.subr.bf16.mxu0 %v6198_v40  ;;  %4091 = vmatprep.subr.bf16.mxu1 %v6200_v41 }
 0xc20   :  { %4051 = vmatpush1.bf16.msra.mxu0 %v6204_v42  ;;  %4092 = vmatpush1.bf16.msra.mxu1 %v6206_v43 }
 0xc21   :  { %4160 = vmatprep.subr.bf16.mxu0 %v6114_v26  ;;  %4201 = vmatprep.subr.bf16.mxu1 %v6116_v27  ;;  %v3923_v26 = vld [vmem:[#allocation2 + $0x38] sm:$0x3] }
 0xcc3   :  { %v3961_v50 = vpop.f32.mrf.mxu0  ;;  %v4002_v51 = vpop.f32.mrf.mxu1 }
 0xcc4   :  { %v4009_v52 = vadd.f32 %v3961_v50, %v3920_v36  ;;  %v4011_v11 = vadd.f32 %v4002_v51, %v3922_v10 }
 0xcc5   :  { %v3963_v7 = vpop.f32.mrf.mxu0  ;;  %v4004_v29 = vpop.f32.mrf.mxu1 }
 0xcc6   :  { %5325 = vtanh.f32 %v4009_v52  ;;  %v4010_v61 = vadd.f32 %v3963_v7, %v3921_v8  ;;  %v4012_v3 = vadd.f32 %v4004_v29, %v3923_v26  ;;  %v5371_v26 = vld [vmem:[#allocation4 + $0x1c0] ss:$16 sps:$4 sm:$0xff]  }
 0xcc7   :  { %v3965_v62 = vpop.f32.mrf.mxu0  ;;  %v4006_v6 = vpop.f32.mrf.mxu1 }
 0xcc8   :  { %5327 = vtanh.f32 %v4010_v61 }
 0xcc9   :  { %v3966_v31 = vpop.f32.mrf.mxu0  ;;  %v4007_v2 = vpop.f32.mrf.mxu1  ;;  %5329 = vtanh.f32 %v4011_v11 }
 0xcca   :  { %5331 = vtanh.f32 %v4012_v3  ;;  %v5372_v3 = vld [vmem:[#allocation4 + $0x1c8] ss:$16 sps:$4 sm:$0xff]  }
 0xcd3   :  { %v5326_v27 = vpop.eup %5325 }
 0xcd4   :  { %v4014_v4 = vmul.f32 0.5, %v5326_v27  ;;  %v5373_v27 = vld [vmem:[#allocation4 + $0x1a4] ss:$16 sps:$4 sm:$0xff]  }
 0xcd5   :  { %v5328_v23 = vpop.eup %5327 }
 0xcd6   :  { %v4015_v24 = vadd.f32 0.5, %v4014_v4  ;;  %v4017_v56 = vmul.f32 0.5, %v5328_v23  ;;  %v5330_v44 = vpop.eup %5329  ;;  %v5374_v4 = vld [vmem:[#allocation4 + $0x1ac] ss:$16 sps:$4 sm:$0xff]   ;;  %v5375_v23 = vld [vmem:[#allocation4 + $0x1a0] ss:$16 sps:$4 sm:$0xff]  }
 0xcd7   :  { %v5332_v47 = vpop.eup %5331 }
 0xcd8   :  { %v4018_v25 = vadd.f32 0.5, %v4017_v56  ;;  %v4027_v46 = vmul.f32 %v5330_v44, %v4015_v24  ;;  %v4021_v48 = vmul.f32 0.5, %v5332_v47  ;;  %v5376_v24 = vld [vmem:[#allocation4 + $0x1a8] ss:$16 sps:$4 sm:$0xff]   ;;  %v5377_v56 = vld [vmem:[#allocation4 + $0x184] ss:$16 sps:$4 sm:$0xff]  }
 0xcd9   :  { %v5380_v44 = vld [vmem:[#allocation4 + $0x188] ss:$16 sps:$4 sm:$0xff]   ;;  %v5385_v47 = vld [vmem:[#allocation4 + $0x144] ss:$16 sps:$4 sm:$0xff]  }
 0xcda   :  { %v4026_v45 = vmul.f32 %v4024_v35, %v4018_v25  ;;  %v4022_v63 = vadd.f32 0.5, %v4021_v48  ;;  %v5378_v25 = vld [vmem:[#allocation4 + $0x18c] ss:$16 sps:$4 sm:$0xff]   ;;  %v5379_v35 = vld [vmem:[#allocation4 + $0x180] ss:$16 sps:$4 sm:$0xff]  }
 0xcdb   :  { %v5386_v48 = vld [vmem:[#allocation4 + $0x14c] ss:$16 sps:$4 sm:$0xff]  }
 0xcdc   :  { %v6410_v49 = vadd.f32 %v4027_v46, %v4026_v45  ;;  %v5382_v45 = vld [vmem:[#allocation4 + $0x16c] ss:$16 sps:$4 sm:$0xff]   ;;  %v5383_v46 = vld [vmem:[#allocation4 + $0x160] ss:$16 sps:$4 sm:$0xff]  }
 0xcde   :  { %5333 = vtanh.f32 %v6410_v49  ;;  %v4145_v51 = vrot.slane %v6410_v49, 6  ;;  %v5384_v49 = vld [vmem:[#allocation4 + $0x168] ss:$16 sps:$4 sm:$0xff]  }
 0xceb   :  { %v5334_v57 = vpop.eup %5333 }
 0xcec   :  { %v4030_v55 = vmul.f32 %v5334_v57, %v4022_v63  ;;  %v5387_v63 = vld [vmem:[#allocation4 + $0x140] ss:$16 sps:$4 sm:$0xff]   ;;  %v5388_v57 = vld [vmem:[#allocation4 + $0x148] ss:$16 sps:$4 sm:$0xff]  }
 0xcee   :  { %v4031_v58 = vpack.c.bf16 %v4030_v55, %v4030_v55  ;;  %v5389_v55 = vld [vmem:[#allocation4 + $0x124] ss:$16 sps:$4 sm:$0xff]  }
 0xcf0   :  { %4069 = vmatmul.mubr.bf16.vlgmr.msra.gmra.mxu0 %v4031_v58  ;;  %4110 = vmatmul.mubr.bf16.vlgmr.msra.gmra.mxu1 %v4031_v58  ;;  %v5390_v58 = vld [vmem:[#allocation4 + $0x12c] ss:$16 sps:$4 sm:$0xff]  }
 0xcf1   :  { %4161 = vmatpush1.bf16.msra.mxu0 %v6413_v59  ;;  %4202 = vmatpush1.bf16.msra.mxu1 %v6416_v1 }
 0xcf2   :  { %4162 = vmatprep.subr.bf16.mxu0 %v6419_v60  ;;  %4203 = vmatprep.subr.bf16.mxu1 %v6422_v28 }
 0xcf3   :  { %4192 = vmatprep.mubr.bf16.mxu0 %v5580_v0  ;;  %4233 = vmatprep.mubr.bf16.mxu1 %v5580_v0 }
 0xcf5   :  { %4163 = vmatpush1.bf16.msra.mxu0 %v6128_v53  ;;  %4204 = vmatpush1.bf16.msra.mxu1 %v6132_v54  ;;  %v5369_v53 = vld [vmem:[#allocation4 + $0x1e4] ss:$16 sps:$4 sm:$0xff]   ;;  %v5370_v54 = vld [vmem:[#allocation4 + $0x1ec] ss:$16 sps:$4 sm:$0xff]  }
 0xcf6   :  { %4164 = vmatprep.subr.bf16.mxu0 %v6136_v30  ;;  %4205 = vmatprep.subr.bf16.mxu1 %v6138_v32 }
 0xcf9   :  { %4165 = vmatpush1.bf16.msra.mxu0 %v6144_v33  ;;  %4206 = vmatpush1.bf16.msra.mxu1 %v6146_v34  ;;  %v4032_v34 = vld [vmem:[#allocation2 + $0x8] sm:$0xc] }
 0xcfa   :  { %4166 = vmatprep.subr.bf16.mxu0 %v6148_v37  ;;  %4207 = vmatprep.subr.bf16.mxu1 %v6152_v5 }
 0xcfd   :  { %4167 = vmatpush1.bf16.msra.mxu0 %v6154_v9  ;;  %4208 = vmatpush1.bf16.msra.mxu1 %v6156_v16 }
 0xcfe   :  { %4168 = vmatprep.subr.bf16.mxu0 %v6158_v17  ;;  %4209 = vmatprep.subr.bf16.mxu1 %v6160_v18  ;;  %v4033_v18 = vld [vmem:[#allocation2 + $0x20] sm:$0xc] }
 0xd01   :  { %4169 = vmatpush1.bf16.msra.mxu0 %v6166_v12  ;;  %4210 = vmatpush1.bf16.msra.mxu1 %v6168_v13 }
 0xd02   :  { %4170 = vmatprep.subr.bf16.mxu0 %v6174_v19  ;;  %4211 = vmatprep.subr.bf16.mxu1 %v6176_v20  ;;  %v4034_v20 = vld [vmem:[#allocation2 + $0x28] sm:$0xc] }
 0xd05   :  { %4171 = vmatpush1.bf16.msra.mxu0 %v6180_v21  ;;  %4212 = vmatpush1.bf16.msra.mxu1 %v6182_v14 }
 0xd06   :  { %4172 = vmatprep.subr.bf16.mxu0 %v6186_v15  ;;  %4213 = vmatprep.subr.bf16.mxu1 %v6188_v22 }
 0xd09   :  { %4173 = vmatpush1.bf16.msra.mxu0 %v6192_v38  ;;  %4214 = vmatpush1.bf16.msra.mxu1 %v6194_v39  ;;  %v4035_v38 = vld [vmem:[#allocation2 + $0x38] sm:$0xc] }
 0xd0a   :  { %4174 = vmatprep.subr.bf16.mxu0 %v6198_v40  ;;  %4215 = vmatprep.subr.bf16.mxu1 %v6200_v41 }
 0xd0d   :  { %4175 = vmatpush1.bf16.msra.mxu0 %v6204_v42  ;;  %4216 = vmatpush1.bf16.msra.mxu1 %v6206_v43 }
 0xd0e   :  { %4284 = vmatprep.subr.bf16.mxu0 %v5369_v53  ;;  %4325 = vmatprep.subr.bf16.mxu1 %v5370_v54  ;;  %v5395_v53 = vld [vmem:[#allocation4 + $0x100] ss:$16 sps:$4 sm:$0xff]   ;;  %v5396_v54 = vld [vmem:[#allocation4 + $0x108] ss:$16 sps:$4 sm:$0xff]  }
 0xdb0   :  { %v4070_v30 = vpop.f32.mrf.mxu0  ;;  %v4111_v32 = vpop.f32.mrf.mxu1 }
 0xdb1   :  { %v4122_v33 = vrot.slane %v4070_v30, 6  ;;  %v4124_v16 = vrot.slane %v4111_v32, 6 }
 0xdb2   :  { %v4072_v37 = vpop.f32.mrf.mxu0  ;;  %v4113_v5 = vpop.f32.mrf.mxu1 }
 0xdb3   :  { %v4130_v9 = vadd.f32 %v4122_v33, %v4032_v34  ;;  %v4123_v17 = vrot.slane %v4072_v37, 6  ;;  %v4132_v15 = vadd.f32 %v4124_v16, %v4034_v20  ;;  %v4125_v22 = vrot.slane %v4113_v5, 6  ;;  %v4153_v34 = vld [vmem:[#allocation2 + $0x8] sm:$0x30] }
 0xdb4   :  { %v4074_v12 = vpop.f32.mrf.mxu0  ;;  %v4115_v13 = vpop.f32.mrf.mxu1  ;;  %v4155_v20 = vld [vmem:[#allocation2 + $0x28] sm:$0x30] }
 0xdb5   :  { %5335 = vtanh.f32 %v4130_v9  ;;  %v4131_v19 = vadd.f32 %v4123_v17, %v4033_v18  ;;  %v4133_v39 = vadd.f32 %v4125_v22, %v4035_v38  ;;  %v4154_v18 = vld [vmem:[#allocation2 + $0x20] sm:$0x30]  ;;  %v4156_v38 = vld [vmem:[#allocation2 + $0x38] sm:$0x30] }
 0xdb6   :  { %v4075_v21 = vpop.f32.mrf.mxu0  ;;  %v4116_v14 = vpop.f32.mrf.mxu1 }
 0xdb7   :  { %5337 = vtanh.f32 %v4131_v19 }
 0xdb8   :  { %5339 = vtanh.f32 %v4132_v15 }
 0xdb9   :  { %5341 = vtanh.f32 %v4133_v39 }
 0xdc2   :  { %v5336_v40 = vpop.eup %5335 }
 0xdc3   :  { %v4135_v41 = vmul.f32 0.5, %v5336_v40 }
 0xdc4   :  { %v5338_v42 = vpop.eup %5337 }
 0xdc5   :  { %v4136_v43 = vadd.f32 0.5, %v4135_v41  ;;  %v4138_v36 = vmul.f32 0.5, %v5338_v42  ;;  %v5340_v52 = vpop.eup %5339 }
 0xdc6   :  { %v5342_v61 = vpop.eup %5341 }
 0xdc7   :  { %v4139_v50 = vadd.f32 0.5, %v4138_v36  ;;  %v4148_v7 = vmul.f32 %v5340_v52, %v4136_v43  ;;  %v4142_v10 = vmul.f32 0.5, %v5342_v61 }
 0xdc9   :  { %v4147_v8 = vmul.f32 %v4145_v51, %v4139_v50  ;;  %v4143_v62 = vadd.f32 0.5, %v4142_v10 }
 0xdcb   :  { %v6454_v29 = vadd.f32 %v4148_v7, %v4147_v8 }
 0xdcd   :  { %5343 = vtanh.f32 %v6454_v29  ;;  %v4269_v51 = vrot.slane %v6454_v29, 6  ;;  %v5278_v29 = vld [vmem:[#allocation14 + $0x30] sm:$0xff]  }
 0xdda   :  { %v5344_v6 = vpop.eup %5343 }
 0xddb   :  { %v4151_v11 = vmul.f32 %v5344_v6, %v4143_v62 }
 0xddd   :  { %v4152_v31 = vpack.c.bf16 %v4151_v11, %v4151_v11 }
 0xddf   :  { %v4158_v2 = vrot.slane %v4152_v31, 1 }
 0xde1   :  { %4193 = vmatmul.mubr.bf16.vlgmr.msra.gmra.mxu0 %v4158_v2  ;;  %4234 = vmatmul.mubr.bf16.vlgmr.msra.gmra.mxu1 %v4158_v2 }
 0xde2   :  { %4285 = vmatpush1.bf16.msra.mxu0 %v6413_v59  ;;  %4326 = vmatpush1.bf16.msra.mxu1 %v6416_v1  ;;  %v5391_v59 = vld [vmem:[#allocation4 + $0x120] ss:$16 sps:$4 sm:$0xff]   ;;  %v5392_v1 = vld [vmem:[#allocation4 + $0x128] ss:$16 sps:$4 sm:$0xff]  }
 0xde3   :  { %4286 = vmatprep.subr.bf16.mxu0 %v6419_v60  ;;  %4327 = vmatprep.subr.bf16.mxu1 %v6422_v28  ;;  %v5393_v60 = vld [vmem:[#allocation4 + $0x104] ss:$16 sps:$4 sm:$0xff]   ;;  %v5394_v28 = vld [vmem:[#allocation4 + $0x10c] ss:$16 sps:$4 sm:$0xff]  }
 0xde4   :  { %4316 = vmatprep.mubr.bf16.mxu0 %v5580_v0  ;;  %4357 = vmatprep.mubr.bf16.mxu1 %v5580_v0  ;;  %v5381_v0 = vld [vmem:[#allocation4 + $0x164] ss:$16 sps:$4 sm:$0xff]  }
 0xde6   :  { %4287 = vmatpush1.bf16.msra.mxu0 %v5371_v26  ;;  %4328 = vmatpush1.bf16.msra.mxu1 %v5372_v3  ;;  %v5277_v3 = vld [vmem:[#allocation14 + $0x38] sm:$0xff]  }
 0xde7   :  { %4288 = vmatprep.subr.bf16.mxu0 %v5373_v27  ;;  %4329 = vmatprep.subr.bf16.mxu1 %v5374_v4  ;;  %v5583_v27 = vmov 0.0   ;;  %v5279_v4 = vld [vmem:[#allocation14 + $0x28] sm:$0xff]  }
 0xdea   :  { %4289 = vmatpush1.bf16.msra.mxu0 %v5375_v23  ;;  %4330 = vmatpush1.bf16.msra.mxu1 %v5376_v24  ;;  %v5280_v23 = vld [vmem:[#allocation14 + $0x20] sm:$0xff]   ;;  %v5281_v24 = vld [vmem:[#allocation14 + $0x18] sm:$0xff]  }
 0xdeb   :  { %4290 = vmatprep.subr.bf16.mxu0 %v5377_v56  ;;  %4331 = vmatprep.subr.bf16.mxu1 %v5378_v25  ;;  %v5282_v56 = vld [vmem:[#allocation14 + $0x10] sm:$0xff]   ;;  %v5283_v25 = vld [vmem:[#allocation14 + $0x8] sm:$0xff]  }
 0xdee   :  { %4291 = vmatpush1.bf16.msra.mxu0 %v5379_v35  ;;  %4332 = vmatpush1.bf16.msra.mxu1 %v5380_v44  ;;  %v5284_v35 = vld [vmem:[#allocation14] sm:$0xff]  }
 0xdef   :  { %4292 = vmatprep.subr.bf16.mxu0 %v5381_v0  ;;  %4333 = vmatprep.subr.bf16.mxu1 %v5382_v45 }
 0xdf2   :  { %4293 = vmatpush1.bf16.msra.mxu0 %v5383_v46  ;;  %4334 = vmatpush1.bf16.msra.mxu1 %v5384_v49  ;;  %v4277_v46 = vld [vmem:[#allocation2 + $0x8] sm:$0xc0] }
 0xdf3   :  { %4294 = vmatprep.subr.bf16.mxu0 %v5385_v47  ;;  %4335 = vmatprep.subr.bf16.mxu1 %v5386_v48 }
 0xdf6   :  { %4295 = vmatpush1.bf16.msra.mxu0 %v5387_v63  ;;  %4336 = vmatpush1.bf16.msra.mxu1 %v5388_v57 }
 0xdf7   :  { %4296 = vmatprep.subr.bf16.mxu0 %v5389_v55  ;;  %4337 = vmatprep.subr.bf16.mxu1 %v5390_v58  ;;  %v4278_v55 = vld [vmem:[#allocation2 + $0x20] sm:$0xc0] }
 0xdfa   :  { %4297 = vmatpush1.bf16.msra.mxu0 %v5391_v59  ;;  %4338 = vmatpush1.bf16.msra.mxu1 %v5392_v1 }
 0xdfb   :  { %4298 = vmatprep.subr.bf16.mxu0 %v5393_v60  ;;  %4339 = vmatprep.subr.bf16.mxu1 %v5394_v28  ;;  %v4279_v60 = vld [vmem:[#allocation2 + $0x28] sm:$0xc0] }
 0xdfe   :  { %4299 = vmatpush1.bf16.msra.mxu0 %v5395_v53  ;;  %4340 = vmatpush1.bf16.msra.mxu1 %v5396_v54 }
 0xdff   :  { %4919 = vmatprep.subr.bf16.mxu0 %v5583_v27 }
 0xea1   :  { %v4194_v30 = vpop.f32.mrf.mxu0  ;;  %v4235_v32 = vpop.f32.mrf.mxu1 }
 0xea2   :  { %v4246_v33 = vrot.slane %v4194_v30, 4  ;;  %v4248_v16 = vrot.slane %v4235_v32, 4  ;;  %v4280_v32 = vld [vmem:[#allocation2 + $0x38] sm:$0xc0] }
 0xea3   :  { %v4196_v37 = vpop.f32.mrf.mxu0  ;;  %v4237_v5 = vpop.f32.mrf.mxu1 }
 0xea4   :  { %v4254_v9 = vadd.f32 %v4246_v33, %v4153_v34  ;;  %v4247_v17 = vrot.slane %v4196_v37, 4  ;;  %v4256_v15 = vadd.f32 %v4248_v16, %v4155_v20  ;;  %v4249_v22 = vrot.slane %v4237_v5, 4 }
 0xea5   :  { %v4198_v12 = vpop.f32.mrf.mxu0  ;;  %v4239_v13 = vpop.f32.mrf.mxu1 }
 0xea6   :  { %5345 = vtanh.f32 %v4254_v9  ;;  %v4255_v19 = vadd.f32 %v4247_v17, %v4154_v18  ;;  %v4257_v39 = vadd.f32 %v4249_v22, %v4156_v38 }
 0xea7   :  { %v4199_v21 = vpop.f32.mrf.mxu0  ;;  %v4240_v14 = vpop.f32.mrf.mxu1 }
 0xea8   :  { %5347 = vtanh.f32 %v4255_v19 }
 0xea9   :  { %5349 = vtanh.f32 %v4256_v15 }
 0xeaa   :  { %5351 = vtanh.f32 %v4257_v39 }
 0xeb3   :  { %v5346_v40 = vpop.eup %5345 }
 0xeb4   :  { %v4259_v41 = vmul.f32 0.5, %v5346_v40 }
 0xeb5   :  { %v5348_v42 = vpop.eup %5347 }
 0xeb6   :  { %v4260_v43 = vadd.f32 0.5, %v4259_v41  ;;  %v4262_v36 = vmul.f32 0.5, %v5348_v42  ;;  %v5350_v52 = vpop.eup %5349  ;;  %v4899_v41 = vld [vmem:[%s6482_s8] ss:$0 sm:$0xff] }
 0xeb7   :  { %v5352_v10 = vpop.eup %5351 }
 0xeb8   :  { %v4263_v50 = vadd.f32 0.5, %v4262_v36  ;;  %v4272_v7 = vmul.f32 %v5350_v52, %v4260_v43  ;;  %v4266_v62 = vmul.f32 0.5, %v5352_v10 }
 0xeba   :  { %v4271_v8 = vmul.f32 %v4269_v51, %v4263_v50  ;;  %v4267_v6 = vadd.f32 0.5, %v4266_v62 }
 0xebc   :  { %v6464_v61 = vadd.f32 %v4272_v7, %v4271_v8 }
 0xebe   :  { %5353 = vtanh.f32 %v6464_v61  ;;  %v4393_v18 = vrot.slane %v6464_v61, 6 }
 0xecb   :  { %v5354_v11 = vpop.eup %5353 }
 0xecc   :  { %v4275_v31 = vmul.f32 %v5354_v11, %v4267_v6 }
 0xece   :  { %v4276_v2 = vpack.c.bf16 %v4275_v31, %v4275_v31 }
 0xed0   :  { %v4282_v26 = vrot.slane %v4276_v2, 2 }
 0xed2   :  { %4317 = vmatmul.mubr.bf16.vlgmr.msra.gmra.mxu0 %v4282_v26  ;;  %4358 = vmatmul.mubr.bf16.vlgmr.msra.gmra.mxu1 %v4282_v26 }
 0xed3   :  { %4920 = vmatpush3.bf16.msra.mxu0 %v5277_v3  ;;  %4935 = vmatprep.mubr.msk.bf16.mxu0 %vm5584_vm0, %v5583_v27 }
 0xed4   :  { %4921 = vmatprep.subr.bf16.mxu0 %v5583_v27 }
 0xed7   :  { %4922 = vmatpush3.bf16.msra.mxu0 %v5278_v29 }
 0xed8   :  { %4923 = vmatprep.subr.bf16.mxu0 %v5583_v27 }
 0xedb   :  { %4924 = vmatpush3.bf16.msra.mxu0 %v5279_v4 }
 0xedc   :  { %4925 = vmatprep.subr.bf16.mxu0 %v5583_v27 }
 0xedf   :  { %4926 = vmatpush3.bf16.msra.mxu0 %v5280_v23 }
 0xee0   :  { %4927 = vmatprep.subr.bf16.mxu0 %v5583_v27 }
 0xee3   :  { %4928 = vmatpush3.bf16.msra.mxu0 %v5281_v24 }
 0xee4   :  { %4929 = vmatprep.subr.bf16.mxu0 %v5583_v27 }
 0xee7   :  { %4930 = vmatpush3.bf16.msra.mxu0 %v5282_v56 }
 0xee8   :  { %4931 = vmatprep.subr.bf16.mxu0 %v5583_v27 }
 0xeeb   :  { %4932 = vmatpush3.bf16.msra.mxu0 %v5283_v25 }
 0xeec   :  { %4933 = vmatprep.subr.bf16.mxu0 %v5583_v27 }
 0xeef   :  { %4934 = vmatpush3.bf16.msra.mxu0 %v5284_v35 }
 0xf92   :  { %v4318_v44 = vpop.f32.mrf.mxu0  ;;  %v4359_v0 = vpop.f32.mrf.mxu1 }
 0xf93   :  { %v4370_v45 = vrot.slane %v4318_v44, 2  ;;  %v4372_v63 = vrot.slane %v4359_v0, 2 }
 0xf94   :  { %v4320_v49 = vpop.f32.mrf.mxu0  ;;  %v4361_v47 = vpop.f32.mrf.mxu1 }
 0xf95   :  { %v4378_v48 = vadd.f32 %v4370_v45, %v4277_v46  ;;  %v4371_v57 = vrot.slane %v4320_v49, 2  ;;  %v4380_v54 = vadd.f32 %v4372_v63, %v4279_v60  ;;  %v4373_v30 = vrot.slane %v4361_v47, 2 }
 0xf96   :  { %v4322_v58 = vpop.f32.mrf.mxu0  ;;  %v4363_v59 = vpop.f32.mrf.mxu1 }
 0xf97   :  { %5355 = vtanh.f32 %v4378_v48  ;;  %v4379_v1 = vadd.f32 %v4371_v57, %v4278_v55  ;;  %v4381_v33 = vadd.f32 %v4373_v30, %v4280_v32 }
 0xf98   :  { %v4323_v28 = vpop.f32.mrf.mxu0  ;;  %v4364_v53 = vpop.f32.mrf.mxu1 }
 0xf99   :  { %5357 = vtanh.f32 %v4379_v1 }
 0xf9a   :  { %5359 = vtanh.f32 %v4380_v54 }
 0xf9b   :  { %5361 = vtanh.f32 %v4381_v33 }
 0xfa4   :  { %v5356_v34 = vpop.eup %5355 }
 0xfa5   :  { %v4383_v37 = vmul.f32 0.5, %v5356_v34 }
 0xfa6   :  { %v5358_v5 = vpop.eup %5357 }
 0xfa7   :  { %v4384_v9 = vadd.f32 0.5, %v4383_v37  ;;  %v4386_v16 = vmul.f32 0.5, %v5358_v5  ;;  %v5360_v12 = vpop.eup %5359 }
 0xfa8   :  { %v5362_v21 = vpop.eup %5361 }
 0xfa9   :  { %v4387_v17 = vadd.f32 0.5, %v4386_v16  ;;  %v4396_v19 = vmul.f32 %v5360_v12, %v4384_v9  ;;  %v4390_v14 = vmul.f32 0.5, %v5362_v21 }
 0xfab   :  { %v4395_v13 = vmul.f32 %v4393_v18, %v4387_v17  ;;  %v4391_v15 = vadd.f32 0.5, %v4390_v14 }
 0xfad   :  { %v4397_v20 = vadd.f32 %v4396_v19, %v4395_v13 }
 0xfaf   :  { %5363 = vtanh.f32 %v4397_v20 }
 0xfbc   :  { %v5364_v22 = vpop.eup %5363 }
 0xfbd   :  { %v4399_v38 = vmul.f32 %v5364_v22, %v4391_v15 }
 0xfbf   :  { %v4400_v39 = vpack.c.bf16 %v4399_v38, %v4399_v38 }
 0xfc1   :  { %v4425_v40 = vrot.slane %v4400_v39, 3 }
 0xfc3   :  { %4936 = vmatmul.mubr.bf16.vlgmr.msra.gmra.mxu0 %v4425_v40 }
0x1083   :  { %v4509_v42 = vpop.f32.mrf.mxu0 }
0x1084   :  { %v4510_v43 = vadd.f32 %v4899_v41, %v4509_v42 }
0x1085   :  { %v4937_v36 = vpop.f32.mrf.mxu0 }
0x1086   :  { %4515 = vst [vmem:[#allocation15] sm:$0x3] %v4510_v43 }
0x1087   :  { %v4512_v50 = vpop.f32.mrf.mxu0 }
0x1088   :  { %5548 = shalt.err (!%p5545_p11)
}
0x1089   :  { %4525 = dma.vmem_to_hbm [thread:$0]  %s4523_s26, 32, %s6483_s9, [#allocation8]   ;;  %v4938_v51 = vpop.f32.mrf.mxu0 }
0x108a   :  { %5567 = dma.done.wait [#allocation8], 32  }
0x108b   :  { %5568 = vsyncadd [#allocation8], 4294967264 }
0x108c   :  { %4529 = vsyncpa [#allocation7], 1 }
0x108d   :  { %4530 = vsyncpa [#allocation10], 1 }
0x108e   :  { %4531 = vsyncpa [#allocation13], 1 }
0x108f   :  { %4532 = vsyncpa [#allocation8], 1 }
0x1090   :  { %4533 = vsyncmov [#allocation5] }
0x1093   :  { %s4534_s8 = vpop.sfrf %4533 }
0x1094   :  { %p4908_p12 = scmp.ne.s32.totalorder %s4534_s8, 0 }
0x1096   :  { %4538 = shalt.err (%p4908_p12)  }
0x1097   :  { %4540 = vsyncmov [#allocation5 + $0x1] }
0x109a   :  { %s4541_s30 = vpop.sfrf %4540 }
0x109b   :  { %p4909_p13 = scmp.ne.s32.totalorder %s4541_s30, 0 }
0x109d   :  { %4545 = shalt.err (%p4909_p13)  }

</bundles_post_ra>
